<compile_context>
chip_gen: v5e
topology: v5e:2x2
jax: 0.10.0
libtpu: 0.0.40
codegen_flags: <defaults>
</compile_context>

<pallas_src>
import functools

import jax
import jax.numpy as jnp
from jax.experimental import pallas as pl
from jax.experimental.pallas import tpu as pltpu

_VMEM_LIMIT_BYTES = 32 * 1024 * 1024
_FUSED_F32_BYTES_MAX = 2 * 1024 * 1024       # per-batch f32 image size for the fused path
_HW_BLOCK_TARGET_BYTES = 3 * 1024 * 1024     # streaming x-block target (safe on v5e/v6e/v7x)


def _round_up(n, m):
    return (n + m - 1) // m * m


def _pick_hw_tile(hw, c, itemsize, target_bytes):
    """Largest 128-multiple lane tile with C*T*itemsize <= ~target; full width if it fits."""
    cap = max(128, (target_bytes // max(1, c * itemsize)) // 128 * 128)
    if hw <= cap:
        return hw                    # single tile, equals the full dim (no alignment needed)
    return cap


def _rowcol_map(length, w):
    """Flat-HW -> (row, col) int32 maps, built once by XLA (tiny)."""
    lane = jnp.arange(length, dtype=jnp.int32)
    return jnp.stack([lane // w, lane % w], axis=0)        # (2, length)


# ---------------------------------------------------------------------------
# Shared in-kernel helpers
# ---------------------------------------------------------------------------
def _channel_mlp(avg, mx, w1t, w2):
    """sigmoid(W2 @ relu(W1 @ avg) + W2 @ relu(W1 @ mx)); VPU/XLU only (no MXU matvec)."""
    h = (jnp.maximum(jnp.sum(w1t * avg, axis=0, keepdims=True), 0.0)
         + jnp.maximum(jnp.sum(w1t * mx, axis=0, keepdims=True), 0.0))      # (1, HID)
    return jax.nn.sigmoid(jnp.sum(w2 * h, axis=-1, keepdims=True))          # (C, 1)


def _conv7x7_sigmoid_flat(stats, row, col, w_ref, H, W):
    """7x7 zero-padded conv (2->1 ch) + sigmoid over flat-HW stats.

    stats: (2, L) f32 value (row 0 = channel-mean, row 1 = channel-max), L % 128 == 0.
    row/col: (1, L) int32 flat->2D index maps.  w_ref: (98,) f32 in SMEM (OIHW flat).
    Returns (1, L); only lanes < H*W are meaningful (tail garbage is masked out of
    every valid output by the row/col validity masks).
    """
    L = stats.shape[-1]
    acc = jnp.zeros((1, L), jnp.float32)
    for kh in range(7):
        dr = kh - 3
        rv = jnp.logical_and(row >= -dr, row < H - dr)
        for kw in range(7):
            dc = kw - 3
            cv = jnp.logical_and(col >= -dc, col < W - dc)
            valid = jnp.logical_and(rv, cv)
            shift = (-(dr * W + dc)) % L
            for ci in range(2):
                ch = stats[ci:ci + 1, :]                                   # (1, L)
                src = ch if shift == 0 else pltpu.roll(ch, shift, axis=1)  # XLU lane roll
                acc = acc + w_ref[ci * 49 + kh * 7 + kw] * jnp.where(valid, src, 0.0)
    return jax.nn.sigmoid(acc)


# ---------------------------------------------------------------------------
# Fully-fused path: one kernel per batch element (x read once, written once)
# ---------------------------------------------------------------------------
def _fused_kernel(x_ref, w1t_ref, w2_ref, wsp_ref, rc_ref, o_ref, stats_sc, *, H, W):
    HW = H * W
    x = x_ref[0].astype(jnp.float32)                        # (C, HW)
    ch_sum = jnp.sum(x, axis=-1, keepdims=True)             # (C, 1)
    ch_max = jnp.max(x, axis=-1, keepdims=True)             # (C, 1)
    ca = _channel_mlp(ch_sum * (1.0 / HW), ch_max,
                      w1t_ref[...].astype(jnp.float32),
                      w2_ref[...].astype(jnp.float32))      # (C, 1)
    xg = x * ca                                             # channel-gated x
    stats_sc[0:1, :HW] = jnp.mean(xg, axis=0, keepdims=True)
    stats_sc[1:2, :HW] = jnp.max(xg, axis=0, keepdims=True)
    rc = rc_ref[...]
    sa = _conv7x7_sigmoid_flat(stats_sc[...], rc[0:1, :], rc[1:2, :],
                               wsp_ref, H, W)               # (1, HWp)
    o_ref[0] = (xg * sa[:, :HW]).astype(o_ref.dtype)


# ---------------------------------------------------------------------------
# Streaming pass 1: channel gate ca = sigmoid(fc(avg) + fc(max)),  ca: (B, C, 1)
# ---------------------------------------------------------------------------
def _channel_attn_kernel(x_ref, w1t_ref, w2_ref, ca_ref, sum_sc, max_sc,
                         *, hw, t_hw, ragged):
    t = pl.program_id(1)
    nt = pl.num_programs(1)

    @pl.when(t == 0)
    def _():
        sum_sc[...] = jnp.zeros_like(sum_sc)
        max_sc[...] = jnp.full_like(max_sc, -jnp.inf)

    x = x_ref[0].astype(jnp.float32)                        # (C, T_HW)

    if ragged:
        @pl.when(t < nt - 1)
        def _():
            sum_sc[...] += jnp.sum(x, axis=-1, keepdims=True)
            max_sc[...] = jnp.maximum(max_sc[...], jnp.max(x, axis=-1, keepdims=True))

        @pl.when(t == nt - 1)
        def _():
            lane = jax.lax.broadcasted_iota(jnp.int32, (1, t_hw), 1)
            mask = (t * t_hw + lane) < hw                   # (1, T_HW) -> broadcasts over C
            sum_sc[...] += jnp.sum(jnp.where(mask, x, 0.0), axis=-1, keepdims=True)
            max_sc[...] = jnp.maximum(
                max_sc[...],
                jnp.max(jnp.where(mask, x, -jnp.inf), axis=-1, keepdims=True))
    else:
        sum_sc[...] += jnp.sum(x, axis=-1, keepdims=True)
        max_sc[...] = jnp.maximum(max_sc[...], jnp.max(x, axis=-1, keepdims=True))

    @pl.when(t == nt - 1)
    def _():
        ca = _channel_mlp(sum_sc[...] * (1.0 / hw), max_sc[...],
                          w1t_ref[...].astype(jnp.float32),
                          w2_ref[...].astype(jnp.float32))
        ca_ref[0] = ca.astype(ca_ref.dtype)


# ---------------------------------------------------------------------------
# Streaming pass 2: channel-gated per-pixel mean/max into VMEM scratch, then the
# 7x7 conv + sigmoid fused into the t==last finalize -> sa (B, 1, SA_W)
# ---------------------------------------------------------------------------
def _stats_conv_kernel(x_ref, ca_ref, wsp_ref, rc_ref, sa_ref, stats_sc, *, H, W, t_hw):
    t = pl.program_id(1)
    x = x_ref[0].astype(jnp.float32)                        # (C, T_HW)
    ca = ca_ref[0].astype(jnp.float32)                      # (C, 1)
    xg = x * ca
    if t_hw % 128 == 0:
        off = pl.multiple_of(t * t_hw, 128)
    else:
        off = t * t_hw                                      # single-tile case (t == 0)
    stats_sc[0:1, pl.ds(off, t_hw)] = jnp.mean(xg, axis=0, keepdims=True)
    stats_sc[1:2, pl.ds(off, t_hw)] = jnp.max(xg, axis=0, keepdims=True)

    @pl.when(t == pl.num_programs(1) - 1)
    def _():
        rc = rc_ref[...]
        sa = _conv7x7_sigmoid_flat(stats_sc[...], rc[0:1, :], rc[1:2, :],
                                   wsp_ref, H, W)           # (1, SA_W)
        sa_ref[0] = sa.astype(sa_ref.dtype)


# ---------------------------------------------------------------------------
# Streaming pass 3: out = x * ca * sa  (elementwise, HW-tiled)
# ---------------------------------------------------------------------------
def _apply_kernel(x_ref, ca_ref, sa_ref, o_ref):
    x = x_ref[0].astype(jnp.float32)                        # (C, T_HW)
    ca = ca_ref[0].astype(jnp.float32)                      # (C, 1)
    sa = sa_ref[0].astype(jnp.float32)[:, :x.shape[-1]]     # (1, T_HW)
    o_ref[0] = (x * ca * sa).astype(o_ref.dtype)


# ---------------------------------------------------------------------------
# Wrapper
# ---------------------------------------------------------------------------
def cbam(x, w1, w2, w_spatial, *, allow_fused=True,
         hw_block_bytes=_HW_BLOCK_TARGET_BYTES):
    """CBAM forward.  x: (B,C,H,W).  w1: (C//r, C).  w2: (C, C//r).  w_spatial: (1,2,7,7)."""
    B, C, H, W = x.shape
    HID = w1.shape[0]
    HW = H * W
    HWp = _round_up(HW, 128)
    dtype = x.dtype
    itemsize = jnp.dtype(dtype).itemsize

    x_f = x.reshape(B, C, HW)                               # free (contiguous) reshape
    w1_t = jnp.asarray(w1, jnp.float32).T                   # (C, HID) == W1^T
    w2_f = jnp.asarray(w2, jnp.float32)                     # (C, HID) == W2
    w_sp = w_spatial.reshape(-1).astype(jnp.float32)        # (98,)

    # ---- fully fused path: x read once + written once ----------------------
    if allow_fused and C * HWp * 4 <= _FUSED_F32_BYTES_MAX:
        rc = _rowcol_map(HWp, W)
        out = pl.pallas_call(
            functools.partial(_fused_kernel, H=H, W=W),
            out_shape=jax.ShapeDtypeStruct((B, C, HW), dtype),
            grid_spec=pltpu.PrefetchScalarGridSpec(
                num_scalar_prefetch=0,
                grid=(B,),
                in_specs=[
                    pl.BlockSpec((1, C, HW), lambda b: (b, 0, 0)),
                    pl.BlockSpec((C, HID), lambda b: (0, 0)),
                    pl.BlockSpec((C, HID), lambda b: (0, 0)),
                    pl.BlockSpec(memory_space=pltpu.MemorySpace.SMEM),   # 7x7 weights
                    pl.BlockSpec((2, HWp), lambda b: (0, 0)),            # row/col maps
                ],
                out_specs=pl.BlockSpec((1, C, HW), lambda b: (b, 0, 0)),
                scratch_shapes=[pltpu.VMEM((2, HWp), jnp.float32)],
            ),
            compiler_params=pltpu.CompilerParams(
                dimension_semantics=("parallel",),
                vmem_limit_bytes=_VMEM_LIMIT_BYTES),
        )(x_f, w1_t, w2_f, w_sp, rc)
        return out.reshape(B, C, H, W)

    # ---- streaming path -----------------------------------------------------
    T_HW = _pick_hw_tile(HW, C, itemsize, hw_block_bytes)
    n_t = (HW + T_HW - 1) // T_HW
    SA_W = _round_up(n_t * T_HW, 128)
    ragged = (HW % T_HW) != 0
    rc = _rowcol_map(SA_W, W)

    # Pass 1: channel attention gate.
    ca = pl.pallas_call(
        functools.partial(_channel_attn_kernel, hw=HW, t_hw=T_HW, ragged=ragged),
        out_shape=jax.ShapeDtypeStruct((B, C, 1), jnp.float32),
        grid_spec=pltpu.PrefetchScalarGridSpec(
            num_scalar_prefetch=0,
            grid=(B, n_t),
            in_specs=[
                pl.BlockSpec((1, C, T_HW), lambda b, t: (b, 0, t)),
                pl.BlockSpec((C, HID), lambda b, t: (0, 0)),
                pl.BlockSpec((C, HID), lambda b, t: (0, 0)),
            ],
            out_specs=pl.BlockSpec((1, C, 1), lambda b, t: (b, 0, 0)),
            scratch_shapes=[pltpu.VMEM((C, 1), jnp.float32),
                            pltpu.VMEM((C, 1), jnp.float32)],
        ),
        compiler_params=pltpu.CompilerParams(
            dimension_semantics=("parallel", "arbitrary"),
            vmem_limit_bytes=_VMEM_LIMIT_BYTES),
    )(x_f, w1_t, w2_f)

    # Pass 2: gated per-pixel stats + fused 7x7 conv + sigmoid -> sa (lane-dense).
    sa = pl.pallas_call(
        functools.partial(_stats_conv_kernel, H=H, W=W, t_hw=T_HW),
        out_shape=jax.ShapeDtypeStruct((B, 1, SA_W), jnp.float32),
        grid_spec=pltpu.PrefetchScalarGridSpec(
            num_scalar_prefetch=0,
            grid=(B, n_t),
            in_specs=[
                pl.BlockSpec((1, C, T_HW), lambda b, t: (b, 0, t)),
                pl.BlockSpec((1, C, 1), lambda b, t: (b, 0, 0)),
                pl.BlockSpec(memory_space=pltpu.MemorySpace.SMEM),       # 7x7 weights
                pl.BlockSpec((2, SA_W), lambda b, t: (0, 0)),            # row/col maps
            ],
            out_specs=pl.BlockSpec((1, 1, SA_W), lambda b, t: (b, 0, 0)),
            scratch_shapes=[pltpu.VMEM((2, SA_W), jnp.float32)],
        ),
        compiler_params=pltpu.CompilerParams(
            dimension_semantics=("parallel", "arbitrary"),
            vmem_limit_bytes=_VMEM_LIMIT_BYTES),
    )(x_f, ca, w_sp, rc)

    # Pass 3: out = x * ca * sa.
    if T_HW % 128 == 0:
        sa_blk, sa_map = T_HW, (lambda b, t: (b, 0, t))
    else:                                      # single (unaligned) tile: n_t == 1
        sa_blk, sa_map = SA_W, (lambda b, t: (b, 0, 0))

    out = pl.pallas_call(
        _apply_kernel,
        out_shape=jax.ShapeDtypeStruct((B, C, HW), dtype),
        grid_spec=pltpu.PrefetchScalarGridSpec(
            num_scalar_prefetch=0,
            grid=(B, n_t),
            in_specs=[
                pl.BlockSpec((1, C, T_HW), lambda b, t: (b, 0, t)),
                pl.BlockSpec((1, C, 1), lambda b, t: (b, 0, 0)),
                pl.BlockSpec((1, 1, sa_blk), sa_map),
            ],
            out_specs=pl.BlockSpec((1, C, T_HW), lambda b, t: (b, 0, t)),
        ),
        compiler_params=pltpu.CompilerParams(
            dimension_semantics=("parallel", "parallel"),
            vmem_limit_bytes=_VMEM_LIMIT_BYTES),
    )(x_f, ca, sa)

    return out.reshape(B, C, H, W)


# ---------------------------------------------------------------------------
# Pure-JAX reference (mirrors the PyTorch CBAM forward)
# ---------------------------------------------------------------------------
def _reference(x, w1, w2, w_spatial):
    avg = jnp.mean(x, axis=(2, 3))                          # (B,C)
    mx = jnp.max(x, axis=(2, 3))                            # (B,C)

    def fc(p):
        return jnp.maximum(p @ w1.T, 0.0) @ w2.T

    ca = jax.nn.sigmoid(fc(avg) + fc(mx))                   # (B,C)
    x1 = x * ca[:, :, None, None]

    a = jnp.mean(x1, axis=1, keepdims=True)                 # (B,1,H,W)
    m = jnp.max(x1, axis=1, keepdims=True)                  # (B,1,H,W)
    s = jnp.concatenate([a, m], axis=1)                     # (B,2,H,W)
    sa = jax.lax.conv_general_dilated(
        s, w_spatial, window_strides=(1, 1), padding=((3, 3), (3, 3)),
        dimension_numbers=("NCHW", "OIHW", "NCHW"))
    sa = jax.nn.sigmoid(sa)                                 # (B,1,H,W)
    return x1 * sa


if __name__ == "__main__":
    jax.config.update("jax_default_matmul_precision", "highest")

    def _run_case(B, C, H, W, reduction, allow_fused, hw_block_bytes, seed):
        key = jax.random.PRNGKey(seed)
        kx, k1, k2, k3 = jax.random.split(key, 4)
        hid = max(1, C // reduction)
        x = jax.random.normal(kx, (B, C, H, W), dtype=jnp.float32)
        # PyTorch layouts: fc1 (1x1 conv) weight (HID, C), fc2 weight (C, HID),
        # spatial conv weight (1, 2, 7, 7); all bias-free.
        w1 = jax.random.normal(k1, (hid, C), dtype=jnp.float32) * 0.1
        w2 = jax.random.normal(k2, (C, hid), dtype=jnp.float32) * 0.1
        w_sp = jax.random.normal(k3, (1, 2, 7, 7), dtype=jnp.float32) * 0.1

        fn = jax.jit(functools.partial(cbam, allow_fused=allow_fused,
                                       hw_block_bytes=hw_block_bytes))
        out = jax.block_until_ready(fn(x, w1, w2, w_sp))
        ref = _reference(x, w1, w2, w_sp)
        assert out.shape == (B, C, H, W)
        err = float(jnp.max(jnp.abs(out - ref)))
        assert jnp.allclose(out, ref, atol=1e-4, rtol=1e-4), (allow_fused, err)

    # Fully-fused single-kernel path (the expected path for small/medium maps).
    _run_case(2, 32, 16, 16, 8, True, _HW_BLOCK_TARGET_BYTES, 0)
    # Streaming path: single unaligned HW tile, conv fused into the pass-2 finalize.
    _run_case(2, 32, 12, 20, 8, False, _HW_BLOCK_TARGET_BYTES, 0)
    # Streaming path: multiple HW tiles with a ragged (masked) last tile.
    _run_case(2, 32, 12, 20, 8, False, 16 * 1024, 0)

    print("KERNEL_OK")
</pallas_src>

<mosaic_0001>
module attributes {stable_mosaic.version = 11 : i64} {
  func.func @_fused_kernel(%arg0: i32, %arg1: memref<1x32x256xf32, #tpu.memory_space<vmem>>, %arg2: memref<32x4xf32, #tpu.memory_space<vmem>>, %arg3: memref<32x4xf32, #tpu.memory_space<vmem>>, %arg4: memref<98xf32, #tpu.memory_space<smem>>, %arg5: memref<2x256xi32, #tpu.memory_space<vmem>>, %arg6: memref<1x32x256xf32, #tpu.memory_space<vmem>>, %arg7: memref<2x256xf32, #tpu.memory_space<vmem>>) attributes {dimension_semantics = [#tpu.dimension_semantics<parallel>], iteration_bounds = array<i64: 2>, scalar_prefetch = 0 : i64, scratch_operands = 1 : i64, tpu.core_type = #tpu.core_type<tc>, window_params = [{transform_indices = @transform_0, window_bounds = array<i64: 1, 32, 256>}, {pipeline_mode = #tpu.pipeline_mode<synchronous>, transform_indices = @transform_1, window_bounds = array<i64: 32, 4>}, {pipeline_mode = #tpu.pipeline_mode<synchronous>, transform_indices = @transform_2, window_bounds = array<i64: 32, 4>}, {transform_indices = @transform_3, window_bounds = array<i64: 98>}, {pipeline_mode = #tpu.pipeline_mode<synchronous>, transform_indices = @transform_4, window_bounds = array<i64: 2, 256>}, {transform_indices = @transform_5, window_bounds = array<i64: 1, 32, 256>}]} {
    %c0 = arith.constant 0 : index
    %c0_0 = arith.constant 0 : index
    %c0_1 = arith.constant 0 : index
    %0 = vector.load %arg1[%c0, %c0_0, %c0_1] : memref<1x32x256xf32, #tpu.memory_space<vmem>>, vector<1x32x256xf32>
    %1 = vector.shape_cast %0 : vector<1x32x256xf32> to vector<32x256xf32>
    %cst = arith.constant dense<0.000000e+00> : vector<32xf32>
    %2 = vector.multi_reduction <add>, %1, %cst [1] : vector<32x256xf32> to vector<32xf32>
    %3 = vector.shape_cast %2 : vector<32xf32> to vector<32x1xf32>
    %cst_2 = arith.constant dense<0xFF800000> : vector<32xf32>
    %4 = vector.multi_reduction <maximumf>, %1, %cst_2 [1] : vector<32x256xf32> to vector<32xf32>
    %5 = vector.shape_cast %4 : vector<32xf32> to vector<32x1xf32>
    %cst_3 = arith.constant 3.906250e-03 : f32
    %6 = vector.broadcast %cst_3 : f32 to vector<32x1xf32>
    %7 = arith.mulf %3, %6 : vector<32x1xf32>
    %c0_4 = arith.constant 0 : index
    %c0_5 = arith.constant 0 : index
    %8 = vector.load %arg2[%c0_4, %c0_5] : memref<32x4xf32, #tpu.memory_space<vmem>>, vector<32x4xf32>
    %c0_6 = arith.constant 0 : index
    %c0_7 = arith.constant 0 : index
    %9 = vector.load %arg3[%c0_6, %c0_7] : memref<32x4xf32, #tpu.memory_space<vmem>>, vector<32x4xf32>
    %10 = vector.broadcast %7 : vector<32x1xf32> to vector<32x4xf32>
    %11 = arith.mulf %8, %10 : vector<32x4xf32>
    %cst_8 = arith.constant dense<0.000000e+00> : vector<4xf32>
    %12 = vector.multi_reduction <add>, %11, %cst_8 [0] : vector<32x4xf32> to vector<4xf32>
    %13 = vector.shape_cast %12 : vector<4xf32> to vector<1x4xf32>
    %cst_9 = arith.constant 0.000000e+00 : f32
    %14 = vector.broadcast %cst_9 : f32 to vector<1x4xf32>
    %15 = arith.maximumf %13, %14 : vector<1x4xf32>
    %16 = vector.broadcast %5 : vector<32x1xf32> to vector<32x4xf32>
    %17 = arith.mulf %8, %16 : vector<32x4xf32>
    %cst_10 = arith.constant dense<0.000000e+00> : vector<4xf32>
    %18 = vector.multi_reduction <add>, %17, %cst_10 [0] : vector<32x4xf32> to vector<4xf32>
    %19 = vector.shape_cast %18 : vector<4xf32> to vector<1x4xf32>
    %cst_11 = arith.constant 0.000000e+00 : f32
    %20 = vector.broadcast %cst_11 : f32 to vector<1x4xf32>
    %21 = arith.maximumf %19, %20 : vector<1x4xf32>
    %22 = arith.addf %15, %21 : vector<1x4xf32>
    %23 = vector.broadcast %22 : vector<1x4xf32> to vector<32x4xf32>
    %24 = arith.mulf %9, %23 : vector<32x4xf32>
    %cst_12 = arith.constant dense<0.000000e+00> : vector<32xf32>
    %25 = vector.multi_reduction <add>, %24, %cst_12 [1] : vector<32x4xf32> to vector<32xf32>
    %26 = vector.shape_cast %25 : vector<32xf32> to vector<32x1xf32>
    %27 = arith.negf %26 : vector<32x1xf32>
    %28 = math.exp %27 : vector<32x1xf32>
    %cst_13 = arith.constant 1.000000e+00 : f32
    %29 = vector.broadcast %cst_13 : f32 to vector<32x1xf32>
    %30 = arith.addf %29, %28 : vector<32x1xf32>
    %31 = arith.divf %29, %30 : vector<32x1xf32>
    %32 = vector.broadcast %31 : vector<32x1xf32> to vector<32x256xf32>
    %33 = arith.mulf %1, %32 : vector<32x256xf32>
    %cst_14 = arith.constant dense<0.000000e+00> : vector<256xf32>
    %34 = vector.multi_reduction <add>, %33, %cst_14 [0] : vector<32x256xf32> to vector<256xf32>
    %35 = vector.shape_cast %34 : vector<256xf32> to vector<1x256xf32>
    %cst_15 = arith.constant 3.200000e+01 : f32
    %36 = vector.broadcast %cst_15 : f32 to vector<1x256xf32>
    %37 = arith.divf %35, %36 : vector<1x256xf32>
    %c0_16 = arith.constant 0 : index
    %c0_17 = arith.constant 0 : index
    %38 = vector.load %arg7[%c0_16, %c0_17] : memref<2x256xf32, #tpu.memory_space<vmem>>, vector<1x256xf32>
    tpu.vector_store %arg7[%c0_16, %c0_17], %37 {strides = array<i32>} : memref<2x256xf32, #tpu.memory_space<vmem>>, vector<1x256xf32>,
    %cst_18 = arith.constant dense<0xFF800000> : vector<256xf32>
    %39 = vector.multi_reduction <maximumf>, %33, %cst_18 [0] : vector<32x256xf32> to vector<256xf32>
    %40 = vector.shape_cast %39 : vector<256xf32> to vector<1x256xf32>
    %c1 = arith.constant 1 : index
    %c0_19 = arith.constant 0 : index
    %41 = vector.load %arg7[%c1, %c0_19] : memref<2x256xf32, #tpu.memory_space<vmem>>, vector<1x256xf32>
    tpu.vector_store %arg7[%c1, %c0_19], %40 {strides = array<i32>} : memref<2x256xf32, #tpu.memory_space<vmem>>, vector<1x256xf32>,
    %c0_20 = arith.constant 0 : index
    %c0_21 = arith.constant 0 : index
    %42 = vector.load %arg5[%c0_20, %c0_21] : memref<2x256xi32, #tpu.memory_space<vmem>>, vector<2x256xi32>
    %c0_22 = arith.constant 0 : index
    %c0_23 = arith.constant 0 : index
    %43 = vector.load %arg7[%c0_22, %c0_23] : memref<2x256xf32, #tpu.memory_space<vmem>>, vector<2x256xf32>
    %44 = vector.extract_strided_slice %42 {offsets = [0, 0], sizes = [1, 256], strides = [1, 1]} : vector<2x256xi32> to vector<1x256xi32>
    %45 = vector.extract_strided_slice %42 {offsets = [1, 0], sizes = [1, 256], strides = [1, 1]} : vector<2x256xi32> to vector<1x256xi32>
    %cst_24 = arith.constant 0.000000e+00 : f32
    %46 = vector.broadcast %cst_24 : f32 to vector<1x256xf32>
    %c3_i32 = arith.constant 3 : i32
    %47 = vector.broadcast %c3_i32 : i32 to vector<1x256xi32>
    %48 = arith.cmpi sge, %44, %47 : vector<1x256xi32>
    %c19_i32 = arith.constant 19 : i32
    %49 = vector.broadcast %c19_i32 : i32 to vector<1x256xi32>
    %50 = arith.cmpi slt, %44, %49 : vector<1x256xi32>
    %51 = arith.andi %48, %50 : vector<1x256xi1>
    %c3_i32_25 = arith.constant 3 : i32
    %52 = vector.broadcast %c3_i32_25 : i32 to vector<1x256xi32>
    %53 = arith.cmpi sge, %45, %52 : vector<1x256xi32>
    %c19_i32_26 = arith.constant 19 : i32
    %54 = vector.broadcast %c19_i32_26 : i32 to vector<1x256xi32>
    %55 = arith.cmpi slt, %45, %54 : vector<1x256xi32>
    %56 = arith.andi %53, %55 : vector<1x256xi1>
    %57 = arith.andi %51, %56 : vector<1x256xi1>
    %58 = vector.extract_strided_slice %43 {offsets = [0, 0], sizes = [1, 256], strides = [1, 1]} : vector<2x256xf32> to vector<1x256xf32>
    %c51_i32 = arith.constant 51 : i32
    %59 = tpu.dynamic_rotate %58 by %c51_i32 dim 1 : vector<1x256xf32>, i32 -> vector<1x256xf32>
    %c0_27 = arith.constant 0 : index
    %60 = memref.load %arg4[%c0_27] : memref<98xf32, #tpu.memory_space<smem>>
    %cst_28 = arith.constant 0.000000e+00 : f32
    %61 = vector.broadcast %cst_28 : f32 to vector<1x256xf32>
    %62 = arith.select %57, %59, %61 : vector<1x256xi1>, vector<1x256xf32>
    %63 = vector.broadcast %60 : f32 to vector<1x256xf32>
    %64 = arith.mulf %63, %62 : vector<1x256xf32>
    %65 = arith.addf %46, %64 : vector<1x256xf32>
    %66 = vector.extract_strided_slice %43 {offsets = [1, 0], sizes = [1, 256], strides = [1, 1]} : vector<2x256xf32> to vector<1x256xf32>
    %c51_i32_29 = arith.constant 51 : i32
    %67 = tpu.dynamic_rotate %66 by %c51_i32_29 dim 1 : vector<1x256xf32>, i32 -> vector<1x256xf32>
    %c49 = arith.constant 49 : index
    %68 = memref.load %arg4[%c49] : memref<98xf32, #tpu.memory_space<smem>>
    %cst_30 = arith.constant 0.000000e+00 : f32
    %69 = vector.broadcast %cst_30 : f32 to vector<1x256xf32>
    %70 = arith.select %57, %67, %69 : vector<1x256xi1>, vector<1x256xf32>
    %71 = vector.broadcast %68 : f32 to vector<1x256xf32>
    %72 = arith.mulf %71, %70 : vector<1x256xf32>
    %73 = arith.addf %65, %72 : vector<1x256xf32>
    %c2_i32 = arith.constant 2 : i32
    %74 = vector.broadcast %c2_i32 : i32 to vector<1x256xi32>
    %75 = arith.cmpi sge, %45, %74 : vector<1x256xi32>
    %c18_i32 = arith.constant 18 : i32
    %76 = vector.broadcast %c18_i32 : i32 to vector<1x256xi32>
    %77 = arith.cmpi slt, %45, %76 : vector<1x256xi32>
    %78 = arith.andi %75, %77 : vector<1x256xi1>
    %79 = arith.andi %51, %78 : vector<1x256xi1>
    %80 = vector.extract_strided_slice %43 {offsets = [0, 0], sizes = [1, 256], strides = [1, 1]} : vector<2x256xf32> to vector<1x256xf32>
    %c50_i32 = arith.constant 50 : i32
    %81 = tpu.dynamic_rotate %80 by %c50_i32 dim 1 : vector<1x256xf32>, i32 -> vector<1x256xf32>
    %c1_31 = arith.constant 1 : index
    %82 = memref.load %arg4[%c1_31] : memref<98xf32, #tpu.memory_space<smem>>
    %cst_32 = arith.constant 0.000000e+00 : f32
    %83 = vector.broadcast %cst_32 : f32 to vector<1x256xf32>
    %84 = arith.select %79, %81, %83 : vector<1x256xi1>, vector<1x256xf32>
    %85 = vector.broadcast %82 : f32 to vector<1x256xf32>
    %86 = arith.mulf %85, %84 : vector<1x256xf32>
    %87 = arith.addf %73, %86 : vector<1x256xf32>
    %88 = vector.extract_strided_slice %43 {offsets = [1, 0], sizes = [1, 256], strides = [1, 1]} : vector<2x256xf32> to vector<1x256xf32>
    %c50_i32_33 = arith.constant 50 : i32
    %89 = tpu.dynamic_rotate %88 by %c50_i32_33 dim 1 : vector<1x256xf32>, i32 -> vector<1x256xf32>
    %c50 = arith.constant 50 : index
    %90 = memref.load %arg4[%c50] : memref<98xf32, #tpu.memory_space<smem>>
    %cst_34 = arith.constant 0.000000e+00 : f32
    %91 = vector.broadcast %cst_34 : f32 to vector<1x256xf32>
    %92 = arith.select %79, %89, %91 : vector<1x256xi1>, vector<1x256xf32>
    %93 = vector.broadcast %90 : f32 to vector<1x256xf32>
    %94 = arith.mulf %93, %92 : vector<1x256xf32>
    %95 = arith.addf %87, %94 : vector<1x256xf32>
    %c1_i32 = arith.constant 1 : i32
    %96 = vector.broadcast %c1_i32 : i32 to vector<1x256xi32>
    %97 = arith.cmpi sge, %45, %96 : vector<1x256xi32>
    %c17_i32 = arith.constant 17 : i32
    %98 = vector.broadcast %c17_i32 : i32 to vector<1x256xi32>
    %99 = arith.cmpi slt, %45, %98 : vector<1x256xi32>
    %100 = arith.andi %97, %99 : vector<1x256xi1>
    %101 = arith.andi %51, %100 : vector<1x256xi1>
    %102 = vector.extract_strided_slice %43 {offsets = [0, 0], sizes = [1, 256], strides = [1, 1]} : vector<2x256xf32> to vector<1x256xf32>
    %c49_i32 = arith.constant 49 : i32
    %103 = tpu.dynamic_rotate %102 by %c49_i32 dim 1 : vector<1x256xf32>, i32 -> vector<1x256xf32>
    %c2 = arith.constant 2 : index
    %104 = memref.load %arg4[%c2] : memref<98xf32, #tpu.memory_space<smem>>
    %cst_35 = arith.constant 0.000000e+00 : f32
    %105 = vector.broadcast %cst_35 : f32 to vector<1x256xf32>
    %106 = arith.select %101, %103, %105 : vector<1x256xi1>, vector<1x256xf32>
    %107 = vector.broadcast %104 : f32 to vector<1x256xf32>
    %108 = arith.mulf %107, %106 : vector<1x256xf32>
    %109 = arith.addf %95, %108 : vector<1x256xf32>
    %110 = vector.extract_strided_slice %43 {offsets = [1, 0], sizes = [1, 256], strides = [1, 1]} : vector<2x256xf32> to vector<1x256xf32>
    %c49_i32_36 = arith.constant 49 : i32
    %111 = tpu.dynamic_rotate %110 by %c49_i32_36 dim 1 : vector<1x256xf32>, i32 -> vector<1x256xf32>
    %c51 = arith.constant 51 : index
    %112 = memref.load %arg4[%c51] : memref<98xf32, #tpu.memory_space<smem>>
    %cst_37 = arith.constant 0.000000e+00 : f32
    %113 = vector.broadcast %cst_37 : f32 to vector<1x256xf32>
    %114 = arith.select %101, %111, %113 : vector<1x256xi1>, vector<1x256xf32>
    %115 = vector.broadcast %112 : f32 to vector<1x256xf32>
    %116 = arith.mulf %115, %114 : vector<1x256xf32>
    %117 = arith.addf %109, %116 : vector<1x256xf32>
    %c0_i32 = arith.constant 0 : i32
    %118 = vector.broadcast %c0_i32 : i32 to vector<1x256xi32>
    %119 = arith.cmpi sge, %45, %118 : vector<1x256xi32>
    %c16_i32 = arith.constant 16 : i32
    %120 = vector.broadcast %c16_i32 : i32 to vector<1x256xi32>
    %121 = arith.cmpi slt, %45, %120 : vector<1x256xi32>
    %122 = arith.andi %119, %121 : vector<1x256xi1>
    %123 = arith.andi %51, %122 : vector<1x256xi1>
    %124 = vector.extract_strided_slice %43 {offsets = [0, 0], sizes = [1, 256], strides = [1, 1]} : vector<2x256xf32> to vector<1x256xf32>
    %c48_i32 = arith.constant 48 : i32
    %125 = tpu.dynamic_rotate %124 by %c48_i32 dim 1 : vector<1x256xf32>, i32 -> vector<1x256xf32>
    %c3 = arith.constant 3 : index
    %126 = memref.load %arg4[%c3] : memref<98xf32, #tpu.memory_space<smem>>
    %cst_38 = arith.constant 0.000000e+00 : f32
    %127 = vector.broadcast %cst_38 : f32 to vector<1x256xf32>
    %128 = arith.select %123, %125, %127 : vector<1x256xi1>, vector<1x256xf32>
    %129 = vector.broadcast %126 : f32 to vector<1x256xf32>
    %130 = arith.mulf %129, %128 : vector<1x256xf32>
    %131 = arith.addf %117, %130 : vector<1x256xf32>
    %132 = vector.extract_strided_slice %43 {offsets = [1, 0], sizes = [1, 256], strides = [1, 1]} : vector<2x256xf32> to vector<1x256xf32>
    %c48_i32_39 = arith.constant 48 : i32
    %133 = tpu.dynamic_rotate %132 by %c48_i32_39 dim 1 : vector<1x256xf32>, i32 -> vector<1x256xf32>
    %c52 = arith.constant 52 : index
    %134 = memref.load %arg4[%c52] : memref<98xf32, #tpu.memory_space<smem>>
    %cst_40 = arith.constant 0.000000e+00 : f32
    %135 = vector.broadcast %cst_40 : f32 to vector<1x256xf32>
    %136 = arith.select %123, %133, %135 : vector<1x256xi1>, vector<1x256xf32>
    %137 = vector.broadcast %134 : f32 to vector<1x256xf32>
    %138 = arith.mulf %137, %136 : vector<1x256xf32>
    %139 = arith.addf %131, %138 : vector<1x256xf32>
    %c-1_i32 = arith.constant -1 : i32
    %140 = vector.broadcast %c-1_i32 : i32 to vector<1x256xi32>
    %141 = arith.cmpi sge, %45, %140 : vector<1x256xi32>
    %c15_i32 = arith.constant 15 : i32
    %142 = vector.broadcast %c15_i32 : i32 to vector<1x256xi32>
    %143 = arith.cmpi slt, %45, %142 : vector<1x256xi32>
    %144 = arith.andi %141, %143 : vector<1x256xi1>
    %145 = arith.andi %51, %144 : vector<1x256xi1>
    %146 = vector.extract_strided_slice %43 {offsets = [0, 0], sizes = [1, 256], strides = [1, 1]} : vector<2x256xf32> to vector<1x256xf32>
    %c47_i32 = arith.constant 47 : i32
    %147 = tpu.dynamic_rotate %146 by %c47_i32 dim 1 : vector<1x256xf32>, i32 -> vector<1x256xf32>
    %c4 = arith.constant 4 : index
    %148 = memref.load %arg4[%c4] : memref<98xf32, #tpu.memory_space<smem>>
    %cst_41 = arith.constant 0.000000e+00 : f32
    %149 = vector.broadcast %cst_41 : f32 to vector<1x256xf32>
    %150 = arith.select %145, %147, %149 : vector<1x256xi1>, vector<1x256xf32>
    %151 = vector.broadcast %148 : f32 to vector<1x256xf32>
    %152 = arith.mulf %151, %150 : vector<1x256xf32>
    %153 = arith.addf %139, %152 : vector<1x256xf32>
    %154 = vector.extract_strided_slice %43 {offsets = [1, 0], sizes = [1, 256], strides = [1, 1]} : vector<2x256xf32> to vector<1x256xf32>
    %c47_i32_42 = arith.constant 47 : i32
    %155 = tpu.dynamic_rotate %154 by %c47_i32_42 dim 1 : vector<1x256xf32>, i32 -> vector<1x256xf32>
    %c53 = arith.constant 53 : index
    %156 = memref.load %arg4[%c53] : memref<98xf32, #tpu.memory_space<smem>>
    %cst_43 = arith.constant 0.000000e+00 : f32
    %157 = vector.broadcast %cst_43 : f32 to vector<1x256xf32>
    %158 = arith.select %145, %155, %157 : vector<1x256xi1>, vector<1x256xf32>
    %159 = vector.broadcast %156 : f32 to vector<1x256xf32>
    %160 = arith.mulf %159, %158 : vector<1x256xf32>
    %161 = arith.addf %153, %160 : vector<1x256xf32>
    %c-2_i32 = arith.constant -2 : i32
    %162 = vector.broadcast %c-2_i32 : i32 to vector<1x256xi32>
    %163 = arith.cmpi sge, %45, %162 : vector<1x256xi32>
    %c14_i32 = arith.constant 14 : i32
    %164 = vector.broadcast %c14_i32 : i32 to vector<1x256xi32>
    %165 = arith.cmpi slt, %45, %164 : vector<1x256xi32>
    %166 = arith.andi %163, %165 : vector<1x256xi1>
    %167 = arith.andi %51, %166 : vector<1x256xi1>
    %168 = vector.extract_strided_slice %43 {offsets = [0, 0], sizes = [1, 256], strides = [1, 1]} : vector<2x256xf32> to vector<1x256xf32>
    %c46_i32 = arith.constant 46 : i32
    %169 = tpu.dynamic_rotate %168 by %c46_i32 dim 1 : vector<1x256xf32>, i32 -> vector<1x256xf32>
    %c5 = arith.constant 5 : index
    %170 = memref.load %arg4[%c5] : memref<98xf32, #tpu.memory_space<smem>>
    %cst_44 = arith.constant 0.000000e+00 : f32
    %171 = vector.broadcast %cst_44 : f32 to vector<1x256xf32>
    %172 = arith.select %167, %169, %171 : vector<1x256xi1>, vector<1x256xf32>
    %173 = vector.broadcast %170 : f32 to vector<1x256xf32>
    %174 = arith.mulf %173, %172 : vector<1x256xf32>
    %175 = arith.addf %161, %174 : vector<1x256xf32>
    %176 = vector.extract_strided_slice %43 {offsets = [1, 0], sizes = [1, 256], strides = [1, 1]} : vector<2x256xf32> to vector<1x256xf32>
    %c46_i32_45 = arith.constant 46 : i32
    %177 = tpu.dynamic_rotate %176 by %c46_i32_45 dim 1 : vector<1x256xf32>, i32 -> vector<1x256xf32>
    %c54 = arith.constant 54 : index
    %178 = memref.load %arg4[%c54] : memref<98xf32, #tpu.memory_space<smem>>
    %cst_46 = arith.constant 0.000000e+00 : f32
    %179 = vector.broadcast %cst_46 : f32 to vector<1x256xf32>
    %180 = arith.select %167, %177, %179 : vector<1x256xi1>, vector<1x256xf32>
    %181 = vector.broadcast %178 : f32 to vector<1x256xf32>
    %182 = arith.mulf %181, %180 : vector<1x256xf32>
    %183 = arith.addf %175, %182 : vector<1x256xf32>
    %c-3_i32 = arith.constant -3 : i32
    %184 = vector.broadcast %c-3_i32 : i32 to vector<1x256xi32>
    %185 = arith.cmpi sge, %45, %184 : vector<1x256xi32>
    %c13_i32 = arith.constant 13 : i32
    %186 = vector.broadcast %c13_i32 : i32 to vector<1x256xi32>
    %187 = arith.cmpi slt, %45, %186 : vector<1x256xi32>
    %188 = arith.andi %185, %187 : vector<1x256xi1>
    %189 = arith.andi %51, %188 : vector<1x256xi1>
    %190 = vector.extract_strided_slice %43 {offsets = [0, 0], sizes = [1, 256], strides = [1, 1]} : vector<2x256xf32> to vector<1x256xf32>
    %c45_i32 = arith.constant 45 : i32
    %191 = tpu.dynamic_rotate %190 by %c45_i32 dim 1 : vector<1x256xf32>, i32 -> vector<1x256xf32>
    %c6 = arith.constant 6 : index
    %192 = memref.load %arg4[%c6] : memref<98xf32, #tpu.memory_space<smem>>
    %cst_47 = arith.constant 0.000000e+00 : f32
    %193 = vector.broadcast %cst_47 : f32 to vector<1x256xf32>
    %194 = arith.select %189, %191, %193 : vector<1x256xi1>, vector<1x256xf32>
    %195 = vector.broadcast %192 : f32 to vector<1x256xf32>
    %196 = arith.mulf %195, %194 : vector<1x256xf32>
    %197 = arith.addf %183, %196 : vector<1x256xf32>
    %198 = vector.extract_strided_slice %43 {offsets = [1, 0], sizes = [1, 256], strides = [1, 1]} : vector<2x256xf32> to vector<1x256xf32>
    %c45_i32_48 = arith.constant 45 : i32
    %199 = tpu.dynamic_rotate %198 by %c45_i32_48 dim 1 : vector<1x256xf32>, i32 -> vector<1x256xf32>
    %c55 = arith.constant 55 : index
    %200 = memref.load %arg4[%c55] : memref<98xf32, #tpu.memory_space<smem>>
    %cst_49 = arith.constant 0.000000e+00 : f32
    %201 = vector.broadcast %cst_49 : f32 to vector<1x256xf32>
    %202 = arith.select %189, %199, %201 : vector<1x256xi1>, vector<1x256xf32>
    %203 = vector.broadcast %200 : f32 to vector<1x256xf32>
    %204 = arith.mulf %203, %202 : vector<1x256xf32>
    %205 = arith.addf %197, %204 : vector<1x256xf32>
    %c2_i32_50 = arith.constant 2 : i32
    %206 = vector.broadcast %c2_i32_50 : i32 to vector<1x256xi32>
    %207 = arith.cmpi sge, %44, %206 : vector<1x256xi32>
    %c18_i32_51 = arith.constant 18 : i32
    %208 = vector.broadcast %c18_i32_51 : i32 to vector<1x256xi32>
    %209 = arith.cmpi slt, %44, %208 : vector<1x256xi32>
    %210 = arith.andi %207, %209 : vector<1x256xi1>
    %c3_i32_52 = arith.constant 3 : i32
    %211 = vector.broadcast %c3_i32_52 : i32 to vector<1x256xi32>
    %212 = arith.cmpi sge, %45, %211 : vector<1x256xi32>
    %c19_i32_53 = arith.constant 19 : i32
    %213 = vector.broadcast %c19_i32_53 : i32 to vector<1x256xi32>
    %214 = arith.cmpi slt, %45, %213 : vector<1x256xi32>
    %215 = arith.andi %212, %214 : vector<1x256xi1>
    %216 = arith.andi %210, %215 : vector<1x256xi1>
    %217 = vector.extract_strided_slice %43 {offsets = [0, 0], sizes = [1, 256], strides = [1, 1]} : vector<2x256xf32> to vector<1x256xf32>
    %c35_i32 = arith.constant 35 : i32
    %218 = tpu.dynamic_rotate %217 by %c35_i32 dim 1 : vector<1x256xf32>, i32 -> vector<1x256xf32>
    %c7 = arith.constant 7 : index
    %219 = memref.load %arg4[%c7] : memref<98xf32, #tpu.memory_space<smem>>
    %cst_54 = arith.constant 0.000000e+00 : f32
    %220 = vector.broadcast %cst_54 : f32 to vector<1x256xf32>
    %221 = arith.select %216, %218, %220 : vector<1x256xi1>, vector<1x256xf32>
    %222 = vector.broadcast %219 : f32 to vector<1x256xf32>
    %223 = arith.mulf %222, %221 : vector<1x256xf32>
    %224 = arith.addf %205, %223 : vector<1x256xf32>
    %225 = vector.extract_strided_slice %43 {offsets = [1, 0], sizes = [1, 256], strides = [1, 1]} : vector<2x256xf32> to vector<1x256xf32>
    %c35_i32_55 = arith.constant 35 : i32
    %226 = tpu.dynamic_rotate %225 by %c35_i32_55 dim 1 : vector<1x256xf32>, i32 -> vector<1x256xf32>
    %c56 = arith.constant 56 : index
    %227 = memref.load %arg4[%c56] : memref<98xf32, #tpu.memory_space<smem>>
    %cst_56 = arith.constant 0.000000e+00 : f32
    %228 = vector.broadcast %cst_56 : f32 to vector<1x256xf32>
    %229 = arith.select %216, %226, %228 : vector<1x256xi1>, vector<1x256xf32>
    %230 = vector.broadcast %227 : f32 to vector<1x256xf32>
    %231 = arith.mulf %230, %229 : vector<1x256xf32>
    %232 = arith.addf %224, %231 : vector<1x256xf32>
    %c2_i32_57 = arith.constant 2 : i32
    %233 = vector.broadcast %c2_i32_57 : i32 to vector<1x256xi32>
    %234 = arith.cmpi sge, %45, %233 : vector<1x256xi32>
    %c18_i32_58 = arith.constant 18 : i32
    %235 = vector.broadcast %c18_i32_58 : i32 to vector<1x256xi32>
    %236 = arith.cmpi slt, %45, %235 : vector<1x256xi32>
    %237 = arith.andi %234, %236 : vector<1x256xi1>
    %238 = arith.andi %210, %237 : vector<1x256xi1>
    %239 = vector.extract_strided_slice %43 {offsets = [0, 0], sizes = [1, 256], strides = [1, 1]} : vector<2x256xf32> to vector<1x256xf32>
    %c34_i32 = arith.constant 34 : i32
    %240 = tpu.dynamic_rotate %239 by %c34_i32 dim 1 : vector<1x256xf32>, i32 -> vector<1x256xf32>
    %c8 = arith.constant 8 : index
    %241 = memref.load %arg4[%c8] : memref<98xf32, #tpu.memory_space<smem>>
    %cst_59 = arith.constant 0.000000e+00 : f32
    %242 = vector.broadcast %cst_59 : f32 to vector<1x256xf32>
    %243 = arith.select %238, %240, %242 : vector<1x256xi1>, vector<1x256xf32>
    %244 = vector.broadcast %241 : f32 to vector<1x256xf32>
    %245 = arith.mulf %244, %243 : vector<1x256xf32>
    %246 = arith.addf %232, %245 : vector<1x256xf32>
    %247 = vector.extract_strided_slice %43 {offsets = [1, 0], sizes = [1, 256], strides = [1, 1]} : vector<2x256xf32> to vector<1x256xf32>
    %c34_i32_60 = arith.constant 34 : i32
    %248 = tpu.dynamic_rotate %247 by %c34_i32_60 dim 1 : vector<1x256xf32>, i32 -> vector<1x256xf32>
    %c57 = arith.constant 57 : index
    %249 = memref.load %arg4[%c57] : memref<98xf32, #tpu.memory_space<smem>>
    %cst_61 = arith.constant 0.000000e+00 : f32
    %250 = vector.broadcast %cst_61 : f32 to vector<1x256xf32>
    %251 = arith.select %238, %248, %250 : vector<1x256xi1>, vector<1x256xf32>
    %252 = vector.broadcast %249 : f32 to vector<1x256xf32>
    %253 = arith.mulf %252, %251 : vector<1x256xf32>
    %254 = arith.addf %246, %253 : vector<1x256xf32>
    %c1_i32_62 = arith.constant 1 : i32
    %255 = vector.broadcast %c1_i32_62 : i32 to vector<1x256xi32>
    %256 = arith.cmpi sge, %45, %255 : vector<1x256xi32>
    %c17_i32_63 = arith.constant 17 : i32
    %257 = vector.broadcast %c17_i32_63 : i32 to vector<1x256xi32>
    %258 = arith.cmpi slt, %45, %257 : vector<1x256xi32>
    %259 = arith.andi %256, %258 : vector<1x256xi1>
    %260 = arith.andi %210, %259 : vector<1x256xi1>
    %261 = vector.extract_strided_slice %43 {offsets = [0, 0], sizes = [1, 256], strides = [1, 1]} : vector<2x256xf32> to vector<1x256xf32>
    %c33_i32 = arith.constant 33 : i32
    %262 = tpu.dynamic_rotate %261 by %c33_i32 dim 1 : vector<1x256xf32>, i32 -> vector<1x256xf32>
    %c9 = arith.constant 9 : index
    %263 = memref.load %arg4[%c9] : memref<98xf32, #tpu.memory_space<smem>>
    %cst_64 = arith.constant 0.000000e+00 : f32
    %264 = vector.broadcast %cst_64 : f32 to vector<1x256xf32>
    %265 = arith.select %260, %262, %264 : vector<1x256xi1>, vector<1x256xf32>
    %266 = vector.broadcast %263 : f32 to vector<1x256xf32>
    %267 = arith.mulf %266, %265 : vector<1x256xf32>
    %268 = arith.addf %254, %267 : vector<1x256xf32>
    %269 = vector.extract_strided_slice %43 {offsets = [1, 0], sizes = [1, 256], strides = [1, 1]} : vector<2x256xf32> to vector<1x256xf32>
    %c33_i32_65 = arith.constant 33 : i32
    %270 = tpu.dynamic_rotate %269 by %c33_i32_65 dim 1 : vector<1x256xf32>, i32 -> vector<1x256xf32>
    %c58 = arith.constant 58 : index
    %271 = memref.load %arg4[%c58] : memref<98xf32, #tpu.memory_space<smem>>
    %cst_66 = arith.constant 0.000000e+00 : f32
    %272 = vector.broadcast %cst_66 : f32 to vector<1x256xf32>
    %273 = arith.select %260, %270, %272 : vector<1x256xi1>, vector<1x256xf32>
    %274 = vector.broadcast %271 : f32 to vector<1x256xf32>
    %275 = arith.mulf %274, %273 : vector<1x256xf32>
    %276 = arith.addf %268, %275 : vector<1x256xf32>
    %c0_i32_67 = arith.constant 0 : i32
    %277 = vector.broadcast %c0_i32_67 : i32 to vector<1x256xi32>
    %278 = arith.cmpi sge, %45, %277 : vector<1x256xi32>
    %c16_i32_68 = arith.constant 16 : i32
    %279 = vector.broadcast %c16_i32_68 : i32 to vector<1x256xi32>
    %280 = arith.cmpi slt, %45, %279 : vector<1x256xi32>
    %281 = arith.andi %278, %280 : vector<1x256xi1>
    %282 = arith.andi %210, %281 : vector<1x256xi1>
    %283 = vector.extract_strided_slice %43 {offsets = [0, 0], sizes = [1, 256], strides = [1, 1]} : vector<2x256xf32> to vector<1x256xf32>
    %c32_i32 = arith.constant 32 : i32
    %284 = tpu.dynamic_rotate %283 by %c32_i32 dim 1 : vector<1x256xf32>, i32 -> vector<1x256xf32>
    %c10 = arith.constant 10 : index
    %285 = memref.load %arg4[%c10] : memref<98xf32, #tpu.memory_space<smem>>
    %cst_69 = arith.constant 0.000000e+00 : f32
    %286 = vector.broadcast %cst_69 : f32 to vector<1x256xf32>
    %287 = arith.select %282, %284, %286 : vector<1x256xi1>, vector<1x256xf32>
    %288 = vector.broadcast %285 : f32 to vector<1x256xf32>
    %289 = arith.mulf %288, %287 : vector<1x256xf32>
    %290 = arith.addf %276, %289 : vector<1x256xf32>
    %291 = vector.extract_strided_slice %43 {offsets = [1, 0], sizes = [1, 256], strides = [1, 1]} : vector<2x256xf32> to vector<1x256xf32>
    %c32_i32_70 = arith.constant 32 : i32
    %292 = tpu.dynamic_rotate %291 by %c32_i32_70 dim 1 : vector<1x256xf32>, i32 -> vector<1x256xf32>
    %c59 = arith.constant 59 : index
    %293 = memref.load %arg4[%c59] : memref<98xf32, #tpu.memory_space<smem>>
    %cst_71 = arith.constant 0.000000e+00 : f32
    %294 = vector.broadcast %cst_71 : f32 to vector<1x256xf32>
    %295 = arith.select %282, %292, %294 : vector<1x256xi1>, vector<1x256xf32>
    %296 = vector.broadcast %293 : f32 to vector<1x256xf32>
    %297 = arith.mulf %296, %295 : vector<1x256xf32>
    %298 = arith.addf %290, %297 : vector<1x256xf32>
    %c-1_i32_72 = arith.constant -1 : i32
    %299 = vector.broadcast %c-1_i32_72 : i32 to vector<1x256xi32>
    %300 = arith.cmpi sge, %45, %299 : vector<1x256xi32>
    %c15_i32_73 = arith.constant 15 : i32
    %301 = vector.broadcast %c15_i32_73 : i32 to vector<1x256xi32>
    %302 = arith.cmpi slt, %45, %301 : vector<1x256xi32>
    %303 = arith.andi %300, %302 : vector<1x256xi1>
    %304 = arith.andi %210, %303 : vector<1x256xi1>
    %305 = vector.extract_strided_slice %43 {offsets = [0, 0], sizes = [1, 256], strides = [1, 1]} : vector<2x256xf32> to vector<1x256xf32>
    %c31_i32 = arith.constant 31 : i32
    %306 = tpu.dynamic_rotate %305 by %c31_i32 dim 1 : vector<1x256xf32>, i32 -> vector<1x256xf32>
    %c11 = arith.constant 11 : index
    %307 = memref.load %arg4[%c11] : memref<98xf32, #tpu.memory_space<smem>>
    %cst_74 = arith.constant 0.000000e+00 : f32
    %308 = vector.broadcast %cst_74 : f32 to vector<1x256xf32>
    %309 = arith.select %304, %306, %308 : vector<1x256xi1>, vector<1x256xf32>
    %310 = vector.broadcast %307 : f32 to vector<1x256xf32>
    %311 = arith.mulf %310, %309 : vector<1x256xf32>
    %312 = arith.addf %298, %311 : vector<1x256xf32>
    %313 = vector.extract_strided_slice %43 {offsets = [1, 0], sizes = [1, 256], strides = [1, 1]} : vector<2x256xf32> to vector<1x256xf32>
    %c31_i32_75 = arith.constant 31 : i32
    %314 = tpu.dynamic_rotate %313 by %c31_i32_75 dim 1 : vector<1x256xf32>, i32 -> vector<1x256xf32>
    %c60 = arith.constant 60 : index
    %315 = memref.load %arg4[%c60] : memref<98xf32, #tpu.memory_space<smem>>
    %cst_76 = arith.constant 0.000000e+00 : f32
    %316 = vector.broadcast %cst_76 : f32 to vector<1x256xf32>
    %317 = arith.select %304, %314, %316 : vector<1x256xi1>, vector<1x256xf32>
    %318 = vector.broadcast %315 : f32 to vector<1x256xf32>
    %319 = arith.mulf %318, %317 : vector<1x256xf32>
    %320 = arith.addf %312, %319 : vector<1x256xf32>
    %c-2_i32_77 = arith.constant -2 : i32
    %321 = vector.broadcast %c-2_i32_77 : i32 to vector<1x256xi32>
    %322 = arith.cmpi sge, %45, %321 : vector<1x256xi32>
    %c14_i32_78 = arith.constant 14 : i32
    %323 = vector.broadcast %c14_i32_78 : i32 to vector<1x256xi32>
    %324 = arith.cmpi slt, %45, %323 : vector<1x256xi32>
    %325 = arith.andi %322, %324 : vector<1x256xi1>
    %326 = arith.andi %210, %325 : vector<1x256xi1>
    %327 = vector.extract_strided_slice %43 {offsets = [0, 0], sizes = [1, 256], strides = [1, 1]} : vector<2x256xf32> to vector<1x256xf32>
    %c30_i32 = arith.constant 30 : i32
    %328 = tpu.dynamic_rotate %327 by %c30_i32 dim 1 : vector<1x256xf32>, i32 -> vector<1x256xf32>
    %c12 = arith.constant 12 : index
    %329 = memref.load %arg4[%c12] : memref<98xf32, #tpu.memory_space<smem>>
    %cst_79 = arith.constant 0.000000e+00 : f32
    %330 = vector.broadcast %cst_79 : f32 to vector<1x256xf32>
    %331 = arith.select %326, %328, %330 : vector<1x256xi1>, vector<1x256xf32>
    %332 = vector.broadcast %329 : f32 to vector<1x256xf32>
    %333 = arith.mulf %332, %331 : vector<1x256xf32>
    %334 = arith.addf %320, %333 : vector<1x256xf32>
    %335 = vector.extract_strided_slice %43 {offsets = [1, 0], sizes = [1, 256], strides = [1, 1]} : vector<2x256xf32> to vector<1x256xf32>
    %c30_i32_80 = arith.constant 30 : i32
    %336 = tpu.dynamic_rotate %335 by %c30_i32_80 dim 1 : vector<1x256xf32>, i32 -> vector<1x256xf32>
    %c61 = arith.constant 61 : index
    %337 = memref.load %arg4[%c61] : memref<98xf32, #tpu.memory_space<smem>>
    %cst_81 = arith.constant 0.000000e+00 : f32
    %338 = vector.broadcast %cst_81 : f32 to vector<1x256xf32>
    %339 = arith.select %326, %336, %338 : vector<1x256xi1>, vector<1x256xf32>
    %340 = vector.broadcast %337 : f32 to vector<1x256xf32>
    %341 = arith.mulf %340, %339 : vector<1x256xf32>
    %342 = arith.addf %334, %341 : vector<1x256xf32>
    %c-3_i32_82 = arith.constant -3 : i32
    %343 = vector.broadcast %c-3_i32_82 : i32 to vector<1x256xi32>
    %344 = arith.cmpi sge, %45, %343 : vector<1x256xi32>
    %c13_i32_83 = arith.constant 13 : i32
    %345 = vector.broadcast %c13_i32_83 : i32 to vector<1x256xi32>
    %346 = arith.cmpi slt, %45, %345 : vector<1x256xi32>
    %347 = arith.andi %344, %346 : vector<1x256xi1>
    %348 = arith.andi %210, %347 : vector<1x256xi1>
    %349 = vector.extract_strided_slice %43 {offsets = [0, 0], sizes = [1, 256], strides = [1, 1]} : vector<2x256xf32> to vector<1x256xf32>
    %c29_i32 = arith.constant 29 : i32
    %350 = tpu.dynamic_rotate %349 by %c29_i32 dim 1 : vector<1x256xf32>, i32 -> vector<1x256xf32>
    %c13 = arith.constant 13 : index
    %351 = memref.load %arg4[%c13] : memref<98xf32, #tpu.memory_space<smem>>
    %cst_84 = arith.constant 0.000000e+00 : f32
    %352 = vector.broadcast %cst_84 : f32 to vector<1x256xf32>
    %353 = arith.select %348, %350, %352 : vector<1x256xi1>, vector<1x256xf32>
    %354 = vector.broadcast %351 : f32 to vector<1x256xf32>
    %355 = arith.mulf %354, %353 : vector<1x256xf32>
    %356 = arith.addf %342, %355 : vector<1x256xf32>
    %357 = vector.extract_strided_slice %43 {offsets = [1, 0], sizes = [1, 256], strides = [1, 1]} : vector<2x256xf32> to vector<1x256xf32>
    %c29_i32_85 = arith.constant 29 : i32
    %358 = tpu.dynamic_rotate %357 by %c29_i32_85 dim 1 : vector<1x256xf32>, i32 -> vector<1x256xf32>
    %c62 = arith.constant 62 : index
    %359 = memref.load %arg4[%c62] : memref<98xf32, #tpu.memory_space<smem>>
    %cst_86 = arith.constant 0.000000e+00 : f32
    %360 = vector.broadcast %cst_86 : f32 to vector<1x256xf32>
    %361 = arith.select %348, %358, %360 : vector<1x256xi1>, vector<1x256xf32>
    %362 = vector.broadcast %359 : f32 to vector<1x256xf32>
    %363 = arith.mulf %362, %361 : vector<1x256xf32>
    %364 = arith.addf %356, %363 : vector<1x256xf32>
    %c1_i32_87 = arith.constant 1 : i32
    %365 = vector.broadcast %c1_i32_87 : i32 to vector<1x256xi32>
    %366 = arith.cmpi sge, %44, %365 : vector<1x256xi32>
    %c17_i32_88 = arith.constant 17 : i32
    %367 = vector.broadcast %c17_i32_88 : i32 to vector<1x256xi32>
    %368 = arith.cmpi slt, %44, %367 : vector<1x256xi32>
    %369 = arith.andi %366, %368 : vector<1x256xi1>
    %c3_i32_89 = arith.constant 3 : i32
    %370 = vector.broadcast %c3_i32_89 : i32 to vector<1x256xi32>
    %371 = arith.cmpi sge, %45, %370 : vector<1x256xi32>
    %c19_i32_90 = arith.constant 19 : i32
    %372 = vector.broadcast %c19_i32_90 : i32 to vector<1x256xi32>
    %373 = arith.cmpi slt, %45, %372 : vector<1x256xi32>
    %374 = arith.andi %371, %373 : vector<1x256xi1>
    %375 = arith.andi %369, %374 : vector<1x256xi1>
    %376 = vector.extract_strided_slice %43 {offsets = [0, 0], sizes = [1, 256], strides = [1, 1]} : vector<2x256xf32> to vector<1x256xf32>
    %c19_i32_91 = arith.constant 19 : i32
    %377 = tpu.dynamic_rotate %376 by %c19_i32_91 dim 1 : vector<1x256xf32>, i32 -> vector<1x256xf32>
    %c14 = arith.constant 14 : index
    %378 = memref.load %arg4[%c14] : memref<98xf32, #tpu.memory_space<smem>>
    %cst_92 = arith.constant 0.000000e+00 : f32
    %379 = vector.broadcast %cst_92 : f32 to vector<1x256xf32>
    %380 = arith.select %375, %377, %379 : vector<1x256xi1>, vector<1x256xf32>
    %381 = vector.broadcast %378 : f32 to vector<1x256xf32>
    %382 = arith.mulf %381, %380 : vector<1x256xf32>
    %383 = arith.addf %364, %382 : vector<1x256xf32>
    %384 = vector.extract_strided_slice %43 {offsets = [1, 0], sizes = [1, 256], strides = [1, 1]} : vector<2x256xf32> to vector<1x256xf32>
    %c19_i32_93 = arith.constant 19 : i32
    %385 = tpu.dynamic_rotate %384 by %c19_i32_93 dim 1 : vector<1x256xf32>, i32 -> vector<1x256xf32>
    %c63 = arith.constant 63 : index
    %386 = memref.load %arg4[%c63] : memref<98xf32, #tpu.memory_space<smem>>
    %cst_94 = arith.constant 0.000000e+00 : f32
    %387 = vector.broadcast %cst_94 : f32 to vector<1x256xf32>
    %388 = arith.select %375, %385, %387 : vector<1x256xi1>, vector<1x256xf32>
    %389 = vector.broadcast %386 : f32 to vector<1x256xf32>
    %390 = arith.mulf %389, %388 : vector<1x256xf32>
    %391 = arith.addf %383, %390 : vector<1x256xf32>
    %c2_i32_95 = arith.constant 2 : i32
    %392 = vector.broadcast %c2_i32_95 : i32 to vector<1x256xi32>
    %393 = arith.cmpi sge, %45, %392 : vector<1x256xi32>
    %c18_i32_96 = arith.constant 18 : i32
    %394 = vector.broadcast %c18_i32_96 : i32 to vector<1x256xi32>
    %395 = arith.cmpi slt, %45, %394 : vector<1x256xi32>
    %396 = arith.andi %393, %395 : vector<1x256xi1>
    %397 = arith.andi %369, %396 : vector<1x256xi1>
    %398 = vector.extract_strided_slice %43 {offsets = [0, 0], sizes = [1, 256], strides = [1, 1]} : vector<2x256xf32> to vector<1x256xf32>
    %c18_i32_97 = arith.constant 18 : i32
    %399 = tpu.dynamic_rotate %398 by %c18_i32_97 dim 1 : vector<1x256xf32>, i32 -> vector<1x256xf32>
    %c15 = arith.constant 15 : index
    %400 = memref.load %arg4[%c15] : memref<98xf32, #tpu.memory_space<smem>>
    %cst_98 = arith.constant 0.000000e+00 : f32
    %401 = vector.broadcast %cst_98 : f32 to vector<1x256xf32>
    %402 = arith.select %397, %399, %401 : vector<1x256xi1>, vector<1x256xf32>
    %403 = vector.broadcast %400 : f32 to vector<1x256xf32>
    %404 = arith.mulf %403, %402 : vector<1x256xf32>
    %405 = arith.addf %391, %404 : vector<1x256xf32>
    %406 = vector.extract_strided_slice %43 {offsets = [1, 0], sizes = [1, 256], strides = [1, 1]} : vector<2x256xf32> to vector<1x256xf32>
    %c18_i32_99 = arith.constant 18 : i32
    %407 = tpu.dynamic_rotate %406 by %c18_i32_99 dim 1 : vector<1x256xf32>, i32 -> vector<1x256xf32>
    %c64 = arith.constant 64 : index
    %408 = memref.load %arg4[%c64] : memref<98xf32, #tpu.memory_space<smem>>
    %cst_100 = arith.constant 0.000000e+00 : f32
    %409 = vector.broadcast %cst_100 : f32 to vector<1x256xf32>
    %410 = arith.select %397, %407, %409 : vector<1x256xi1>, vector<1x256xf32>
    %411 = vector.broadcast %408 : f32 to vector<1x256xf32>
    %412 = arith.mulf %411, %410 : vector<1x256xf32>
    %413 = arith.addf %405, %412 : vector<1x256xf32>
    %c1_i32_101 = arith.constant 1 : i32
    %414 = vector.broadcast %c1_i32_101 : i32 to vector<1x256xi32>
    %415 = arith.cmpi sge, %45, %414 : vector<1x256xi32>
    %c17_i32_102 = arith.constant 17 : i32
    %416 = vector.broadcast %c17_i32_102 : i32 to vector<1x256xi32>
    %417 = arith.cmpi slt, %45, %416 : vector<1x256xi32>
    %418 = arith.andi %415, %417 : vector<1x256xi1>
    %419 = arith.andi %369, %418 : vector<1x256xi1>
    %420 = vector.extract_strided_slice %43 {offsets = [0, 0], sizes = [1, 256], strides = [1, 1]} : vector<2x256xf32> to vector<1x256xf32>
    %c17_i32_103 = arith.constant 17 : i32
    %421 = tpu.dynamic_rotate %420 by %c17_i32_103 dim 1 : vector<1x256xf32>, i32 -> vector<1x256xf32>
    %c16 = arith.constant 16 : index
    %422 = memref.load %arg4[%c16] : memref<98xf32, #tpu.memory_space<smem>>
    %cst_104 = arith.constant 0.000000e+00 : f32
    %423 = vector.broadcast %cst_104 : f32 to vector<1x256xf32>
    %424 = arith.select %419, %421, %423 : vector<1x256xi1>, vector<1x256xf32>
    %425 = vector.broadcast %422 : f32 to vector<1x256xf32>
    %426 = arith.mulf %425, %424 : vector<1x256xf32>
    %427 = arith.addf %413, %426 : vector<1x256xf32>
    %428 = vector.extract_strided_slice %43 {offsets = [1, 0], sizes = [1, 256], strides = [1, 1]} : vector<2x256xf32> to vector<1x256xf32>
    %c17_i32_105 = arith.constant 17 : i32
    %429 = tpu.dynamic_rotate %428 by %c17_i32_105 dim 1 : vector<1x256xf32>, i32 -> vector<1x256xf32>
    %c65 = arith.constant 65 : index
    %430 = memref.load %arg4[%c65] : memref<98xf32, #tpu.memory_space<smem>>
    %cst_106 = arith.constant 0.000000e+00 : f32
    %431 = vector.broadcast %cst_106 : f32 to vector<1x256xf32>
    %432 = arith.select %419, %429, %431 : vector<1x256xi1>, vector<1x256xf32>
    %433 = vector.broadcast %430 : f32 to vector<1x256xf32>
    %434 = arith.mulf %433, %432 : vector<1x256xf32>
    %435 = arith.addf %427, %434 : vector<1x256xf32>
    %c0_i32_107 = arith.constant 0 : i32
    %436 = vector.broadcast %c0_i32_107 : i32 to vector<1x256xi32>
    %437 = arith.cmpi sge, %45, %436 : vector<1x256xi32>
    %c16_i32_108 = arith.constant 16 : i32
    %438 = vector.broadcast %c16_i32_108 : i32 to vector<1x256xi32>
    %439 = arith.cmpi slt, %45, %438 : vector<1x256xi32>
    %440 = arith.andi %437, %439 : vector<1x256xi1>
    %441 = arith.andi %369, %440 : vector<1x256xi1>
    %442 = vector.extract_strided_slice %43 {offsets = [0, 0], sizes = [1, 256], strides = [1, 1]} : vector<2x256xf32> to vector<1x256xf32>
    %c16_i32_109 = arith.constant 16 : i32
    %443 = tpu.dynamic_rotate %442 by %c16_i32_109 dim 1 : vector<1x256xf32>, i32 -> vector<1x256xf32>
    %c17 = arith.constant 17 : index
    %444 = memref.load %arg4[%c17] : memref<98xf32, #tpu.memory_space<smem>>
    %cst_110 = arith.constant 0.000000e+00 : f32
    %445 = vector.broadcast %cst_110 : f32 to vector<1x256xf32>
    %446 = arith.select %441, %443, %445 : vector<1x256xi1>, vector<1x256xf32>
    %447 = vector.broadcast %444 : f32 to vector<1x256xf32>
    %448 = arith.mulf %447, %446 : vector<1x256xf32>
    %449 = arith.addf %435, %448 : vector<1x256xf32>
    %450 = vector.extract_strided_slice %43 {offsets = [1, 0], sizes = [1, 256], strides = [1, 1]} : vector<2x256xf32> to vector<1x256xf32>
    %c16_i32_111 = arith.constant 16 : i32
    %451 = tpu.dynamic_rotate %450 by %c16_i32_111 dim 1 : vector<1x256xf32>, i32 -> vector<1x256xf32>
    %c66 = arith.constant 66 : index
    %452 = memref.load %arg4[%c66] : memref<98xf32, #tpu.memory_space<smem>>
    %cst_112 = arith.constant 0.000000e+00 : f32
    %453 = vector.broadcast %cst_112 : f32 to vector<1x256xf32>
    %454 = arith.select %441, %451, %453 : vector<1x256xi1>, vector<1x256xf32>
    %455 = vector.broadcast %452 : f32 to vector<1x256xf32>
    %456 = arith.mulf %455, %454 : vector<1x256xf32>
    %457 = arith.addf %449, %456 : vector<1x256xf32>
    %c-1_i32_113 = arith.constant -1 : i32
    %458 = vector.broadcast %c-1_i32_113 : i32 to vector<1x256xi32>
    %459 = arith.cmpi sge, %45, %458 : vector<1x256xi32>
    %c15_i32_114 = arith.constant 15 : i32
    %460 = vector.broadcast %c15_i32_114 : i32 to vector<1x256xi32>
    %461 = arith.cmpi slt, %45, %460 : vector<1x256xi32>
    %462 = arith.andi %459, %461 : vector<1x256xi1>
    %463 = arith.andi %369, %462 : vector<1x256xi1>
    %464 = vector.extract_strided_slice %43 {offsets = [0, 0], sizes = [1, 256], strides = [1, 1]} : vector<2x256xf32> to vector<1x256xf32>
    %c15_i32_115 = arith.constant 15 : i32
    %465 = tpu.dynamic_rotate %464 by %c15_i32_115 dim 1 : vector<1x256xf32>, i32 -> vector<1x256xf32>
    %c18 = arith.constant 18 : index
    %466 = memref.load %arg4[%c18] : memref<98xf32, #tpu.memory_space<smem>>
    %cst_116 = arith.constant 0.000000e+00 : f32
    %467 = vector.broadcast %cst_116 : f32 to vector<1x256xf32>
    %468 = arith.select %463, %465, %467 : vector<1x256xi1>, vector<1x256xf32>
    %469 = vector.broadcast %466 : f32 to vector<1x256xf32>
    %470 = arith.mulf %469, %468 : vector<1x256xf32>
    %471 = arith.addf %457, %470 : vector<1x256xf32>
    %472 = vector.extract_strided_slice %43 {offsets = [1, 0], sizes = [1, 256], strides = [1, 1]} : vector<2x256xf32> to vector<1x256xf32>
    %c15_i32_117 = arith.constant 15 : i32
    %473 = tpu.dynamic_rotate %472 by %c15_i32_117 dim 1 : vector<1x256xf32>, i32 -> vector<1x256xf32>
    %c67 = arith.constant 67 : index
    %474 = memref.load %arg4[%c67] : memref<98xf32, #tpu.memory_space<smem>>
    %cst_118 = arith.constant 0.000000e+00 : f32
    %475 = vector.broadcast %cst_118 : f32 to vector<1x256xf32>
    %476 = arith.select %463, %473, %475 : vector<1x256xi1>, vector<1x256xf32>
    %477 = vector.broadcast %474 : f32 to vector<1x256xf32>
    %478 = arith.mulf %477, %476 : vector<1x256xf32>
    %479 = arith.addf %471, %478 : vector<1x256xf32>
    %c-2_i32_119 = arith.constant -2 : i32
    %480 = vector.broadcast %c-2_i32_119 : i32 to vector<1x256xi32>
    %481 = arith.cmpi sge, %45, %480 : vector<1x256xi32>
    %c14_i32_120 = arith.constant 14 : i32
    %482 = vector.broadcast %c14_i32_120 : i32 to vector<1x256xi32>
    %483 = arith.cmpi slt, %45, %482 : vector<1x256xi32>
    %484 = arith.andi %481, %483 : vector<1x256xi1>
    %485 = arith.andi %369, %484 : vector<1x256xi1>
    %486 = vector.extract_strided_slice %43 {offsets = [0, 0], sizes = [1, 256], strides = [1, 1]} : vector<2x256xf32> to vector<1x256xf32>
    %c14_i32_121 = arith.constant 14 : i32
    %487 = tpu.dynamic_rotate %486 by %c14_i32_121 dim 1 : vector<1x256xf32>, i32 -> vector<1x256xf32>
    %c19 = arith.constant 19 : index
    %488 = memref.load %arg4[%c19] : memref<98xf32, #tpu.memory_space<smem>>
    %cst_122 = arith.constant 0.000000e+00 : f32
    %489 = vector.broadcast %cst_122 : f32 to vector<1x256xf32>
    %490 = arith.select %485, %487, %489 : vector<1x256xi1>, vector<1x256xf32>
    %491 = vector.broadcast %488 : f32 to vector<1x256xf32>
    %492 = arith.mulf %491, %490 : vector<1x256xf32>
    %493 = arith.addf %479, %492 : vector<1x256xf32>
    %494 = vector.extract_strided_slice %43 {offsets = [1, 0], sizes = [1, 256], strides = [1, 1]} : vector<2x256xf32> to vector<1x256xf32>
    %c14_i32_123 = arith.constant 14 : i32
    %495 = tpu.dynamic_rotate %494 by %c14_i32_123 dim 1 : vector<1x256xf32>, i32 -> vector<1x256xf32>
    %c68 = arith.constant 68 : index
    %496 = memref.load %arg4[%c68] : memref<98xf32, #tpu.memory_space<smem>>
    %cst_124 = arith.constant 0.000000e+00 : f32
    %497 = vector.broadcast %cst_124 : f32 to vector<1x256xf32>
    %498 = arith.select %485, %495, %497 : vector<1x256xi1>, vector<1x256xf32>
    %499 = vector.broadcast %496 : f32 to vector<1x256xf32>
    %500 = arith.mulf %499, %498 : vector<1x256xf32>
    %501 = arith.addf %493, %500 : vector<1x256xf32>
    %c-3_i32_125 = arith.constant -3 : i32
    %502 = vector.broadcast %c-3_i32_125 : i32 to vector<1x256xi32>
    %503 = arith.cmpi sge, %45, %502 : vector<1x256xi32>
    %c13_i32_126 = arith.constant 13 : i32
    %504 = vector.broadcast %c13_i32_126 : i32 to vector<1x256xi32>
    %505 = arith.cmpi slt, %45, %504 : vector<1x256xi32>
    %506 = arith.andi %503, %505 : vector<1x256xi1>
    %507 = arith.andi %369, %506 : vector<1x256xi1>
    %508 = vector.extract_strided_slice %43 {offsets = [0, 0], sizes = [1, 256], strides = [1, 1]} : vector<2x256xf32> to vector<1x256xf32>
    %c13_i32_127 = arith.constant 13 : i32
    %509 = tpu.dynamic_rotate %508 by %c13_i32_127 dim 1 : vector<1x256xf32>, i32 -> vector<1x256xf32>
    %c20 = arith.constant 20 : index
    %510 = memref.load %arg4[%c20] : memref<98xf32, #tpu.memory_space<smem>>
    %cst_128 = arith.constant 0.000000e+00 : f32
    %511 = vector.broadcast %cst_128 : f32 to vector<1x256xf32>
    %512 = arith.select %507, %509, %511 : vector<1x256xi1>, vector<1x256xf32>
    %513 = vector.broadcast %510 : f32 to vector<1x256xf32>
    %514 = arith.mulf %513, %512 : vector<1x256xf32>
    %515 = arith.addf %501, %514 : vector<1x256xf32>
    %516 = vector.extract_strided_slice %43 {offsets = [1, 0], sizes = [1, 256], strides = [1, 1]} : vector<2x256xf32> to vector<1x256xf32>
    %c13_i32_129 = arith.constant 13 : i32
    %517 = tpu.dynamic_rotate %516 by %c13_i32_129 dim 1 : vector<1x256xf32>, i32 -> vector<1x256xf32>
    %c69 = arith.constant 69 : index
    %518 = memref.load %arg4[%c69] : memref<98xf32, #tpu.memory_space<smem>>
    %cst_130 = arith.constant 0.000000e+00 : f32
    %519 = vector.broadcast %cst_130 : f32 to vector<1x256xf32>
    %520 = arith.select %507, %517, %519 : vector<1x256xi1>, vector<1x256xf32>
    %521 = vector.broadcast %518 : f32 to vector<1x256xf32>
    %522 = arith.mulf %521, %520 : vector<1x256xf32>
    %523 = arith.addf %515, %522 : vector<1x256xf32>
    %c0_i32_131 = arith.constant 0 : i32
    %524 = vector.broadcast %c0_i32_131 : i32 to vector<1x256xi32>
    %525 = arith.cmpi sge, %44, %524 : vector<1x256xi32>
    %c16_i32_132 = arith.constant 16 : i32
    %526 = vector.broadcast %c16_i32_132 : i32 to vector<1x256xi32>
    %527 = arith.cmpi slt, %44, %526 : vector<1x256xi32>
    %528 = arith.andi %525, %527 : vector<1x256xi1>
    %c3_i32_133 = arith.constant 3 : i32
    %529 = vector.broadcast %c3_i32_133 : i32 to vector<1x256xi32>
    %530 = arith.cmpi sge, %45, %529 : vector<1x256xi32>
    %c19_i32_134 = arith.constant 19 : i32
    %531 = vector.broadcast %c19_i32_134 : i32 to vector<1x256xi32>
    %532 = arith.cmpi slt, %45, %531 : vector<1x256xi32>
    %533 = arith.andi %530, %532 : vector<1x256xi1>
    %534 = arith.andi %528, %533 : vector<1x256xi1>
    %535 = vector.extract_strided_slice %43 {offsets = [0, 0], sizes = [1, 256], strides = [1, 1]} : vector<2x256xf32> to vector<1x256xf32>
    %c3_i32_135 = arith.constant 3 : i32
    %536 = tpu.dynamic_rotate %535 by %c3_i32_135 dim 1 : vector<1x256xf32>, i32 -> vector<1x256xf32>
    %c21 = arith.constant 21 : index
    %537 = memref.load %arg4[%c21] : memref<98xf32, #tpu.memory_space<smem>>
    %cst_136 = arith.constant 0.000000e+00 : f32
    %538 = vector.broadcast %cst_136 : f32 to vector<1x256xf32>
    %539 = arith.select %534, %536, %538 : vector<1x256xi1>, vector<1x256xf32>
    %540 = vector.broadcast %537 : f32 to vector<1x256xf32>
    %541 = arith.mulf %540, %539 : vector<1x256xf32>
    %542 = arith.addf %523, %541 : vector<1x256xf32>
    %543 = vector.extract_strided_slice %43 {offsets = [1, 0], sizes = [1, 256], strides = [1, 1]} : vector<2x256xf32> to vector<1x256xf32>
    %c3_i32_137 = arith.constant 3 : i32
    %544 = tpu.dynamic_rotate %543 by %c3_i32_137 dim 1 : vector<1x256xf32>, i32 -> vector<1x256xf32>
    %c70 = arith.constant 70 : index
    %545 = memref.load %arg4[%c70] : memref<98xf32, #tpu.memory_space<smem>>
    %cst_138 = arith.constant 0.000000e+00 : f32
    %546 = vector.broadcast %cst_138 : f32 to vector<1x256xf32>
    %547 = arith.select %534, %544, %546 : vector<1x256xi1>, vector<1x256xf32>
    %548 = vector.broadcast %545 : f32 to vector<1x256xf32>
    %549 = arith.mulf %548, %547 : vector<1x256xf32>
    %550 = arith.addf %542, %549 : vector<1x256xf32>
    %c2_i32_139 = arith.constant 2 : i32
    %551 = vector.broadcast %c2_i32_139 : i32 to vector<1x256xi32>
    %552 = arith.cmpi sge, %45, %551 : vector<1x256xi32>
    %c18_i32_140 = arith.constant 18 : i32
    %553 = vector.broadcast %c18_i32_140 : i32 to vector<1x256xi32>
    %554 = arith.cmpi slt, %45, %553 : vector<1x256xi32>
    %555 = arith.andi %552, %554 : vector<1x256xi1>
    %556 = arith.andi %528, %555 : vector<1x256xi1>
    %557 = vector.extract_strided_slice %43 {offsets = [0, 0], sizes = [1, 256], strides = [1, 1]} : vector<2x256xf32> to vector<1x256xf32>
    %c2_i32_141 = arith.constant 2 : i32
    %558 = tpu.dynamic_rotate %557 by %c2_i32_141 dim 1 : vector<1x256xf32>, i32 -> vector<1x256xf32>
    %c22 = arith.constant 22 : index
    %559 = memref.load %arg4[%c22] : memref<98xf32, #tpu.memory_space<smem>>
    %cst_142 = arith.constant 0.000000e+00 : f32
    %560 = vector.broadcast %cst_142 : f32 to vector<1x256xf32>
    %561 = arith.select %556, %558, %560 : vector<1x256xi1>, vector<1x256xf32>
    %562 = vector.broadcast %559 : f32 to vector<1x256xf32>
    %563 = arith.mulf %562, %561 : vector<1x256xf32>
    %564 = arith.addf %550, %563 : vector<1x256xf32>
    %565 = vector.extract_strided_slice %43 {offsets = [1, 0], sizes = [1, 256], strides = [1, 1]} : vector<2x256xf32> to vector<1x256xf32>
    %c2_i32_143 = arith.constant 2 : i32
    %566 = tpu.dynamic_rotate %565 by %c2_i32_143 dim 1 : vector<1x256xf32>, i32 -> vector<1x256xf32>
    %c71 = arith.constant 71 : index
    %567 = memref.load %arg4[%c71] : memref<98xf32, #tpu.memory_space<smem>>
    %cst_144 = arith.constant 0.000000e+00 : f32
    %568 = vector.broadcast %cst_144 : f32 to vector<1x256xf32>
    %569 = arith.select %556, %566, %568 : vector<1x256xi1>, vector<1x256xf32>
    %570 = vector.broadcast %567 : f32 to vector<1x256xf32>
    %571 = arith.mulf %570, %569 : vector<1x256xf32>
    %572 = arith.addf %564, %571 : vector<1x256xf32>
    %c1_i32_145 = arith.constant 1 : i32
    %573 = vector.broadcast %c1_i32_145 : i32 to vector<1x256xi32>
    %574 = arith.cmpi sge, %45, %573 : vector<1x256xi32>
    %c17_i32_146 = arith.constant 17 : i32
    %575 = vector.broadcast %c17_i32_146 : i32 to vector<1x256xi32>
    %576 = arith.cmpi slt, %45, %575 : vector<1x256xi32>
    %577 = arith.andi %574, %576 : vector<1x256xi1>
    %578 = arith.andi %528, %577 : vector<1x256xi1>
    %579 = vector.extract_strided_slice %43 {offsets = [0, 0], sizes = [1, 256], strides = [1, 1]} : vector<2x256xf32> to vector<1x256xf32>
    %c1_i32_147 = arith.constant 1 : i32
    %580 = tpu.dynamic_rotate %579 by %c1_i32_147 dim 1 : vector<1x256xf32>, i32 -> vector<1x256xf32>
    %c23 = arith.constant 23 : index
    %581 = memref.load %arg4[%c23] : memref<98xf32, #tpu.memory_space<smem>>
    %cst_148 = arith.constant 0.000000e+00 : f32
    %582 = vector.broadcast %cst_148 : f32 to vector<1x256xf32>
    %583 = arith.select %578, %580, %582 : vector<1x256xi1>, vector<1x256xf32>
    %584 = vector.broadcast %581 : f32 to vector<1x256xf32>
    %585 = arith.mulf %584, %583 : vector<1x256xf32>
    %586 = arith.addf %572, %585 : vector<1x256xf32>
    %587 = vector.extract_strided_slice %43 {offsets = [1, 0], sizes = [1, 256], strides = [1, 1]} : vector<2x256xf32> to vector<1x256xf32>
    %c1_i32_149 = arith.constant 1 : i32
    %588 = tpu.dynamic_rotate %587 by %c1_i32_149 dim 1 : vector<1x256xf32>, i32 -> vector<1x256xf32>
    %c72 = arith.constant 72 : index
    %589 = memref.load %arg4[%c72] : memref<98xf32, #tpu.memory_space<smem>>
    %cst_150 = arith.constant 0.000000e+00 : f32
    %590 = vector.broadcast %cst_150 : f32 to vector<1x256xf32>
    %591 = arith.select %578, %588, %590 : vector<1x256xi1>, vector<1x256xf32>
    %592 = vector.broadcast %589 : f32 to vector<1x256xf32>
    %593 = arith.mulf %592, %591 : vector<1x256xf32>
    %594 = arith.addf %586, %593 : vector<1x256xf32>
    %c0_i32_151 = arith.constant 0 : i32
    %595 = vector.broadcast %c0_i32_151 : i32 to vector<1x256xi32>
    %596 = arith.cmpi sge, %45, %595 : vector<1x256xi32>
    %c16_i32_152 = arith.constant 16 : i32
    %597 = vector.broadcast %c16_i32_152 : i32 to vector<1x256xi32>
    %598 = arith.cmpi slt, %45, %597 : vector<1x256xi32>
    %599 = arith.andi %596, %598 : vector<1x256xi1>
    %600 = arith.andi %528, %599 : vector<1x256xi1>
    %601 = vector.extract_strided_slice %43 {offsets = [0, 0], sizes = [1, 256], strides = [1, 1]} : vector<2x256xf32> to vector<1x256xf32>
    %c24 = arith.constant 24 : index
    %602 = memref.load %arg4[%c24] : memref<98xf32, #tpu.memory_space<smem>>
    %cst_153 = arith.constant 0.000000e+00 : f32
    %603 = vector.broadcast %cst_153 : f32 to vector<1x256xf32>
    %604 = arith.select %600, %601, %603 : vector<1x256xi1>, vector<1x256xf32>
    %605 = vector.broadcast %602 : f32 to vector<1x256xf32>
    %606 = arith.mulf %605, %604 : vector<1x256xf32>
    %607 = arith.addf %594, %606 : vector<1x256xf32>
    %608 = vector.extract_strided_slice %43 {offsets = [1, 0], sizes = [1, 256], strides = [1, 1]} : vector<2x256xf32> to vector<1x256xf32>
    %c73 = arith.constant 73 : index
    %609 = memref.load %arg4[%c73] : memref<98xf32, #tpu.memory_space<smem>>
    %cst_154 = arith.constant 0.000000e+00 : f32
    %610 = vector.broadcast %cst_154 : f32 to vector<1x256xf32>
    %611 = arith.select %600, %608, %610 : vector<1x256xi1>, vector<1x256xf32>
    %612 = vector.broadcast %609 : f32 to vector<1x256xf32>
    %613 = arith.mulf %612, %611 : vector<1x256xf32>
    %614 = arith.addf %607, %613 : vector<1x256xf32>
    %c-1_i32_155 = arith.constant -1 : i32
    %615 = vector.broadcast %c-1_i32_155 : i32 to vector<1x256xi32>
    %616 = arith.cmpi sge, %45, %615 : vector<1x256xi32>
    %c15_i32_156 = arith.constant 15 : i32
    %617 = vector.broadcast %c15_i32_156 : i32 to vector<1x256xi32>
    %618 = arith.cmpi slt, %45, %617 : vector<1x256xi32>
    %619 = arith.andi %616, %618 : vector<1x256xi1>
    %620 = arith.andi %528, %619 : vector<1x256xi1>
    %621 = vector.extract_strided_slice %43 {offsets = [0, 0], sizes = [1, 256], strides = [1, 1]} : vector<2x256xf32> to vector<1x256xf32>
    %c255_i32 = arith.constant 255 : i32
    %622 = tpu.dynamic_rotate %621 by %c255_i32 dim 1 : vector<1x256xf32>, i32 -> vector<1x256xf32>
    %c25 = arith.constant 25 : index
    %623 = memref.load %arg4[%c25] : memref<98xf32, #tpu.memory_space<smem>>
    %cst_157 = arith.constant 0.000000e+00 : f32
    %624 = vector.broadcast %cst_157 : f32 to vector<1x256xf32>
    %625 = arith.select %620, %622, %624 : vector<1x256xi1>, vector<1x256xf32>
    %626 = vector.broadcast %623 : f32 to vector<1x256xf32>
    %627 = arith.mulf %626, %625 : vector<1x256xf32>
    %628 = arith.addf %614, %627 : vector<1x256xf32>
    %629 = vector.extract_strided_slice %43 {offsets = [1, 0], sizes = [1, 256], strides = [1, 1]} : vector<2x256xf32> to vector<1x256xf32>
    %c255_i32_158 = arith.constant 255 : i32
    %630 = tpu.dynamic_rotate %629 by %c255_i32_158 dim 1 : vector<1x256xf32>, i32 -> vector<1x256xf32>
    %c74 = arith.constant 74 : index
    %631 = memref.load %arg4[%c74] : memref<98xf32, #tpu.memory_space<smem>>
    %cst_159 = arith.constant 0.000000e+00 : f32
    %632 = vector.broadcast %cst_159 : f32 to vector<1x256xf32>
    %633 = arith.select %620, %630, %632 : vector<1x256xi1>, vector<1x256xf32>
    %634 = vector.broadcast %631 : f32 to vector<1x256xf32>
    %635 = arith.mulf %634, %633 : vector<1x256xf32>
    %636 = arith.addf %628, %635 : vector<1x256xf32>
    %c-2_i32_160 = arith.constant -2 : i32
    %637 = vector.broadcast %c-2_i32_160 : i32 to vector<1x256xi32>
    %638 = arith.cmpi sge, %45, %637 : vector<1x256xi32>
    %c14_i32_161 = arith.constant 14 : i32
    %639 = vector.broadcast %c14_i32_161 : i32 to vector<1x256xi32>
    %640 = arith.cmpi slt, %45, %639 : vector<1x256xi32>
    %641 = arith.andi %638, %640 : vector<1x256xi1>
    %642 = arith.andi %528, %641 : vector<1x256xi1>
    %643 = vector.extract_strided_slice %43 {offsets = [0, 0], sizes = [1, 256], strides = [1, 1]} : vector<2x256xf32> to vector<1x256xf32>
    %c254_i32 = arith.constant 254 : i32
    %644 = tpu.dynamic_rotate %643 by %c254_i32 dim 1 : vector<1x256xf32>, i32 -> vector<1x256xf32>
    %c26 = arith.constant 26 : index
    %645 = memref.load %arg4[%c26] : memref<98xf32, #tpu.memory_space<smem>>
    %cst_162 = arith.constant 0.000000e+00 : f32
    %646 = vector.broadcast %cst_162 : f32 to vector<1x256xf32>
    %647 = arith.select %642, %644, %646 : vector<1x256xi1>, vector<1x256xf32>
    %648 = vector.broadcast %645 : f32 to vector<1x256xf32>
    %649 = arith.mulf %648, %647 : vector<1x256xf32>
    %650 = arith.addf %636, %649 : vector<1x256xf32>
    %651 = vector.extract_strided_slice %43 {offsets = [1, 0], sizes = [1, 256], strides = [1, 1]} : vector<2x256xf32> to vector<1x256xf32>
    %c254_i32_163 = arith.constant 254 : i32
    %652 = tpu.dynamic_rotate %651 by %c254_i32_163 dim 1 : vector<1x256xf32>, i32 -> vector<1x256xf32>
    %c75 = arith.constant 75 : index
    %653 = memref.load %arg4[%c75] : memref<98xf32, #tpu.memory_space<smem>>
    %cst_164 = arith.constant 0.000000e+00 : f32
    %654 = vector.broadcast %cst_164 : f32 to vector<1x256xf32>
    %655 = arith.select %642, %652, %654 : vector<1x256xi1>, vector<1x256xf32>
    %656 = vector.broadcast %653 : f32 to vector<1x256xf32>
    %657 = arith.mulf %656, %655 : vector<1x256xf32>
    %658 = arith.addf %650, %657 : vector<1x256xf32>
    %c-3_i32_165 = arith.constant -3 : i32
    %659 = vector.broadcast %c-3_i32_165 : i32 to vector<1x256xi32>
    %660 = arith.cmpi sge, %45, %659 : vector<1x256xi32>
    %c13_i32_166 = arith.constant 13 : i32
    %661 = vector.broadcast %c13_i32_166 : i32 to vector<1x256xi32>
    %662 = arith.cmpi slt, %45, %661 : vector<1x256xi32>
    %663 = arith.andi %660, %662 : vector<1x256xi1>
    %664 = arith.andi %528, %663 : vector<1x256xi1>
    %665 = vector.extract_strided_slice %43 {offsets = [0, 0], sizes = [1, 256], strides = [1, 1]} : vector<2x256xf32> to vector<1x256xf32>
    %c253_i32 = arith.constant 253 : i32
    %666 = tpu.dynamic_rotate %665 by %c253_i32 dim 1 : vector<1x256xf32>, i32 -> vector<1x256xf32>
    %c27 = arith.constant 27 : index
    %667 = memref.load %arg4[%c27] : memref<98xf32, #tpu.memory_space<smem>>
    %cst_167 = arith.constant 0.000000e+00 : f32
    %668 = vector.broadcast %cst_167 : f32 to vector<1x256xf32>
    %669 = arith.select %664, %666, %668 : vector<1x256xi1>, vector<1x256xf32>
    %670 = vector.broadcast %667 : f32 to vector<1x256xf32>
    %671 = arith.mulf %670, %669 : vector<1x256xf32>
    %672 = arith.addf %658, %671 : vector<1x256xf32>
    %673 = vector.extract_strided_slice %43 {offsets = [1, 0], sizes = [1, 256], strides = [1, 1]} : vector<2x256xf32> to vector<1x256xf32>
    %c253_i32_168 = arith.constant 253 : i32
    %674 = tpu.dynamic_rotate %673 by %c253_i32_168 dim 1 : vector<1x256xf32>, i32 -> vector<1x256xf32>
    %c76 = arith.constant 76 : index
    %675 = memref.load %arg4[%c76] : memref<98xf32, #tpu.memory_space<smem>>
    %cst_169 = arith.constant 0.000000e+00 : f32
    %676 = vector.broadcast %cst_169 : f32 to vector<1x256xf32>
    %677 = arith.select %664, %674, %676 : vector<1x256xi1>, vector<1x256xf32>
    %678 = vector.broadcast %675 : f32 to vector<1x256xf32>
    %679 = arith.mulf %678, %677 : vector<1x256xf32>
    %680 = arith.addf %672, %679 : vector<1x256xf32>
    %c-1_i32_170 = arith.constant -1 : i32
    %681 = vector.broadcast %c-1_i32_170 : i32 to vector<1x256xi32>
    %682 = arith.cmpi sge, %44, %681 : vector<1x256xi32>
    %c15_i32_171 = arith.constant 15 : i32
    %683 = vector.broadcast %c15_i32_171 : i32 to vector<1x256xi32>
    %684 = arith.cmpi slt, %44, %683 : vector<1x256xi32>
    %685 = arith.andi %682, %684 : vector<1x256xi1>
    %c3_i32_172 = arith.constant 3 : i32
    %686 = vector.broadcast %c3_i32_172 : i32 to vector<1x256xi32>
    %687 = arith.cmpi sge, %45, %686 : vector<1x256xi32>
    %c19_i32_173 = arith.constant 19 : i32
    %688 = vector.broadcast %c19_i32_173 : i32 to vector<1x256xi32>
    %689 = arith.cmpi slt, %45, %688 : vector<1x256xi32>
    %690 = arith.andi %687, %689 : vector<1x256xi1>
    %691 = arith.andi %685, %690 : vector<1x256xi1>
    %692 = vector.extract_strided_slice %43 {offsets = [0, 0], sizes = [1, 256], strides = [1, 1]} : vector<2x256xf32> to vector<1x256xf32>
    %c243_i32 = arith.constant 243 : i32
    %693 = tpu.dynamic_rotate %692 by %c243_i32 dim 1 : vector<1x256xf32>, i32 -> vector<1x256xf32>
    %c28 = arith.constant 28 : index
    %694 = memref.load %arg4[%c28] : memref<98xf32, #tpu.memory_space<smem>>
    %cst_174 = arith.constant 0.000000e+00 : f32
    %695 = vector.broadcast %cst_174 : f32 to vector<1x256xf32>
    %696 = arith.select %691, %693, %695 : vector<1x256xi1>, vector<1x256xf32>
    %697 = vector.broadcast %694 : f32 to vector<1x256xf32>
    %698 = arith.mulf %697, %696 : vector<1x256xf32>
    %699 = arith.addf %680, %698 : vector<1x256xf32>
    %700 = vector.extract_strided_slice %43 {offsets = [1, 0], sizes = [1, 256], strides = [1, 1]} : vector<2x256xf32> to vector<1x256xf32>
    %c243_i32_175 = arith.constant 243 : i32
    %701 = tpu.dynamic_rotate %700 by %c243_i32_175 dim 1 : vector<1x256xf32>, i32 -> vector<1x256xf32>
    %c77 = arith.constant 77 : index
    %702 = memref.load %arg4[%c77] : memref<98xf32, #tpu.memory_space<smem>>
    %cst_176 = arith.constant 0.000000e+00 : f32
    %703 = vector.broadcast %cst_176 : f32 to vector<1x256xf32>
    %704 = arith.select %691, %701, %703 : vector<1x256xi1>, vector<1x256xf32>
    %705 = vector.broadcast %702 : f32 to vector<1x256xf32>
    %706 = arith.mulf %705, %704 : vector<1x256xf32>
    %707 = arith.addf %699, %706 : vector<1x256xf32>
    %c2_i32_177 = arith.constant 2 : i32
    %708 = vector.broadcast %c2_i32_177 : i32 to vector<1x256xi32>
    %709 = arith.cmpi sge, %45, %708 : vector<1x256xi32>
    %c18_i32_178 = arith.constant 18 : i32
    %710 = vector.broadcast %c18_i32_178 : i32 to vector<1x256xi32>
    %711 = arith.cmpi slt, %45, %710 : vector<1x256xi32>
    %712 = arith.andi %709, %711 : vector<1x256xi1>
    %713 = arith.andi %685, %712 : vector<1x256xi1>
    %714 = vector.extract_strided_slice %43 {offsets = [0, 0], sizes = [1, 256], strides = [1, 1]} : vector<2x256xf32> to vector<1x256xf32>
    %c242_i32 = arith.constant 242 : i32
    %715 = tpu.dynamic_rotate %714 by %c242_i32 dim 1 : vector<1x256xf32>, i32 -> vector<1x256xf32>
    %c29 = arith.constant 29 : index
    %716 = memref.load %arg4[%c29] : memref<98xf32, #tpu.memory_space<smem>>
    %cst_179 = arith.constant 0.000000e+00 : f32
    %717 = vector.broadcast %cst_179 : f32 to vector<1x256xf32>
    %718 = arith.select %713, %715, %717 : vector<1x256xi1>, vector<1x256xf32>
    %719 = vector.broadcast %716 : f32 to vector<1x256xf32>
    %720 = arith.mulf %719, %718 : vector<1x256xf32>
    %721 = arith.addf %707, %720 : vector<1x256xf32>
    %722 = vector.extract_strided_slice %43 {offsets = [1, 0], sizes = [1, 256], strides = [1, 1]} : vector<2x256xf32> to vector<1x256xf32>
    %c242_i32_180 = arith.constant 242 : i32
    %723 = tpu.dynamic_rotate %722 by %c242_i32_180 dim 1 : vector<1x256xf32>, i32 -> vector<1x256xf32>
    %c78 = arith.constant 78 : index
    %724 = memref.load %arg4[%c78] : memref<98xf32, #tpu.memory_space<smem>>
    %cst_181 = arith.constant 0.000000e+00 : f32
    %725 = vector.broadcast %cst_181 : f32 to vector<1x256xf32>
    %726 = arith.select %713, %723, %725 : vector<1x256xi1>, vector<1x256xf32>
    %727 = vector.broadcast %724 : f32 to vector<1x256xf32>
    %728 = arith.mulf %727, %726 : vector<1x256xf32>
    %729 = arith.addf %721, %728 : vector<1x256xf32>
    %c1_i32_182 = arith.constant 1 : i32
    %730 = vector.broadcast %c1_i32_182 : i32 to vector<1x256xi32>
    %731 = arith.cmpi sge, %45, %730 : vector<1x256xi32>
    %c17_i32_183 = arith.constant 17 : i32
    %732 = vector.broadcast %c17_i32_183 : i32 to vector<1x256xi32>
    %733 = arith.cmpi slt, %45, %732 : vector<1x256xi32>
    %734 = arith.andi %731, %733 : vector<1x256xi1>
    %735 = arith.andi %685, %734 : vector<1x256xi1>
    %736 = vector.extract_strided_slice %43 {offsets = [0, 0], sizes = [1, 256], strides = [1, 1]} : vector<2x256xf32> to vector<1x256xf32>
    %c241_i32 = arith.constant 241 : i32
    %737 = tpu.dynamic_rotate %736 by %c241_i32 dim 1 : vector<1x256xf32>, i32 -> vector<1x256xf32>
    %c30 = arith.constant 30 : index
    %738 = memref.load %arg4[%c30] : memref<98xf32, #tpu.memory_space<smem>>
    %cst_184 = arith.constant 0.000000e+00 : f32
    %739 = vector.broadcast %cst_184 : f32 to vector<1x256xf32>
    %740 = arith.select %735, %737, %739 : vector<1x256xi1>, vector<1x256xf32>
    %741 = vector.broadcast %738 : f32 to vector<1x256xf32>
    %742 = arith.mulf %741, %740 : vector<1x256xf32>
    %743 = arith.addf %729, %742 : vector<1x256xf32>
    %744 = vector.extract_strided_slice %43 {offsets = [1, 0], sizes = [1, 256], strides = [1, 1]} : vector<2x256xf32> to vector<1x256xf32>
    %c241_i32_185 = arith.constant 241 : i32
    %745 = tpu.dynamic_rotate %744 by %c241_i32_185 dim 1 : vector<1x256xf32>, i32 -> vector<1x256xf32>
    %c79 = arith.constant 79 : index
    %746 = memref.load %arg4[%c79] : memref<98xf32, #tpu.memory_space<smem>>
    %cst_186 = arith.constant 0.000000e+00 : f32
    %747 = vector.broadcast %cst_186 : f32 to vector<1x256xf32>
    %748 = arith.select %735, %745, %747 : vector<1x256xi1>, vector<1x256xf32>
    %749 = vector.broadcast %746 : f32 to vector<1x256xf32>
    %750 = arith.mulf %749, %748 : vector<1x256xf32>
    %751 = arith.addf %743, %750 : vector<1x256xf32>
    %c0_i32_187 = arith.constant 0 : i32
    %752 = vector.broadcast %c0_i32_187 : i32 to vector<1x256xi32>
    %753 = arith.cmpi sge, %45, %752 : vector<1x256xi32>
    %c16_i32_188 = arith.constant 16 : i32
    %754 = vector.broadcast %c16_i32_188 : i32 to vector<1x256xi32>
    %755 = arith.cmpi slt, %45, %754 : vector<1x256xi32>
    %756 = arith.andi %753, %755 : vector<1x256xi1>
    %757 = arith.andi %685, %756 : vector<1x256xi1>
    %758 = vector.extract_strided_slice %43 {offsets = [0, 0], sizes = [1, 256], strides = [1, 1]} : vector<2x256xf32> to vector<1x256xf32>
    %c240_i32 = arith.constant 240 : i32
    %759 = tpu.dynamic_rotate %758 by %c240_i32 dim 1 : vector<1x256xf32>, i32 -> vector<1x256xf32>
    %c31 = arith.constant 31 : index
    %760 = memref.load %arg4[%c31] : memref<98xf32, #tpu.memory_space<smem>>
    %cst_189 = arith.constant 0.000000e+00 : f32
    %761 = vector.broadcast %cst_189 : f32 to vector<1x256xf32>
    %762 = arith.select %757, %759, %761 : vector<1x256xi1>, vector<1x256xf32>
    %763 = vector.broadcast %760 : f32 to vector<1x256xf32>
    %764 = arith.mulf %763, %762 : vector<1x256xf32>
    %765 = arith.addf %751, %764 : vector<1x256xf32>
    %766 = vector.extract_strided_slice %43 {offsets = [1, 0], sizes = [1, 256], strides = [1, 1]} : vector<2x256xf32> to vector<1x256xf32>
    %c240_i32_190 = arith.constant 240 : i32
    %767 = tpu.dynamic_rotate %766 by %c240_i32_190 dim 1 : vector<1x256xf32>, i32 -> vector<1x256xf32>
    %c80 = arith.constant 80 : index
    %768 = memref.load %arg4[%c80] : memref<98xf32, #tpu.memory_space<smem>>
    %cst_191 = arith.constant 0.000000e+00 : f32
    %769 = vector.broadcast %cst_191 : f32 to vector<1x256xf32>
    %770 = arith.select %757, %767, %769 : vector<1x256xi1>, vector<1x256xf32>
    %771 = vector.broadcast %768 : f32 to vector<1x256xf32>
    %772 = arith.mulf %771, %770 : vector<1x256xf32>
    %773 = arith.addf %765, %772 : vector<1x256xf32>
    %c-1_i32_192 = arith.constant -1 : i32
    %774 = vector.broadcast %c-1_i32_192 : i32 to vector<1x256xi32>
    %775 = arith.cmpi sge, %45, %774 : vector<1x256xi32>
    %c15_i32_193 = arith.constant 15 : i32
    %776 = vector.broadcast %c15_i32_193 : i32 to vector<1x256xi32>
    %777 = arith.cmpi slt, %45, %776 : vector<1x256xi32>
    %778 = arith.andi %775, %777 : vector<1x256xi1>
    %779 = arith.andi %685, %778 : vector<1x256xi1>
    %780 = vector.extract_strided_slice %43 {offsets = [0, 0], sizes = [1, 256], strides = [1, 1]} : vector<2x256xf32> to vector<1x256xf32>
    %c239_i32 = arith.constant 239 : i32
    %781 = tpu.dynamic_rotate %780 by %c239_i32 dim 1 : vector<1x256xf32>, i32 -> vector<1x256xf32>
    %c32 = arith.constant 32 : index
    %782 = memref.load %arg4[%c32] : memref<98xf32, #tpu.memory_space<smem>>
    %cst_194 = arith.constant 0.000000e+00 : f32
    %783 = vector.broadcast %cst_194 : f32 to vector<1x256xf32>
    %784 = arith.select %779, %781, %783 : vector<1x256xi1>, vector<1x256xf32>
    %785 = vector.broadcast %782 : f32 to vector<1x256xf32>
    %786 = arith.mulf %785, %784 : vector<1x256xf32>
    %787 = arith.addf %773, %786 : vector<1x256xf32>
    %788 = vector.extract_strided_slice %43 {offsets = [1, 0], sizes = [1, 256], strides = [1, 1]} : vector<2x256xf32> to vector<1x256xf32>
    %c239_i32_195 = arith.constant 239 : i32
    %789 = tpu.dynamic_rotate %788 by %c239_i32_195 dim 1 : vector<1x256xf32>, i32 -> vector<1x256xf32>
    %c81 = arith.constant 81 : index
    %790 = memref.load %arg4[%c81] : memref<98xf32, #tpu.memory_space<smem>>
    %cst_196 = arith.constant 0.000000e+00 : f32
    %791 = vector.broadcast %cst_196 : f32 to vector<1x256xf32>
    %792 = arith.select %779, %789, %791 : vector<1x256xi1>, vector<1x256xf32>
    %793 = vector.broadcast %790 : f32 to vector<1x256xf32>
    %794 = arith.mulf %793, %792 : vector<1x256xf32>
    %795 = arith.addf %787, %794 : vector<1x256xf32>
    %c-2_i32_197 = arith.constant -2 : i32
    %796 = vector.broadcast %c-2_i32_197 : i32 to vector<1x256xi32>
    %797 = arith.cmpi sge, %45, %796 : vector<1x256xi32>
    %c14_i32_198 = arith.constant 14 : i32
    %798 = vector.broadcast %c14_i32_198 : i32 to vector<1x256xi32>
    %799 = arith.cmpi slt, %45, %798 : vector<1x256xi32>
    %800 = arith.andi %797, %799 : vector<1x256xi1>
    %801 = arith.andi %685, %800 : vector<1x256xi1>
    %802 = vector.extract_strided_slice %43 {offsets = [0, 0], sizes = [1, 256], strides = [1, 1]} : vector<2x256xf32> to vector<1x256xf32>
    %c238_i32 = arith.constant 238 : i32
    %803 = tpu.dynamic_rotate %802 by %c238_i32 dim 1 : vector<1x256xf32>, i32 -> vector<1x256xf32>
    %c33 = arith.constant 33 : index
    %804 = memref.load %arg4[%c33] : memref<98xf32, #tpu.memory_space<smem>>
    %cst_199 = arith.constant 0.000000e+00 : f32
    %805 = vector.broadcast %cst_199 : f32 to vector<1x256xf32>
    %806 = arith.select %801, %803, %805 : vector<1x256xi1>, vector<1x256xf32>
    %807 = vector.broadcast %804 : f32 to vector<1x256xf32>
    %808 = arith.mulf %807, %806 : vector<1x256xf32>
    %809 = arith.addf %795, %808 : vector<1x256xf32>
    %810 = vector.extract_strided_slice %43 {offsets = [1, 0], sizes = [1, 256], strides = [1, 1]} : vector<2x256xf32> to vector<1x256xf32>
    %c238_i32_200 = arith.constant 238 : i32
    %811 = tpu.dynamic_rotate %810 by %c238_i32_200 dim 1 : vector<1x256xf32>, i32 -> vector<1x256xf32>
    %c82 = arith.constant 82 : index
    %812 = memref.load %arg4[%c82] : memref<98xf32, #tpu.memory_space<smem>>
    %cst_201 = arith.constant 0.000000e+00 : f32
    %813 = vector.broadcast %cst_201 : f32 to vector<1x256xf32>
    %814 = arith.select %801, %811, %813 : vector<1x256xi1>, vector<1x256xf32>
    %815 = vector.broadcast %812 : f32 to vector<1x256xf32>
    %816 = arith.mulf %815, %814 : vector<1x256xf32>
    %817 = arith.addf %809, %816 : vector<1x256xf32>
    %c-3_i32_202 = arith.constant -3 : i32
    %818 = vector.broadcast %c-3_i32_202 : i32 to vector<1x256xi32>
    %819 = arith.cmpi sge, %45, %818 : vector<1x256xi32>
    %c13_i32_203 = arith.constant 13 : i32
    %820 = vector.broadcast %c13_i32_203 : i32 to vector<1x256xi32>
    %821 = arith.cmpi slt, %45, %820 : vector<1x256xi32>
    %822 = arith.andi %819, %821 : vector<1x256xi1>
    %823 = arith.andi %685, %822 : vector<1x256xi1>
    %824 = vector.extract_strided_slice %43 {offsets = [0, 0], sizes = [1, 256], strides = [1, 1]} : vector<2x256xf32> to vector<1x256xf32>
    %c237_i32 = arith.constant 237 : i32
    %825 = tpu.dynamic_rotate %824 by %c237_i32 dim 1 : vector<1x256xf32>, i32 -> vector<1x256xf32>
    %c34 = arith.constant 34 : index
    %826 = memref.load %arg4[%c34] : memref<98xf32, #tpu.memory_space<smem>>
    %cst_204 = arith.constant 0.000000e+00 : f32
    %827 = vector.broadcast %cst_204 : f32 to vector<1x256xf32>
    %828 = arith.select %823, %825, %827 : vector<1x256xi1>, vector<1x256xf32>
    %829 = vector.broadcast %826 : f32 to vector<1x256xf32>
    %830 = arith.mulf %829, %828 : vector<1x256xf32>
    %831 = arith.addf %817, %830 : vector<1x256xf32>
    %832 = vector.extract_strided_slice %43 {offsets = [1, 0], sizes = [1, 256], strides = [1, 1]} : vector<2x256xf32> to vector<1x256xf32>
    %c237_i32_205 = arith.constant 237 : i32
    %833 = tpu.dynamic_rotate %832 by %c237_i32_205 dim 1 : vector<1x256xf32>, i32 -> vector<1x256xf32>
    %c83 = arith.constant 83 : index
    %834 = memref.load %arg4[%c83] : memref<98xf32, #tpu.memory_space<smem>>
    %cst_206 = arith.constant 0.000000e+00 : f32
    %835 = vector.broadcast %cst_206 : f32 to vector<1x256xf32>
    %836 = arith.select %823, %833, %835 : vector<1x256xi1>, vector<1x256xf32>
    %837 = vector.broadcast %834 : f32 to vector<1x256xf32>
    %838 = arith.mulf %837, %836 : vector<1x256xf32>
    %839 = arith.addf %831, %838 : vector<1x256xf32>
    %c-2_i32_207 = arith.constant -2 : i32
    %840 = vector.broadcast %c-2_i32_207 : i32 to vector<1x256xi32>
    %841 = arith.cmpi sge, %44, %840 : vector<1x256xi32>
    %c14_i32_208 = arith.constant 14 : i32
    %842 = vector.broadcast %c14_i32_208 : i32 to vector<1x256xi32>
    %843 = arith.cmpi slt, %44, %842 : vector<1x256xi32>
    %844 = arith.andi %841, %843 : vector<1x256xi1>
    %c3_i32_209 = arith.constant 3 : i32
    %845 = vector.broadcast %c3_i32_209 : i32 to vector<1x256xi32>
    %846 = arith.cmpi sge, %45, %845 : vector<1x256xi32>
    %c19_i32_210 = arith.constant 19 : i32
    %847 = vector.broadcast %c19_i32_210 : i32 to vector<1x256xi32>
    %848 = arith.cmpi slt, %45, %847 : vector<1x256xi32>
    %849 = arith.andi %846, %848 : vector<1x256xi1>
    %850 = arith.andi %844, %849 : vector<1x256xi1>
    %851 = vector.extract_strided_slice %43 {offsets = [0, 0], sizes = [1, 256], strides = [1, 1]} : vector<2x256xf32> to vector<1x256xf32>
    %c227_i32 = arith.constant 227 : i32
    %852 = tpu.dynamic_rotate %851 by %c227_i32 dim 1 : vector<1x256xf32>, i32 -> vector<1x256xf32>
    %c35 = arith.constant 35 : index
    %853 = memref.load %arg4[%c35] : memref<98xf32, #tpu.memory_space<smem>>
    %cst_211 = arith.constant 0.000000e+00 : f32
    %854 = vector.broadcast %cst_211 : f32 to vector<1x256xf32>
    %855 = arith.select %850, %852, %854 : vector<1x256xi1>, vector<1x256xf32>
    %856 = vector.broadcast %853 : f32 to vector<1x256xf32>
    %857 = arith.mulf %856, %855 : vector<1x256xf32>
    %858 = arith.addf %839, %857 : vector<1x256xf32>
    %859 = vector.extract_strided_slice %43 {offsets = [1, 0], sizes = [1, 256], strides = [1, 1]} : vector<2x256xf32> to vector<1x256xf32>
    %c227_i32_212 = arith.constant 227 : i32
    %860 = tpu.dynamic_rotate %859 by %c227_i32_212 dim 1 : vector<1x256xf32>, i32 -> vector<1x256xf32>
    %c84 = arith.constant 84 : index
    %861 = memref.load %arg4[%c84] : memref<98xf32, #tpu.memory_space<smem>>
    %cst_213 = arith.constant 0.000000e+00 : f32
    %862 = vector.broadcast %cst_213 : f32 to vector<1x256xf32>
    %863 = arith.select %850, %860, %862 : vector<1x256xi1>, vector<1x256xf32>
    %864 = vector.broadcast %861 : f32 to vector<1x256xf32>
    %865 = arith.mulf %864, %863 : vector<1x256xf32>
    %866 = arith.addf %858, %865 : vector<1x256xf32>
    %c2_i32_214 = arith.constant 2 : i32
    %867 = vector.broadcast %c2_i32_214 : i32 to vector<1x256xi32>
    %868 = arith.cmpi sge, %45, %867 : vector<1x256xi32>
    %c18_i32_215 = arith.constant 18 : i32
    %869 = vector.broadcast %c18_i32_215 : i32 to vector<1x256xi32>
    %870 = arith.cmpi slt, %45, %869 : vector<1x256xi32>
    %871 = arith.andi %868, %870 : vector<1x256xi1>
    %872 = arith.andi %844, %871 : vector<1x256xi1>
    %873 = vector.extract_strided_slice %43 {offsets = [0, 0], sizes = [1, 256], strides = [1, 1]} : vector<2x256xf32> to vector<1x256xf32>
    %c226_i32 = arith.constant 226 : i32
    %874 = tpu.dynamic_rotate %873 by %c226_i32 dim 1 : vector<1x256xf32>, i32 -> vector<1x256xf32>
    %c36 = arith.constant 36 : index
    %875 = memref.load %arg4[%c36] : memref<98xf32, #tpu.memory_space<smem>>
    %cst_216 = arith.constant 0.000000e+00 : f32
    %876 = vector.broadcast %cst_216 : f32 to vector<1x256xf32>
    %877 = arith.select %872, %874, %876 : vector<1x256xi1>, vector<1x256xf32>
    %878 = vector.broadcast %875 : f32 to vector<1x256xf32>
    %879 = arith.mulf %878, %877 : vector<1x256xf32>
    %880 = arith.addf %866, %879 : vector<1x256xf32>
    %881 = vector.extract_strided_slice %43 {offsets = [1, 0], sizes = [1, 256], strides = [1, 1]} : vector<2x256xf32> to vector<1x256xf32>
    %c226_i32_217 = arith.constant 226 : i32
    %882 = tpu.dynamic_rotate %881 by %c226_i32_217 dim 1 : vector<1x256xf32>, i32 -> vector<1x256xf32>
    %c85 = arith.constant 85 : index
    %883 = memref.load %arg4[%c85] : memref<98xf32, #tpu.memory_space<smem>>
    %cst_218 = arith.constant 0.000000e+00 : f32
    %884 = vector.broadcast %cst_218 : f32 to vector<1x256xf32>
    %885 = arith.select %872, %882, %884 : vector<1x256xi1>, vector<1x256xf32>
    %886 = vector.broadcast %883 : f32 to vector<1x256xf32>
    %887 = arith.mulf %886, %885 : vector<1x256xf32>
    %888 = arith.addf %880, %887 : vector<1x256xf32>
    %c1_i32_219 = arith.constant 1 : i32
    %889 = vector.broadcast %c1_i32_219 : i32 to vector<1x256xi32>
    %890 = arith.cmpi sge, %45, %889 : vector<1x256xi32>
    %c17_i32_220 = arith.constant 17 : i32
    %891 = vector.broadcast %c17_i32_220 : i32 to vector<1x256xi32>
    %892 = arith.cmpi slt, %45, %891 : vector<1x256xi32>
    %893 = arith.andi %890, %892 : vector<1x256xi1>
    %894 = arith.andi %844, %893 : vector<1x256xi1>
    %895 = vector.extract_strided_slice %43 {offsets = [0, 0], sizes = [1, 256], strides = [1, 1]} : vector<2x256xf32> to vector<1x256xf32>
    %c225_i32 = arith.constant 225 : i32
    %896 = tpu.dynamic_rotate %895 by %c225_i32 dim 1 : vector<1x256xf32>, i32 -> vector<1x256xf32>
    %c37 = arith.constant 37 : index
    %897 = memref.load %arg4[%c37] : memref<98xf32, #tpu.memory_space<smem>>
    %cst_221 = arith.constant 0.000000e+00 : f32
    %898 = vector.broadcast %cst_221 : f32 to vector<1x256xf32>
    %899 = arith.select %894, %896, %898 : vector<1x256xi1>, vector<1x256xf32>
    %900 = vector.broadcast %897 : f32 to vector<1x256xf32>
    %901 = arith.mulf %900, %899 : vector<1x256xf32>
    %902 = arith.addf %888, %901 : vector<1x256xf32>
    %903 = vector.extract_strided_slice %43 {offsets = [1, 0], sizes = [1, 256], strides = [1, 1]} : vector<2x256xf32> to vector<1x256xf32>
    %c225_i32_222 = arith.constant 225 : i32
    %904 = tpu.dynamic_rotate %903 by %c225_i32_222 dim 1 : vector<1x256xf32>, i32 -> vector<1x256xf32>
    %c86 = arith.constant 86 : index
    %905 = memref.load %arg4[%c86] : memref<98xf32, #tpu.memory_space<smem>>
    %cst_223 = arith.constant 0.000000e+00 : f32
    %906 = vector.broadcast %cst_223 : f32 to vector<1x256xf32>
    %907 = arith.select %894, %904, %906 : vector<1x256xi1>, vector<1x256xf32>
    %908 = vector.broadcast %905 : f32 to vector<1x256xf32>
    %909 = arith.mulf %908, %907 : vector<1x256xf32>
    %910 = arith.addf %902, %909 : vector<1x256xf32>
    %c0_i32_224 = arith.constant 0 : i32
    %911 = vector.broadcast %c0_i32_224 : i32 to vector<1x256xi32>
    %912 = arith.cmpi sge, %45, %911 : vector<1x256xi32>
    %c16_i32_225 = arith.constant 16 : i32
    %913 = vector.broadcast %c16_i32_225 : i32 to vector<1x256xi32>
    %914 = arith.cmpi slt, %45, %913 : vector<1x256xi32>
    %915 = arith.andi %912, %914 : vector<1x256xi1>
    %916 = arith.andi %844, %915 : vector<1x256xi1>
    %917 = vector.extract_strided_slice %43 {offsets = [0, 0], sizes = [1, 256], strides = [1, 1]} : vector<2x256xf32> to vector<1x256xf32>
    %c224_i32 = arith.constant 224 : i32
    %918 = tpu.dynamic_rotate %917 by %c224_i32 dim 1 : vector<1x256xf32>, i32 -> vector<1x256xf32>
    %c38 = arith.constant 38 : index
    %919 = memref.load %arg4[%c38] : memref<98xf32, #tpu.memory_space<smem>>
    %cst_226 = arith.constant 0.000000e+00 : f32
    %920 = vector.broadcast %cst_226 : f32 to vector<1x256xf32>
    %921 = arith.select %916, %918, %920 : vector<1x256xi1>, vector<1x256xf32>
    %922 = vector.broadcast %919 : f32 to vector<1x256xf32>
    %923 = arith.mulf %922, %921 : vector<1x256xf32>
    %924 = arith.addf %910, %923 : vector<1x256xf32>
    %925 = vector.extract_strided_slice %43 {offsets = [1, 0], sizes = [1, 256], strides = [1, 1]} : vector<2x256xf32> to vector<1x256xf32>
    %c224_i32_227 = arith.constant 224 : i32
    %926 = tpu.dynamic_rotate %925 by %c224_i32_227 dim 1 : vector<1x256xf32>, i32 -> vector<1x256xf32>
    %c87 = arith.constant 87 : index
    %927 = memref.load %arg4[%c87] : memref<98xf32, #tpu.memory_space<smem>>
    %cst_228 = arith.constant 0.000000e+00 : f32
    %928 = vector.broadcast %cst_228 : f32 to vector<1x256xf32>
    %929 = arith.select %916, %926, %928 : vector<1x256xi1>, vector<1x256xf32>
    %930 = vector.broadcast %927 : f32 to vector<1x256xf32>
    %931 = arith.mulf %930, %929 : vector<1x256xf32>
    %932 = arith.addf %924, %931 : vector<1x256xf32>
    %c-1_i32_229 = arith.constant -1 : i32
    %933 = vector.broadcast %c-1_i32_229 : i32 to vector<1x256xi32>
    %934 = arith.cmpi sge, %45, %933 : vector<1x256xi32>
    %c15_i32_230 = arith.constant 15 : i32
    %935 = vector.broadcast %c15_i32_230 : i32 to vector<1x256xi32>
    %936 = arith.cmpi slt, %45, %935 : vector<1x256xi32>
    %937 = arith.andi %934, %936 : vector<1x256xi1>
    %938 = arith.andi %844, %937 : vector<1x256xi1>
    %939 = vector.extract_strided_slice %43 {offsets = [0, 0], sizes = [1, 256], strides = [1, 1]} : vector<2x256xf32> to vector<1x256xf32>
    %c223_i32 = arith.constant 223 : i32
    %940 = tpu.dynamic_rotate %939 by %c223_i32 dim 1 : vector<1x256xf32>, i32 -> vector<1x256xf32>
    %c39 = arith.constant 39 : index
    %941 = memref.load %arg4[%c39] : memref<98xf32, #tpu.memory_space<smem>>
    %cst_231 = arith.constant 0.000000e+00 : f32
    %942 = vector.broadcast %cst_231 : f32 to vector<1x256xf32>
    %943 = arith.select %938, %940, %942 : vector<1x256xi1>, vector<1x256xf32>
    %944 = vector.broadcast %941 : f32 to vector<1x256xf32>
    %945 = arith.mulf %944, %943 : vector<1x256xf32>
    %946 = arith.addf %932, %945 : vector<1x256xf32>
    %947 = vector.extract_strided_slice %43 {offsets = [1, 0], sizes = [1, 256], strides = [1, 1]} : vector<2x256xf32> to vector<1x256xf32>
    %c223_i32_232 = arith.constant 223 : i32
    %948 = tpu.dynamic_rotate %947 by %c223_i32_232 dim 1 : vector<1x256xf32>, i32 -> vector<1x256xf32>
    %c88 = arith.constant 88 : index
    %949 = memref.load %arg4[%c88] : memref<98xf32, #tpu.memory_space<smem>>
    %cst_233 = arith.constant 0.000000e+00 : f32
    %950 = vector.broadcast %cst_233 : f32 to vector<1x256xf32>
    %951 = arith.select %938, %948, %950 : vector<1x256xi1>, vector<1x256xf32>
    %952 = vector.broadcast %949 : f32 to vector<1x256xf32>
    %953 = arith.mulf %952, %951 : vector<1x256xf32>
    %954 = arith.addf %946, %953 : vector<1x256xf32>
    %c-2_i32_234 = arith.constant -2 : i32
    %955 = vector.broadcast %c-2_i32_234 : i32 to vector<1x256xi32>
    %956 = arith.cmpi sge, %45, %955 : vector<1x256xi32>
    %c14_i32_235 = arith.constant 14 : i32
    %957 = vector.broadcast %c14_i32_235 : i32 to vector<1x256xi32>
    %958 = arith.cmpi slt, %45, %957 : vector<1x256xi32>
    %959 = arith.andi %956, %958 : vector<1x256xi1>
    %960 = arith.andi %844, %959 : vector<1x256xi1>
    %961 = vector.extract_strided_slice %43 {offsets = [0, 0], sizes = [1, 256], strides = [1, 1]} : vector<2x256xf32> to vector<1x256xf32>
    %c222_i32 = arith.constant 222 : i32
    %962 = tpu.dynamic_rotate %961 by %c222_i32 dim 1 : vector<1x256xf32>, i32 -> vector<1x256xf32>
    %c40 = arith.constant 40 : index
    %963 = memref.load %arg4[%c40] : memref<98xf32, #tpu.memory_space<smem>>
    %cst_236 = arith.constant 0.000000e+00 : f32
    %964 = vector.broadcast %cst_236 : f32 to vector<1x256xf32>
    %965 = arith.select %960, %962, %964 : vector<1x256xi1>, vector<1x256xf32>
    %966 = vector.broadcast %963 : f32 to vector<1x256xf32>
    %967 = arith.mulf %966, %965 : vector<1x256xf32>
    %968 = arith.addf %954, %967 : vector<1x256xf32>
    %969 = vector.extract_strided_slice %43 {offsets = [1, 0], sizes = [1, 256], strides = [1, 1]} : vector<2x256xf32> to vector<1x256xf32>
    %c222_i32_237 = arith.constant 222 : i32
    %970 = tpu.dynamic_rotate %969 by %c222_i32_237 dim 1 : vector<1x256xf32>, i32 -> vector<1x256xf32>
    %c89 = arith.constant 89 : index
    %971 = memref.load %arg4[%c89] : memref<98xf32, #tpu.memory_space<smem>>
    %cst_238 = arith.constant 0.000000e+00 : f32
    %972 = vector.broadcast %cst_238 : f32 to vector<1x256xf32>
    %973 = arith.select %960, %970, %972 : vector<1x256xi1>, vector<1x256xf32>
    %974 = vector.broadcast %971 : f32 to vector<1x256xf32>
    %975 = arith.mulf %974, %973 : vector<1x256xf32>
    %976 = arith.addf %968, %975 : vector<1x256xf32>
    %c-3_i32_239 = arith.constant -3 : i32
    %977 = vector.broadcast %c-3_i32_239 : i32 to vector<1x256xi32>
    %978 = arith.cmpi sge, %45, %977 : vector<1x256xi32>
    %c13_i32_240 = arith.constant 13 : i32
    %979 = vector.broadcast %c13_i32_240 : i32 to vector<1x256xi32>
    %980 = arith.cmpi slt, %45, %979 : vector<1x256xi32>
    %981 = arith.andi %978, %980 : vector<1x256xi1>
    %982 = arith.andi %844, %981 : vector<1x256xi1>
    %983 = vector.extract_strided_slice %43 {offsets = [0, 0], sizes = [1, 256], strides = [1, 1]} : vector<2x256xf32> to vector<1x256xf32>
    %c221_i32 = arith.constant 221 : i32
    %984 = tpu.dynamic_rotate %983 by %c221_i32 dim 1 : vector<1x256xf32>, i32 -> vector<1x256xf32>
    %c41 = arith.constant 41 : index
    %985 = memref.load %arg4[%c41] : memref<98xf32, #tpu.memory_space<smem>>
    %cst_241 = arith.constant 0.000000e+00 : f32
    %986 = vector.broadcast %cst_241 : f32 to vector<1x256xf32>
    %987 = arith.select %982, %984, %986 : vector<1x256xi1>, vector<1x256xf32>
    %988 = vector.broadcast %985 : f32 to vector<1x256xf32>
    %989 = arith.mulf %988, %987 : vector<1x256xf32>
    %990 = arith.addf %976, %989 : vector<1x256xf32>
    %991 = vector.extract_strided_slice %43 {offsets = [1, 0], sizes = [1, 256], strides = [1, 1]} : vector<2x256xf32> to vector<1x256xf32>
    %c221_i32_242 = arith.constant 221 : i32
    %992 = tpu.dynamic_rotate %991 by %c221_i32_242 dim 1 : vector<1x256xf32>, i32 -> vector<1x256xf32>
    %c90 = arith.constant 90 : index
    %993 = memref.load %arg4[%c90] : memref<98xf32, #tpu.memory_space<smem>>
    %cst_243 = arith.constant 0.000000e+00 : f32
    %994 = vector.broadcast %cst_243 : f32 to vector<1x256xf32>
    %995 = arith.select %982, %992, %994 : vector<1x256xi1>, vector<1x256xf32>
    %996 = vector.broadcast %993 : f32 to vector<1x256xf32>
    %997 = arith.mulf %996, %995 : vector<1x256xf32>
    %998 = arith.addf %990, %997 : vector<1x256xf32>
    %c-3_i32_244 = arith.constant -3 : i32
    %999 = vector.broadcast %c-3_i32_244 : i32 to vector<1x256xi32>
    %1000 = arith.cmpi sge, %44, %999 : vector<1x256xi32>
    %c13_i32_245 = arith.constant 13 : i32
    %1001 = vector.broadcast %c13_i32_245 : i32 to vector<1x256xi32>
    %1002 = arith.cmpi slt, %44, %1001 : vector<1x256xi32>
    %1003 = arith.andi %1000, %1002 : vector<1x256xi1>
    %c3_i32_246 = arith.constant 3 : i32
    %1004 = vector.broadcast %c3_i32_246 : i32 to vector<1x256xi32>
    %1005 = arith.cmpi sge, %45, %1004 : vector<1x256xi32>
    %c19_i32_247 = arith.constant 19 : i32
    %1006 = vector.broadcast %c19_i32_247 : i32 to vector<1x256xi32>
    %1007 = arith.cmpi slt, %45, %1006 : vector<1x256xi32>
    %1008 = arith.andi %1005, %1007 : vector<1x256xi1>
    %1009 = arith.andi %1003, %1008 : vector<1x256xi1>
    %1010 = vector.extract_strided_slice %43 {offsets = [0, 0], sizes = [1, 256], strides = [1, 1]} : vector<2x256xf32> to vector<1x256xf32>
    %c211_i32 = arith.constant 211 : i32
    %1011 = tpu.dynamic_rotate %1010 by %c211_i32 dim 1 : vector<1x256xf32>, i32 -> vector<1x256xf32>
    %c42 = arith.constant 42 : index
    %1012 = memref.load %arg4[%c42] : memref<98xf32, #tpu.memory_space<smem>>
    %cst_248 = arith.constant 0.000000e+00 : f32
    %1013 = vector.broadcast %cst_248 : f32 to vector<1x256xf32>
    %1014 = arith.select %1009, %1011, %1013 : vector<1x256xi1>, vector<1x256xf32>
    %1015 = vector.broadcast %1012 : f32 to vector<1x256xf32>
    %1016 = arith.mulf %1015, %1014 : vector<1x256xf32>
    %1017 = arith.addf %998, %1016 : vector<1x256xf32>
    %1018 = vector.extract_strided_slice %43 {offsets = [1, 0], sizes = [1, 256], strides = [1, 1]} : vector<2x256xf32> to vector<1x256xf32>
    %c211_i32_249 = arith.constant 211 : i32
    %1019 = tpu.dynamic_rotate %1018 by %c211_i32_249 dim 1 : vector<1x256xf32>, i32 -> vector<1x256xf32>
    %c91 = arith.constant 91 : index
    %1020 = memref.load %arg4[%c91] : memref<98xf32, #tpu.memory_space<smem>>
    %cst_250 = arith.constant 0.000000e+00 : f32
    %1021 = vector.broadcast %cst_250 : f32 to vector<1x256xf32>
    %1022 = arith.select %1009, %1019, %1021 : vector<1x256xi1>, vector<1x256xf32>
    %1023 = vector.broadcast %1020 : f32 to vector<1x256xf32>
    %1024 = arith.mulf %1023, %1022 : vector<1x256xf32>
    %1025 = arith.addf %1017, %1024 : vector<1x256xf32>
    %c2_i32_251 = arith.constant 2 : i32
    %1026 = vector.broadcast %c2_i32_251 : i32 to vector<1x256xi32>
    %1027 = arith.cmpi sge, %45, %1026 : vector<1x256xi32>
    %c18_i32_252 = arith.constant 18 : i32
    %1028 = vector.broadcast %c18_i32_252 : i32 to vector<1x256xi32>
    %1029 = arith.cmpi slt, %45, %1028 : vector<1x256xi32>
    %1030 = arith.andi %1027, %1029 : vector<1x256xi1>
    %1031 = arith.andi %1003, %1030 : vector<1x256xi1>
    %1032 = vector.extract_strided_slice %43 {offsets = [0, 0], sizes = [1, 256], strides = [1, 1]} : vector<2x256xf32> to vector<1x256xf32>
    %c210_i32 = arith.constant 210 : i32
    %1033 = tpu.dynamic_rotate %1032 by %c210_i32 dim 1 : vector<1x256xf32>, i32 -> vector<1x256xf32>
    %c43 = arith.constant 43 : index
    %1034 = memref.load %arg4[%c43] : memref<98xf32, #tpu.memory_space<smem>>
    %cst_253 = arith.constant 0.000000e+00 : f32
    %1035 = vector.broadcast %cst_253 : f32 to vector<1x256xf32>
    %1036 = arith.select %1031, %1033, %1035 : vector<1x256xi1>, vector<1x256xf32>
    %1037 = vector.broadcast %1034 : f32 to vector<1x256xf32>
    %1038 = arith.mulf %1037, %1036 : vector<1x256xf32>
    %1039 = arith.addf %1025, %1038 : vector<1x256xf32>
    %1040 = vector.extract_strided_slice %43 {offsets = [1, 0], sizes = [1, 256], strides = [1, 1]} : vector<2x256xf32> to vector<1x256xf32>
    %c210_i32_254 = arith.constant 210 : i32
    %1041 = tpu.dynamic_rotate %1040 by %c210_i32_254 dim 1 : vector<1x256xf32>, i32 -> vector<1x256xf32>
    %c92 = arith.constant 92 : index
    %1042 = memref.load %arg4[%c92] : memref<98xf32, #tpu.memory_space<smem>>
    %cst_255 = arith.constant 0.000000e+00 : f32
    %1043 = vector.broadcast %cst_255 : f32 to vector<1x256xf32>
    %1044 = arith.select %1031, %1041, %1043 : vector<1x256xi1>, vector<1x256xf32>
    %1045 = vector.broadcast %1042 : f32 to vector<1x256xf32>
    %1046 = arith.mulf %1045, %1044 : vector<1x256xf32>
    %1047 = arith.addf %1039, %1046 : vector<1x256xf32>
    %c1_i32_256 = arith.constant 1 : i32
    %1048 = vector.broadcast %c1_i32_256 : i32 to vector<1x256xi32>
    %1049 = arith.cmpi sge, %45, %1048 : vector<1x256xi32>
    %c17_i32_257 = arith.constant 17 : i32
    %1050 = vector.broadcast %c17_i32_257 : i32 to vector<1x256xi32>
    %1051 = arith.cmpi slt, %45, %1050 : vector<1x256xi32>
    %1052 = arith.andi %1049, %1051 : vector<1x256xi1>
    %1053 = arith.andi %1003, %1052 : vector<1x256xi1>
    %1054 = vector.extract_strided_slice %43 {offsets = [0, 0], sizes = [1, 256], strides = [1, 1]} : vector<2x256xf32> to vector<1x256xf32>
    %c209_i32 = arith.constant 209 : i32
    %1055 = tpu.dynamic_rotate %1054 by %c209_i32 dim 1 : vector<1x256xf32>, i32 -> vector<1x256xf32>
    %c44 = arith.constant 44 : index
    %1056 = memref.load %arg4[%c44] : memref<98xf32, #tpu.memory_space<smem>>
    %cst_258 = arith.constant 0.000000e+00 : f32
    %1057 = vector.broadcast %cst_258 : f32 to vector<1x256xf32>
    %1058 = arith.select %1053, %1055, %1057 : vector<1x256xi1>, vector<1x256xf32>
    %1059 = vector.broadcast %1056 : f32 to vector<1x256xf32>
    %1060 = arith.mulf %1059, %1058 : vector<1x256xf32>
    %1061 = arith.addf %1047, %1060 : vector<1x256xf32>
    %1062 = vector.extract_strided_slice %43 {offsets = [1, 0], sizes = [1, 256], strides = [1, 1]} : vector<2x256xf32> to vector<1x256xf32>
    %c209_i32_259 = arith.constant 209 : i32
    %1063 = tpu.dynamic_rotate %1062 by %c209_i32_259 dim 1 : vector<1x256xf32>, i32 -> vector<1x256xf32>
    %c93 = arith.constant 93 : index
    %1064 = memref.load %arg4[%c93] : memref<98xf32, #tpu.memory_space<smem>>
    %cst_260 = arith.constant 0.000000e+00 : f32
    %1065 = vector.broadcast %cst_260 : f32 to vector<1x256xf32>
    %1066 = arith.select %1053, %1063, %1065 : vector<1x256xi1>, vector<1x256xf32>
    %1067 = vector.broadcast %1064 : f32 to vector<1x256xf32>
    %1068 = arith.mulf %1067, %1066 : vector<1x256xf32>
    %1069 = arith.addf %1061, %1068 : vector<1x256xf32>
    %c0_i32_261 = arith.constant 0 : i32
    %1070 = vector.broadcast %c0_i32_261 : i32 to vector<1x256xi32>
    %1071 = arith.cmpi sge, %45, %1070 : vector<1x256xi32>
    %c16_i32_262 = arith.constant 16 : i32
    %1072 = vector.broadcast %c16_i32_262 : i32 to vector<1x256xi32>
    %1073 = arith.cmpi slt, %45, %1072 : vector<1x256xi32>
    %1074 = arith.andi %1071, %1073 : vector<1x256xi1>
    %1075 = arith.andi %1003, %1074 : vector<1x256xi1>
    %1076 = vector.extract_strided_slice %43 {offsets = [0, 0], sizes = [1, 256], strides = [1, 1]} : vector<2x256xf32> to vector<1x256xf32>
    %c208_i32 = arith.constant 208 : i32
    %1077 = tpu.dynamic_rotate %1076 by %c208_i32 dim 1 : vector<1x256xf32>, i32 -> vector<1x256xf32>
    %c45 = arith.constant 45 : index
    %1078 = memref.load %arg4[%c45] : memref<98xf32, #tpu.memory_space<smem>>
    %cst_263 = arith.constant 0.000000e+00 : f32
    %1079 = vector.broadcast %cst_263 : f32 to vector<1x256xf32>
    %1080 = arith.select %1075, %1077, %1079 : vector<1x256xi1>, vector<1x256xf32>
    %1081 = vector.broadcast %1078 : f32 to vector<1x256xf32>
    %1082 = arith.mulf %1081, %1080 : vector<1x256xf32>
    %1083 = arith.addf %1069, %1082 : vector<1x256xf32>
    %1084 = vector.extract_strided_slice %43 {offsets = [1, 0], sizes = [1, 256], strides = [1, 1]} : vector<2x256xf32> to vector<1x256xf32>
    %c208_i32_264 = arith.constant 208 : i32
    %1085 = tpu.dynamic_rotate %1084 by %c208_i32_264 dim 1 : vector<1x256xf32>, i32 -> vector<1x256xf32>
    %c94 = arith.constant 94 : index
    %1086 = memref.load %arg4[%c94] : memref<98xf32, #tpu.memory_space<smem>>
    %cst_265 = arith.constant 0.000000e+00 : f32
    %1087 = vector.broadcast %cst_265 : f32 to vector<1x256xf32>
    %1088 = arith.select %1075, %1085, %1087 : vector<1x256xi1>, vector<1x256xf32>
    %1089 = vector.broadcast %1086 : f32 to vector<1x256xf32>
    %1090 = arith.mulf %1089, %1088 : vector<1x256xf32>
    %1091 = arith.addf %1083, %1090 : vector<1x256xf32>
    %c-1_i32_266 = arith.constant -1 : i32
    %1092 = vector.broadcast %c-1_i32_266 : i32 to vector<1x256xi32>
    %1093 = arith.cmpi sge, %45, %1092 : vector<1x256xi32>
    %c15_i32_267 = arith.constant 15 : i32
    %1094 = vector.broadcast %c15_i32_267 : i32 to vector<1x256xi32>
    %1095 = arith.cmpi slt, %45, %1094 : vector<1x256xi32>
    %1096 = arith.andi %1093, %1095 : vector<1x256xi1>
    %1097 = arith.andi %1003, %1096 : vector<1x256xi1>
    %1098 = vector.extract_strided_slice %43 {offsets = [0, 0], sizes = [1, 256], strides = [1, 1]} : vector<2x256xf32> to vector<1x256xf32>
    %c207_i32 = arith.constant 207 : i32
    %1099 = tpu.dynamic_rotate %1098 by %c207_i32 dim 1 : vector<1x256xf32>, i32 -> vector<1x256xf32>
    %c46 = arith.constant 46 : index
    %1100 = memref.load %arg4[%c46] : memref<98xf32, #tpu.memory_space<smem>>
    %cst_268 = arith.constant 0.000000e+00 : f32
    %1101 = vector.broadcast %cst_268 : f32 to vector<1x256xf32>
    %1102 = arith.select %1097, %1099, %1101 : vector<1x256xi1>, vector<1x256xf32>
    %1103 = vector.broadcast %1100 : f32 to vector<1x256xf32>
    %1104 = arith.mulf %1103, %1102 : vector<1x256xf32>
    %1105 = arith.addf %1091, %1104 : vector<1x256xf32>
    %1106 = vector.extract_strided_slice %43 {offsets = [1, 0], sizes = [1, 256], strides = [1, 1]} : vector<2x256xf32> to vector<1x256xf32>
    %c207_i32_269 = arith.constant 207 : i32
    %1107 = tpu.dynamic_rotate %1106 by %c207_i32_269 dim 1 : vector<1x256xf32>, i32 -> vector<1x256xf32>
    %c95 = arith.constant 95 : index
    %1108 = memref.load %arg4[%c95] : memref<98xf32, #tpu.memory_space<smem>>
    %cst_270 = arith.constant 0.000000e+00 : f32
    %1109 = vector.broadcast %cst_270 : f32 to vector<1x256xf32>
    %1110 = arith.select %1097, %1107, %1109 : vector<1x256xi1>, vector<1x256xf32>
    %1111 = vector.broadcast %1108 : f32 to vector<1x256xf32>
    %1112 = arith.mulf %1111, %1110 : vector<1x256xf32>
    %1113 = arith.addf %1105, %1112 : vector<1x256xf32>
    %c-2_i32_271 = arith.constant -2 : i32
    %1114 = vector.broadcast %c-2_i32_271 : i32 to vector<1x256xi32>
    %1115 = arith.cmpi sge, %45, %1114 : vector<1x256xi32>
    %c14_i32_272 = arith.constant 14 : i32
    %1116 = vector.broadcast %c14_i32_272 : i32 to vector<1x256xi32>
    %1117 = arith.cmpi slt, %45, %1116 : vector<1x256xi32>
    %1118 = arith.andi %1115, %1117 : vector<1x256xi1>
    %1119 = arith.andi %1003, %1118 : vector<1x256xi1>
    %1120 = vector.extract_strided_slice %43 {offsets = [0, 0], sizes = [1, 256], strides = [1, 1]} : vector<2x256xf32> to vector<1x256xf32>
    %c206_i32 = arith.constant 206 : i32
    %1121 = tpu.dynamic_rotate %1120 by %c206_i32 dim 1 : vector<1x256xf32>, i32 -> vector<1x256xf32>
    %c47 = arith.constant 47 : index
    %1122 = memref.load %arg4[%c47] : memref<98xf32, #tpu.memory_space<smem>>
    %cst_273 = arith.constant 0.000000e+00 : f32
    %1123 = vector.broadcast %cst_273 : f32 to vector<1x256xf32>
    %1124 = arith.select %1119, %1121, %1123 : vector<1x256xi1>, vector<1x256xf32>
    %1125 = vector.broadcast %1122 : f32 to vector<1x256xf32>
    %1126 = arith.mulf %1125, %1124 : vector<1x256xf32>
    %1127 = arith.addf %1113, %1126 : vector<1x256xf32>
    %1128 = vector.extract_strided_slice %43 {offsets = [1, 0], sizes = [1, 256], strides = [1, 1]} : vector<2x256xf32> to vector<1x256xf32>
    %c206_i32_274 = arith.constant 206 : i32
    %1129 = tpu.dynamic_rotate %1128 by %c206_i32_274 dim 1 : vector<1x256xf32>, i32 -> vector<1x256xf32>
    %c96 = arith.constant 96 : index
    %1130 = memref.load %arg4[%c96] : memref<98xf32, #tpu.memory_space<smem>>
    %cst_275 = arith.constant 0.000000e+00 : f32
    %1131 = vector.broadcast %cst_275 : f32 to vector<1x256xf32>
    %1132 = arith.select %1119, %1129, %1131 : vector<1x256xi1>, vector<1x256xf32>
    %1133 = vector.broadcast %1130 : f32 to vector<1x256xf32>
    %1134 = arith.mulf %1133, %1132 : vector<1x256xf32>
    %1135 = arith.addf %1127, %1134 : vector<1x256xf32>
    %c-3_i32_276 = arith.constant -3 : i32
    %1136 = vector.broadcast %c-3_i32_276 : i32 to vector<1x256xi32>
    %1137 = arith.cmpi sge, %45, %1136 : vector<1x256xi32>
    %c13_i32_277 = arith.constant 13 : i32
    %1138 = vector.broadcast %c13_i32_277 : i32 to vector<1x256xi32>
    %1139 = arith.cmpi slt, %45, %1138 : vector<1x256xi32>
    %1140 = arith.andi %1137, %1139 : vector<1x256xi1>
    %1141 = arith.andi %1003, %1140 : vector<1x256xi1>
    %1142 = vector.extract_strided_slice %43 {offsets = [0, 0], sizes = [1, 256], strides = [1, 1]} : vector<2x256xf32> to vector<1x256xf32>
    %c205_i32 = arith.constant 205 : i32
    %1143 = tpu.dynamic_rotate %1142 by %c205_i32 dim 1 : vector<1x256xf32>, i32 -> vector<1x256xf32>
    %c48 = arith.constant 48 : index
    %1144 = memref.load %arg4[%c48] : memref<98xf32, #tpu.memory_space<smem>>
    %cst_278 = arith.constant 0.000000e+00 : f32
    %1145 = vector.broadcast %cst_278 : f32 to vector<1x256xf32>
    %1146 = arith.select %1141, %1143, %1145 : vector<1x256xi1>, vector<1x256xf32>
    %1147 = vector.broadcast %1144 : f32 to vector<1x256xf32>
    %1148 = arith.mulf %1147, %1146 : vector<1x256xf32>
    %1149 = arith.addf %1135, %1148 : vector<1x256xf32>
    %1150 = vector.extract_strided_slice %43 {offsets = [1, 0], sizes = [1, 256], strides = [1, 1]} : vector<2x256xf32> to vector<1x256xf32>
    %c205_i32_279 = arith.constant 205 : i32
    %1151 = tpu.dynamic_rotate %1150 by %c205_i32_279 dim 1 : vector<1x256xf32>, i32 -> vector<1x256xf32>
    %c97 = arith.constant 97 : index
    %1152 = memref.load %arg4[%c97] : memref<98xf32, #tpu.memory_space<smem>>
    %cst_280 = arith.constant 0.000000e+00 : f32
    %1153 = vector.broadcast %cst_280 : f32 to vector<1x256xf32>
    %1154 = arith.select %1141, %1151, %1153 : vector<1x256xi1>, vector<1x256xf32>
    %1155 = vector.broadcast %1152 : f32 to vector<1x256xf32>
    %1156 = arith.mulf %1155, %1154 : vector<1x256xf32>
    %1157 = arith.addf %1149, %1156 : vector<1x256xf32>
    %1158 = arith.negf %1157 : vector<1x256xf32>
    %1159 = math.exp %1158 : vector<1x256xf32>
    %cst_281 = arith.constant 1.000000e+00 : f32
    %1160 = vector.broadcast %cst_281 : f32 to vector<1x256xf32>
    %1161 = arith.addf %1160, %1159 : vector<1x256xf32>
    %1162 = arith.divf %1160, %1161 : vector<1x256xf32>
    %1163 = vector.broadcast %1162 : vector<1x256xf32> to vector<32x256xf32>
    %1164 = arith.mulf %33, %1163 : vector<32x256xf32>
    %c0_282 = arith.constant 0 : index
    %c0_283 = arith.constant 0 : index
    %c0_284 = arith.constant 0 : index
    %1165 = vector.load %arg6[%c0_282, %c0_283, %c0_284] : memref<1x32x256xf32, #tpu.memory_space<vmem>>, vector<1x32x256xf32>
    %1166 = vector.shape_cast %1165 : vector<1x32x256xf32> to vector<32x256xf32>
    %1167 = vector.shape_cast %1164 : vector<32x256xf32> to vector<1x32x256xf32>
    tpu.vector_store %arg6[%c0_282, %c0_283, %c0_284], %1167 {strides = array<i32>} : memref<1x32x256xf32, #tpu.memory_space<vmem>>, vector<1x32x256xf32>,
    return
  }
  func.func @transform_0(%arg0: i32) -> (i32, i32, i32) {
    %c0_i32 = arith.constant 0 : i32
    %c0_i32_0 = arith.constant 0 : i32
    %c0_i32_1 = arith.constant 0 : i32
    return %arg0, %c0_i32, %c0_i32_0 : i32, i32, i32
  }
  func.func @transform_1(%arg0: i32) -> (i32, i32) {
    %c0_i32 = arith.constant 0 : i32
    %c0_i32_0 = arith.constant 0 : i32
    %c0_i32_1 = arith.constant 0 : i32
    return %c0_i32, %c0_i32_0 : i32, i32
  }
  func.func @transform_2(%arg0: i32) -> (i32, i32) {
    %c0_i32 = arith.constant 0 : i32
    %c0_i32_0 = arith.constant 0 : i32
    %c0_i32_1 = arith.constant 0 : i32
    return %c0_i32, %c0_i32_0 : i32, i32
  }
  func.func @transform_3(%arg0: i32) -> i32 {
    %c0_i32 = arith.constant 0 : i32
    %c0_i32_0 = arith.constant 0 : i32
    return %c0_i32 : i32
  }
  func.func @transform_4(%arg0: i32) -> (i32, i32) {
    %c0_i32 = arith.constant 0 : i32
    %c0_i32_0 = arith.constant 0 : i32
    %c0_i32_1 = arith.constant 0 : i32
    return %c0_i32, %c0_i32_0 : i32, i32
  }
  func.func @transform_5(%arg0: i32) -> (i32, i32, i32) {
    %c0_i32 = arith.constant 0 : i32
    %c0_i32_0 = arith.constant 0 : i32
    %c0_i32_1 = arith.constant 0 : i32
    return %arg0, %c0_i32, %c0_i32_0 : i32, i32, i32
  }
}

</mosaic_0001>

<bundles_post_ra>
// kernel: cbam.1
= control target key start
LH: loop header
LB: loop body
LE: loop exit
PB: predicated region body
PF: predicated region fallthrough
CT: control target
= control target key end

     0   :  { %10 = vsyncpa [#allocation4], 0  ;;  %s2627_s18 = smov 0   ;;  %s4690_s0 = inlined_call_operand.vmem [shape: f32[2,32,256], index: 0, kind: input, shape index: {}]   ;;  %s4691_s1 = inlined_call_operand.vmem [shape: f32[32,4], index: 1, kind: input, shape index: {}]   ;;  %s4692_s2 = inlined_call_operand.vmem [shape: f32[32,4], index: 2, kind: input, shape index: {}]   ;;  %s4693_s3 = inlined_call_operand.vmem [shape: f32[98], index: 3, kind: input, shape index: {}]   ;;  %s4694_s4 = inlined_call_operand.vmem [shape: s32[2,256], index: 4, kind: input, shape index: {}]   ;;  %s4695_s5 = inlined_call_operand.vmem [shape: f32[2,32,256], index: 5, kind: output, shape index: {}]  }
   0x1 LB: > { %s2302_s19 = sadd.s32 4294967295, %s2544_s18   ;;  %p2304_p0 = scmp.ge.s32.totalorder %s2544_s18, 1  ;;  %s2544_s18 = sphi %s2627_s18, %s16_s18  }
   0x2   : > { %p157_p1 = scmp.lt.s32.totalorder %s2544_s18, 3  ;;  %s175_s22 = sshll.u32 %s4693_s3, 4  ;;  %s176_s22 = int_to_ptr.vmem [resolvable:$true] %s175_s22 }
   0x3   : > { %p2435_p3 = scmp.eq.s32.totalorder %s2302_s19, 0  ;;  %s2546_s23 = smov [#allocation3]  }
   0x4   : > { %p158_p2 = pnand %p2304_p0, %p157_p1 }
   0x6   : > { %p2431_p4 = pneg %p158_p2  ;;  %199 = sbr.rel (%p158_p2) target bundleno = 1040 (0x410), region = 40 }
   0x8   : > { %p2432_p5 = pnand %p2435_p3, %p2431_p4 }
   0xa   : > { %2434 = dma.vmem_to_smem (!%p2432_p5), %s176_s22, 16, %s2546_s23, [#allocation4]  }
   0xb   : > { %2539 = dma.done.wait (%p2435_p3), [#allocation4], 16  }
   0xc   : > { %2541 = vsyncadd (%p2435_p3), [#allocation4], 4294967280 }
   0xd   : > { %206 = sfence }
   0xe   : > { %p229_p6 = scmp.lt.s32.totalorder %s2302_s19, 1  ;;  %v275_v20 = vld [vmem:[%s4691_s1] sm:$0xff]  ;;  %v276_v22 = vld [vmem:[%s4691_s1 + $0x8] sm:$0xff]  ;;  %v277_v25 = vld [vmem:[%s4691_s1 + $0x10] sm:$0xff]  ;;  %vm287_vm0 = vcmask 31744   ;;  %s2548_s21 = smov 51  }
   0xf   : > { %v278_v30 = vld [vmem:[%s4691_s1 + $0x18] sm:$0xff]  ;;  %s2549_s22 = smov 50   ;;  %s2550_s23 = smov 49  }
  0x10   : > { %s4834_s19 = smov (!%p229_p6, %s2302_s19), 1  ;;  %s2551_s25 = smov 48  }
  0x11   : > { %s2425_s24 = sshll.u32 %s4834_s19, 6  ;;  %s2552_s26 = smov 47  }
  0x12   : > { %s233_s27 = scalar_lea.vmem %s4690_s0, %s2425_s24  ;;  %s2554_s28 = smov 45  }
  0x13   : > { %v2646_v0 = vld [vmem:[%s233_s27] sm:$0xff]  ;;  %v2648_v1 = vld [vmem:[%s233_s27 + $0x8] sm:$0xff]  ;;  %v2660_v7 = vld [vmem:[%s233_s27 + $0x10] sm:$0xff]  ;;  %s2555_s29 = smov 35   ;;  %s2556_s30 = smov 34  }
  0x14   : > { %v2650_v2 = vld [vmem:[%s233_s27 + $0x20] sm:$0xff]  ;;  %v259_v3 = vmax.f32 %v2646_v0, %v2648_v1  ;;  %v247_v4 = vadd.f32 %v2648_v1, %v2646_v0  ;;  %v2656_v5 = vld [vmem:[%s233_s27 + $0x28] sm:$0xff]  ;;  %v2662_v8 = vld [vmem:[%s233_s27 + $0x18] sm:$0xff]  ;;  %s2557_s6 = smov 33   ;;  %s2558_s7 = smov 32  }
  0x15   : > { %v253_v6 = vadd.f32 %v2656_v5, %v2650_v2  ;;  %v2664_v9 = vld [vmem:[%s233_s27 + $0x30] sm:$0xff]  ;;  %v2666_v10 = vld [vmem:[%s233_s27 + $0x38] sm:$0xff]  ;;  %v262_v11 = vmax.f32 %v2660_v7, %v2662_v8  ;;  %v250_v12 = vadd.f32 %v2662_v8, %v2660_v7  ;;  %v265_v14 = vmax.f32 %v2650_v2, %v2656_v5  ;;  %s2553_s27 = smov 46   ;;  %s2559_s8 = smov 31  }
  0x16   : > { %260 = vmax.xlane.f32.xlu2 %v259_v3  ;;  %248 = vadd.xlane.f32.xlu0 %v247_v4  ;;  %v256_v13 = vadd.f32 %v2666_v10, %v2664_v9  ;;  %v268_v15 = vmax.f32 %v2664_v9, %v2666_v10  ;;  %s2560_s9 = smov 30   ;;  %s2561_s10 = smov 29  }
  0x17   : > { %254 = vadd.xlane.f32.xlu1 %v253_v6  ;;  %s2562_s11 = smov 19   ;;  %s2563_s14 = smov 18  }
  0x18   : > { %s2565_s15 = smov 17   ;;  %s2926_s16 = sld [smem:[#allocation3 + $0x31]] }
  0x19   : > { %s2929_s17 = sld [smem:[#allocation3]] }
  0x1a   : > { %s2947_s20 = sld [smem:[#allocation3 + $0x1]] }
  0x1b   : > { %s3306_s12 = sld [smem:[#allocation3 + $0x7]] }
  0x1c   : > { %s3322_s13 = sld [smem:[#allocation3 + $0x38]] }
  0x1e   : > { %263 = vmax.xlane.f32.xlu2 %v262_v11  ;;  %251 = vadd.xlane.f32.xlu0 %v250_v12  ;;  %v281_v12 = vld [vmem:[%s4692_s2 + $0x10] sm:$0xff] }
  0x1f   : > { %257 = vadd.xlane.f32.xlu1 %v256_v13  ;;  %v280_v13 = vld [vmem:[%s4692_s2 + $0x8] sm:$0xff] }
  0x26   : > { %266 = vmax.xlane.f32.xlu0 %v265_v14  ;;  %v279_v14 = vld [vmem:[%s4692_s2] sm:$0xff] }
  0x27   : > { %269 = vmax.xlane.f32.xlu1 %v268_v15 }
  0x89   : > { %v261_v16 = vpop.xlane.xlu2 %260  ;;  %v249_v17 = vpop.xlane.xlu0 %248 }
  0x8a   : > { %v255_v18 = vpop.xlane.xlu1 %254  ;;  %v271_v19 = vmul.f32 0.00390625, %v249_v17  ;;  %v302_v34 = vmul.f32 %v275_v20, %v261_v16 }
  0x8b   : > { %v273_v21 = vmul.f32 0.00390625, %v255_v18 }
  0x8c   : > { %v283_v26 = vmul.f32 %v275_v20, %v271_v19  ;;  %v306_v43 = vsel %vm287_vm0, %v302_v34, 0.0 }
  0x8d   : > { %v285_v33 = vmul.f32 %v277_v25, %v273_v21 }
  0x8e   : > { %v288_v35 = vsel %vm287_vm0, %v283_v26, 0.0 }
  0x8f   : > { %v291_v40 = vsel %vm287_vm0, %v285_v33, 0.0 }
  0x91   : > { %v264_v23 = vpop.xlane.xlu2 %263  ;;  %v252_v24 = vpop.xlane.xlu0 %251 }
  0x92   : > { %v272_v27 = vmul.f32 0.00390625, %v252_v24  ;;  %v258_v28 = vpop.xlane.xlu1 %257  ;;  %v303_v31 = vmul.f32 %v276_v22, %v264_v23 }
  0x93   : > { %v274_v29 = vmul.f32 0.00390625, %v258_v28 }
  0x94   : > { %v284_v32 = vmul.f32 %v276_v22, %v272_v27  ;;  %v307_v39 = vsel %vm287_vm0, %v303_v31, 0.0  ;;  %v282_v22 = vld [vmem:[%s4692_s2 + $0x18] sm:$0xff] }
  0x95   : > { %v286_v37 = vmul.f32 %v278_v30, %v274_v29  ;;  %v308_v47 = vadd.f32 %v307_v39, %v306_v43 }
  0x96   : > { %v289_v36 = vsel %vm287_vm0, %v284_v32, 0.0 }
  0x97   : > { %v290_v38 = vadd.f32 %v289_v36, %v288_v35  ;;  %v293_v45 = vsel %vm287_vm0, %v286_v37, 0.0 }
  0x99   : > { %v292_v41 = vadd.f32 %v291_v40, %v290_v38  ;;  %v267_v42 = vpop.xlane.xlu0 %266 }
  0x9a   : > { %v304_v44 = vmul.f32 %v277_v25, %v267_v42  ;;  %v270_v46 = vpop.xlane.xlu1 %269 }
  0x9b   : > { %v294_v48 = vadd.f32 %v293_v45, %v292_v41  ;;  %v305_v49 = vmul.f32 %v278_v30, %v270_v46 }
  0x9c   : > { %v309_v50 = vsel %vm287_vm0, %v304_v44, 0.0 }
  0x9d   : > { %v310_v51 = vadd.f32 %v309_v50, %v308_v47  ;;  %v295_v52 = vrot.slane %v294_v48, 4  ;;  %v311_v53 = vsel %vm287_vm0, %v305_v49, 0.0 }
  0x9f   : > { %v296_v54 = vadd.f32 %v295_v52, %v294_v48  ;;  %v312_v55 = vadd.f32 %v311_v53, %v310_v51 }
  0xa1   : > { %v297_v56 = vrot.slane %v296_v54, 2  ;;  %v313_v57 = vrot.slane %v312_v55, 4 }
  0xa3   : > { %v298_v58 = vadd.f32 %v297_v56, %v296_v54  ;;  %v314_v59 = vadd.f32 %v313_v57, %v312_v55 }
  0xa5   : > { %v299_v60 = vrot.slane %v298_v58, 1  ;;  %v315_v61 = vrot.slane %v314_v59, 2 }
  0xa7   : > { %v316_v62 = vadd.f32 %v315_v61, %v314_v59  ;;  %v300_v63 = vadd.f32 %v299_v60, %v298_v58 }
  0xa9   : > { %v317_v3 = vrot.slane %v316_v62, 1  ;;  %v301_v11 = vmax.f32 %v300_v63, 0.0 }
  0xab   : > { %v318_v4 = vadd.f32 %v317_v3, %v316_v62  ;;  %v2547_v62 = vmov 32.0  }
  0xad   : > { %v319_v6 = vmax.f32 %v318_v4, 0.0 }
  0xaf   : > { %v320_v15 = vadd.f32 %v319_v6, %v301_v11 }
  0xb1   : > { %v323_v16 = vmul.f32 %v320_v15, %v281_v12  ;;  %v322_v17 = vmul.f32 %v320_v15, %v280_v13  ;;  %v321_v18 = vmul.f32 %v320_v15, %v279_v14  ;;  %v324_v23 = vmul.f32 %v320_v15, %v282_v22 }
  0xb3   : > { %v331_v19 = vsel %vm287_vm0, %v323_v16, 0.0  ;;  %v328_v20 = vsel %vm287_vm0, %v322_v17, 0.0  ;;  %v325_v21 = vsel %vm287_vm0, %v321_v18, 0.0  ;;  %v334_v24 = vsel %vm287_vm0, %v324_v23, 0.0 }
  0xb4   : > { %332 = vadd.xlane.f32.xlu1 %v331_v19  ;;  %329 = vadd.xlane.f32.xlu0 %v328_v20 }
  0xb5   : > { %326 = vadd.xlane.f32.xlu2 %v325_v21 }
  0xbd   : > { %335 = vadd.xlane.f32.xlu2 %v334_v24 }
 0x127   : > { %v333_v25 = vpop.xlane.xlu1 %332  ;;  %v330_v26 = vpop.xlane.xlu0 %329 }
 0x128   : > { %v2315_v27 = vmul.f32 -1.442695, %v333_v25  ;;  %v2314_v28 = vmul.f32 -1.442695, %v330_v26  ;;  %v327_v29 = vpop.xlane.xlu2 %326 }
 0x129   : > { %v2313_v30 = vmul.f32 -1.442695, %v327_v29 }
 0x12a   : > { %2496 = vpow2.f32 %v2315_v27 }
 0x12b   : > { %2498 = vpow2.f32 %v2314_v28 }
 0x12c   : > { %2500 = vpow2.f32 %v2313_v30 }
 0x130   : > { %v2497_v31 = vpop.eup %2496  ;;  %v336_v32 = vpop.xlane.xlu2 %335 }
 0x131   : > { %v2499_v33 = vpop.eup %2498  ;;  %v351_v34 = vadd.f32 1.0, %v2497_v31  ;;  %v2316_v37 = vmul.f32 -1.442695, %v336_v32 }
 0x132   : > { %v2501_v35 = vpop.eup %2500  ;;  %v350_v36 = vadd.f32 1.0, %v2499_v33 }
 0x133   : > { %2502 = vrcp.f32 %v351_v34  ;;  %v349_v38 = vadd.f32 1.0, %v2501_v35  ;;  %v394_v59 = vand.u32 2147483648, %v351_v34  ;;  %vm388_vm7 = vweird.f32 %v351_v34 }
 0x134   : > { %2504 = vrcp.f32 %v350_v36  ;;  %v379_v50 = vand.u32 2147483648, %v350_v36  ;;  %vm373_vm2 = vweird.f32 %v350_v36  ;;  %v377_v54 = vand.u32 2147483647, %v350_v36 }
 0x135   : > { %2506 = vpow2.f32 %v2316_v37  ;;  %v364_v55 = vand.u32 2147483648, %v349_v38  ;;  %v362_v58 = vand.u32 2147483647, %v349_v38  ;;  %vm358_vm6 = vweird.f32 %v349_v38 }
 0x136   : > { %2508 = vrcp.f32 %v349_v38  ;;  %v380_v61 = vor.u32 1.1754944e-38, %v379_v50  ;;  %v392_v6 = vand.u32 2147483647, %v351_v34  ;;  %vm378_vm8 = vcmp.eq.f32.partialorder %v377_v54, 8.507059e+37 }
 0x137   : > { %v365_v11 = vor.u32 1.1754944e-38, %v364_v55  ;;  %vm363_vm10 = vcmp.eq.f32.partialorder %v362_v58, 8.507059e+37  ;;  %v395_v17 = vor.u32 1.1754944e-38, %v394_v59 }
 0x138   : > { %vm393_vm12 = vcmp.eq.f32.partialorder %v392_v6, 8.507059e+37 }
 0x139   : > { %v2503_v39 = vpop.eup %2502 }
 0x13a   : > { %v2505_v40 = vpop.eup %2504  ;;  %v384_v41 = vmul.f32 %v2503_v39, %v351_v34  ;;  %vm389_vm5 = vweird.f32 %v2503_v39 }
 0x13b   : > { %v369_v42 = vmul.f32 %v2505_v40, %v350_v36  ;;  %v2507_v43 = vpop.eup %2506  ;;  %vm374_vm1 = vweird.f32 %v2505_v40  ;;  %vm390_vm11 = vmor %vm388_vm7, %vm389_vm5 }
 0x13c   : > { %v385_v44 = vsub.f32 1.0, %v384_v41  ;;  %v2509_v45 = vpop.eup %2508  ;;  %v352_v47 = vadd.f32 1.0, %v2507_v43  ;;  %vm2714_vm3 = vmor %vm373_vm2, %vm374_vm1  ;;  %vm451_vm2 = vcmask 1040384  }
 0x13d   : > { %v370_v46 = vsub.f32 1.0, %v369_v42  ;;  %v354_v48 = vmul.f32 %v2509_v45, %v349_v38  ;;  %vm359_vm4 = vweird.f32 %v2509_v45 }
 0x13e   : > { %2510 = vrcp.f32 %v352_v47  ;;  %v386_v51 = vmul.f32 %v2503_v39, %v385_v44  ;;  %vm360_vm9 = vmor %vm358_vm6, %vm359_vm4  ;;  %v409_v24 = vand.u32 2147483648, %v352_v47  ;;  %v407_v27 = vand.u32 2147483647, %v352_v47 }
 0x13f   : > { %v371_v49 = vmul.f32 %v2505_v40, %v370_v46  ;;  %v355_v52 = vsub.f32 1.0, %v354_v48  ;;  %2512 = vrcp.f32 %v2547_v62  ;;  %vm403_vm14 = vweird.f32 %v352_v47 }
 0x140   : > { %v387_v63 = vadd.f32 %v2503_v39, %v386_v51  ;;  %v410_v30 = vor.u32 1.1754944e-38, %v409_v24  ;;  %vm408_vm0 = vcmp.eq.f32.partialorder %v407_v27, 8.507059e+37 }
 0x141   : > { %v372_v53 = vadd.f32 %v2505_v40, %v371_v49  ;;  %v356_v57 = vmul.f32 %v2509_v45, %v355_v52 }
 0x142   : > { %v391_v16 = vsel %vm390_vm11, %v2503_v39, %v387_v63  ;;  %v454_v63 = vlaneseq }
 0x143   : > { %v376_v60 = vsel %vm2714_vm3, %v2505_v40, %v372_v53  ;;  %v357_v3 = vadd.f32 %v2509_v45, %v356_v57  ;;  %v396_v25 = vsel %vm393_vm12, %v395_v17, %v391_v16 }
 0x144   : > { %v2511_v4 = vpop.eup %2510  ;;  %v381_v12 = vsel %vm378_vm8, %v380_v61, %v376_v60  ;;  %vm456_vm3 = vcmp.lt.s32.totalorder %v454_v63, 256 }
 0x145   : > { %v361_v13 = vsel %vm360_vm9, %v2509_v45, %v357_v3  ;;  %v399_v14 = vmul.f32 %v2511_v4, %v352_v47  ;;  %v2513_v19 = vpop.eup %2512  ;;  %v2722_v20 = vmul.f32 %v381_v12, %v2660_v7  ;;  %v2725_v21 = vmul.f32 %v381_v12, %v2662_v8 }
 0x146   : > { %v366_v15 = vsel %vm363_vm10, %v365_v11, %v361_v13  ;;  %vm404_vm13 = vweird.f32 %v2511_v4  ;;  %v440_v29 = vmul.f32 32.0, %v2513_v19  ;;  %vm444_vm1 = vweird.f32 %v2513_v19 }
 0x147   : > { %v400_v18 = vsub.f32 1.0, %v399_v14  ;;  %v2728_v22 = vmul.f32 %v366_v15, %v2646_v0  ;;  %v2731_v23 = vmul.f32 %v366_v15, %v2648_v1  ;;  %v2738_v0 = vmul.f32 %v396_v25, %v2650_v2  ;;  %vm405_vm15 = vmor %vm403_vm14, %vm404_vm13 }
 0x148   : > { %v2741_v1 = vmul.f32 %v396_v25, %v2656_v5  ;;  %v441_v37 = vsub.f32 1.0, %v440_v29 }
 0x149   : > { %v401_v26 = vmul.f32 %v2511_v4, %v400_v18  ;;  %v421_v28 = vadd.f32 %v2722_v20, %v2728_v22  ;;  %v430_v7 = vadd.f32 %v2725_v21, %v2731_v23  ;;  %v459_v2 = vmax.f32 %v2728_v22, %v2738_v0 }
 0x14a   : > { %v468_v5 = vmax.f32 %v2731_v23, %v2741_v1  ;;  %v442_v44 = vmul.f32 %v2513_v19, %v441_v37 }
 0x14b   : > { %v402_v8 = vadd.f32 %v2511_v4, %v401_v26  ;;  %v422_v33 = vadd.f32 %v421_v28, %v2738_v0  ;;  %v431_v34 = vadd.f32 %v430_v7, %v2741_v1 }
 0x14c   : > { %v443_v53 = vadd.f32 %v2513_v19, %v442_v44 }
 0x14d   : > { %v406_v31 = vsel %vm405_vm15, %v2511_v4, %v402_v8 }
 0x14e   : > { %v411_v32 = vsel %vm408_vm0, %v410_v30, %v406_v31  ;;  %v445_v62 = vsel %vm444_vm1, %v2513_v19, %v443_v53 }
 0x14f   : > { %v2746_v35 = vmul.f32 %v411_v32, %v2664_v9  ;;  %v2749_v36 = vmul.f32 %v411_v32, %v2666_v10 }
 0x151   : > { %v423_v38 = vadd.f32 %v422_v33, %v2746_v35  ;;  %v432_v39 = vadd.f32 %v431_v34, %v2749_v36  ;;  %v460_v40 = vmax.f32 %v2722_v20, %v2746_v35  ;;  %v469_v9 = vmax.f32 %v2725_v21, %v2749_v36 }
 0x153   : > { %v424_v41 = vrot.slane %v423_v38, 4  ;;  %v433_v10 = vrot.slane %v432_v39, 4  ;;  %v461_v42 = vmax.f32 %v459_v2, %v460_v40  ;;  %v470_v43 = vmax.f32 %v468_v5, %v469_v9 }
 0x155   : > { %v425_v45 = vadd.f32 %v424_v41, %v423_v38  ;;  %v434_v46 = vadd.f32 %v433_v10, %v432_v39  ;;  %v462_v47 = vrot.slane %v461_v42, 4  ;;  %v471_v48 = vrot.slane %v470_v43, 4 }
 0x157   : > { %v426_v49 = vrot.slane %v425_v45, 2  ;;  %v435_v50 = vrot.slane %v434_v46, 2  ;;  %v463_v51 = vmax.f32 %v461_v42, %v462_v47  ;;  %v472_v52 = vmax.f32 %v470_v43, %v471_v48 }
 0x158   : > { %v2882_v47 = vand.u32 127, %v454_v63 }
 0x159   : > { %v427_v54 = vadd.f32 %v426_v49, %v425_v45  ;;  %v436_v55 = vadd.f32 %v435_v50, %v434_v46  ;;  %v464_v56 = vrot.slane %v463_v51, 2  ;;  %v473_v57 = vrot.slane %v472_v52, 2  ;;  %v2875_v46 = vld [vmem:[%s4694_s4] sm:$0xf] }
 0x15a   : > { %vm486_vm4 = vcmp.ge.s32.totalorder %v2875_v46, 3  ;;  %vm487_vm5 = vcmp.lt.s32.totalorder %v2875_v46, 19  ;;  %vm539_vm7 = vcmp.ge.s32.totalorder %v2875_v46, 2  ;;  %vm540_vm8 = vcmp.lt.s32.totalorder %v2875_v46, 18 }
 0x15b   : > { %v428_v58 = vrot.slane %v427_v54, 1  ;;  %v437_v59 = vrot.slane %v436_v55, 1  ;;  %v465_v60 = vmax.f32 %v463_v51, %v464_v56  ;;  %v474_v61 = vmax.f32 %v472_v52, %v473_v57  ;;  %vm2885_vm6 = vmand %vm486_vm4, %vm487_vm5 }
 0x15c   : > { %v2564_v52 = vmov 0   ;;  %vm505_vm9 = vcmp.lt.s32.totalorder %v2882_v47, 51  ;;  %vm580_vm10 = vcmp.ge.s32.totalorder %v2875_v46, 1  ;;  %vm581_vm11 = vcmp.lt.s32.totalorder %v2875_v46, 17  ;;  %vm2903_vm12 = vmand %vm539_vm7, %vm540_vm8 }
 0x15d   : > { %v429_v3 = vadd.f32 %v428_v58, %v427_v54  ;;  %v438_v4 = vadd.f32 %v437_v59, %v436_v55  ;;  %v466_v6 = vrot.slane %v465_v60, 1  ;;  %v475_v11 = vrot.slane %v474_v61, 1  ;;  %vm2915_vm13 = vmand %vm580_vm10, %vm581_vm11 }
 0x15e   : > { %v489_v53 = vsel %vm2885_vm6, 1, %v2564_v52  ;;  %v542_v59 = vsel %vm2903_vm12, 1, %v2564_v52  ;;  %vm551_vm14 = vcmp.lt.s32.totalorder %v2882_v47, 50  ;;  %vm621_vm15 = vcmp.ge.s32.totalorder %v2875_v46, 0 }
 0x15f   : > { %v447_v12 = vmul.f32 %v445_v62, %v438_v4  ;;  %v476_v13 = vmax.f32 %v474_v61, %v475_v11  ;;  %v446_v14 = vmul.f32 %v445_v62, %v429_v3  ;;  %v467_v16 = vmax.f32 %v465_v60, %v466_v6 }
 0x160   : > { %v2317_v56 = vrot.slane %v489_v53, 9  ;;  %v583_v3 = vsel %vm2915_vm13, 1, %v2564_v52  ;;  %vm622_vm0 = vcmp.lt.s32.totalorder %v2875_v46, 16  ;;  %v2319_v11 = vrot.slane %v542_v59, 9 }
 0x161   : > { %v450_v15 = vrot.slane %v447_v12, 7  ;;  %v479_v17 = vrot.slane %v476_v13, 7  ;;  %vm2967_vm4 = vmand %vm621_vm15, %vm622_vm0  ;;  %vm662_vm10 = vcmp.ge.s32.totalorder %v2875_v46, 4294967295 }
 0x162   : > { %vm2943_vm1 = vcmp.ne.s32.totalorder %v2317_v56, 0  ;;  %vm2988_vm7 = vcmp.ne.s32.totalorder %v2319_v11, 0  ;;  %v516_v56 = vstv %s2929_s17  ;;  %s3397_s17 = sld [smem:[#allocation3 + $0x3a]] }
 0x163   : > { %v452_v18 = vsel %vm451_vm2, %v446_v14, %v450_v15  ;;  %v480_v24 = vsel %vm451_vm2, %v467_v16, %v479_v17  ;;  %vm4698_vm2 = vcmask 1041408   ;;  %v2322_v17 = vrot.slane %v583_v3, 9  ;;  %vm493_vm5 = vmand %vm2885_vm6, %vm2943_vm1 }
 0x164   : > { %458 = vst.msk [vmem:[#allocation2] ss:$2 sm:$0x3] %vm456_vm3, %v452_v18  ;;  %v4720_v18 = vmov 0  ;;  %vm546_vm11 = vmand %vm2885_vm6, %vm2988_vm7 }
 0x165   : > { %483 = vst.msk [vmem:[#allocation2 + $0x1] ss:$2 sm:$0x3] %vm456_vm3, %v480_v24  ;;  %vm592_vm3 = vcmp.lt.s32.totalorder %v2882_v47, 49  ;;  %v4721_v18 = vsel %vm2967_vm4, 4294967295, %v4720_v18  ;;  %vm3009_vm8 = vcmp.ne.s32.totalorder %v2322_v17, 0 }
 0x166   : > { %vm4696_vm15 = vmand %vm2885_vm6, %vm3009_vm8 }
 0x16c   : > { %v485_v25 = vld [vmem:[#allocation2] sm:$0xf] }
 0x16d   : > { %v2762_v19 = vperm.slane %v485_v25, 0  ;;  %v2764_v26 = vperm.slane %v485_v25, 2  ;;  %v2766_v27 = vperm.slane %v485_v25, 1  ;;  %v2771_v28 = vperm.slane %v485_v25, 3 }
 0x16f   : > { %523 = vrot.lane.b32.xlu2 %v2766_v27, %s2548_s21  ;;  %501 = vrot.lane.b32.xlu1 %v2764_v26, %s2548_s21 }
 0x170   : > { %499 = vrot.lane.b32.xlu0 %v2762_v19, %s2548_s21 }
 0x177   : > { %549 = vrot.lane.b32.xlu1 %v2764_v26, %s2549_s22  ;;  %547 = vrot.lane.b32.xlu2 %v2762_v19, %s2549_s22 }
 0x178   : > { %525 = vrot.lane.b32.xlu0 %v2771_v28, %s2548_s21  ;;  %s2976_s21 = sld [smem:[#allocation3 + $0x32]] }
 0x17f   : > { %588 = vrot.lane.b32.xlu1 %v2762_v19, %s2550_s23  ;;  %566 = vrot.lane.b32.xlu2 %v2771_v28, %s2549_s22 }
 0x180   : > { %564 = vrot.lane.b32.xlu0 %v2766_v27, %s2549_s22  ;;  %s2978_s22 = sld [smem:[#allocation3 + $0x2]] }
 0x187   : > { %607 = vrot.lane.b32.xlu1 %v2771_v28, %s2550_s23  ;;  %605 = vrot.lane.b32.xlu2 %v2766_v27, %s2550_s23 }
 0x188   : > { %590 = vrot.lane.b32.xlu0 %v2764_v26, %s2550_s23  ;;  %s2566_s23 = smov 16  }
 0x18f   : > { %646 = vrot.lane.b32.xlu1 %v2766_v27, %s2551_s25  ;;  %631 = vrot.lane.b32.xlu2 %v2764_v26, %s2551_s25 }
 0x190   : > { %629 = vrot.lane.b32.xlu0 %v2762_v19, %s2551_s25 }
 0x197   : > { %672 = vrot.lane.b32.xlu1 %v2764_v26, %s2552_s26  ;;  %670 = vrot.lane.b32.xlu2 %v2762_v19, %s2552_s26 }
 0x198   : > { %648 = vrot.lane.b32.xlu0 %v2771_v28, %s2551_s25  ;;  %s3026_s25 = sld [smem:[#allocation3 + $0x33]] }
 0x19f   : > { %711 = vrot.lane.b32.xlu1 %v2762_v19, %s2553_s27  ;;  %689 = vrot.lane.b32.xlu2 %v2771_v28, %s2552_s26 }
 0x1a0   : > { %687 = vrot.lane.b32.xlu0 %v2766_v27, %s2552_s26  ;;  %s3051_s26 = sld [smem:[#allocation3 + $0x3]] }
 0x1a7   : > { %730 = vrot.lane.b32.xlu1 %v2771_v28, %s2553_s27  ;;  %728 = vrot.lane.b32.xlu2 %v2766_v27, %s2553_s27 }
 0x1a8   : > { %713 = vrot.lane.b32.xlu0 %v2764_v26, %s2553_s27  ;;  %s3086_s27 = sld [smem:[#allocation3 + $0x34]] }
 0x1af   : > { %769 = vrot.lane.b32.xlu1 %v2766_v27, %s2554_s28  ;;  %754 = vrot.lane.b32.xlu2 %v2764_v26, %s2554_s28 }
 0x1b0   : > { %752 = vrot.lane.b32.xlu0 %v2762_v19, %s2554_s28 }
 0x1b7   : > { %788 = vrot.lane.b32.xlu1 %v2764_v26, %s2555_s29  ;;  %786 = vrot.lane.b32.xlu2 %v2762_v19, %s2555_s29 }
 0x1b8   : > { %771 = vrot.lane.b32.xlu0 %v2771_v28, %s2554_s28  ;;  %s2567_s28 = smov 15  }
 0x1bf   : > { %820 = vrot.lane.b32.xlu1 %v2762_v19, %s2556_s30  ;;  %805 = vrot.lane.b32.xlu2 %v2771_v28, %s2555_s29 }
 0x1c0   : > { %803 = vrot.lane.b32.xlu0 %v2766_v27, %s2555_s29  ;;  %s3160_s29 = sld [smem:[#allocation3 + $0x4]] }
 0x1c7   : > { %839 = vrot.lane.b32.xlu1 %v2771_v28, %s2556_s30  ;;  %837 = vrot.lane.b32.xlu2 %v2766_v27, %s2556_s30 }
 0x1c8   : > { %822 = vrot.lane.b32.xlu0 %v2764_v26, %s2556_s30  ;;  %s3173_s30 = sld [smem:[#allocation3 + $0x35]] }
 0x1c9   : > { %v2806_v7 = vpop.permute.xlu2 %523 }
 0x1cf   : > { %871 = vrot.lane.b32.xlu1 %v2766_v27, %s2557_s6  ;;  %856 = vrot.lane.b32.xlu2 %v2764_v26, %s2557_s6 }
 0x1d0   : > { %854 = vrot.lane.b32.xlu0 %v2762_v19, %s2557_s6 }
 0x1d1   : > { %v2811_v8 = vpop.permute.xlu2 %547 }
 0x1d7   : > { %890 = vrot.lane.b32.xlu1 %v2764_v26, %s2558_s7  ;;  %888 = vrot.lane.b32.xlu2 %v2762_v19, %s2558_s7 }
 0x1d8   : > { %873 = vrot.lane.b32.xlu0 %v2771_v28, %s2557_s6  ;;  %s3190_s6 = sld [smem:[#allocation3 + $0x5]] }
 0x1d9   : > { %v2816_v29 = vpop.permute.xlu2 %566 }
 0x1df   : > { %922 = vrot.lane.b32.xlu1 %v2762_v19, %s2559_s8  ;;  %907 = vrot.lane.b32.xlu2 %v2771_v28, %s2558_s7 }
 0x1e0   : > { %905 = vrot.lane.b32.xlu0 %v2766_v27, %s2558_s7  ;;  %s2568_s7 = smov 14  }
 0x1e1   : > { %v2821_v30 = vpop.permute.xlu1 %501  ;;  %v2823_v31 = vpop.permute.xlu2 %605 }
 0x1e2   : > { %v2825_v32 = vpop.permute.xlu0 %499 }
 0x1e3   : > { %v506_v57 = vsel %vm505_vm9, %v2825_v32, %v2821_v30  ;;  %v507_v15 = vsel %vm505_vm9, %v2821_v30, %v2825_v32 }
 0x1e4   : > { %v511_v63 = vrot.slane %v506_v57, 6 }
 0x1e6   : > { %v513_v24 = vsel %vm4698_vm2, %v507_v15, %v511_v63 }
 0x1e7   : > { %941 = vrot.lane.b32.xlu1 %v2771_v28, %s2559_s8  ;;  %939 = vrot.lane.b32.xlu2 %v2766_v27, %s2559_s8  ;;  %v515_v57 = vsel %vm493_vm5, %v513_v24, 0.0 }
 0x1e8   : > { %924 = vrot.lane.b32.xlu0 %v2764_v26, %s2559_s8  ;;  %v517_v15 = vmul.f32 %v516_v56, %v515_v57  ;;  %s3240_s8 = sld [smem:[#allocation3 + $0x36]] }
 0x1e9   : > { %v2830_v33 = vpop.permute.xlu1 %549  ;;  %v2832_v34 = vpop.permute.xlu2 %631 }
 0x1ea   : > { %v2834_v2 = vpop.permute.xlu0 %525  ;;  %v552_v12 = vsel %vm551_vm14, %v2811_v8, %v2830_v33  ;;  %v553_v3 = vsel %vm551_vm14, %v2830_v33, %v2811_v8 }
 0x1eb   : > { %v527_v55 = vsel %vm505_vm9, %v2806_v7, %v2834_v2  ;;  %v528_v13 = vsel %vm505_vm9, %v2834_v2, %v2806_v7  ;;  %v557_v25 = vrot.slane %v552_v12, 6  ;;  %v536_v2 = vstv %s2926_s16  ;;  %s3387_s16 = sld [smem:[#allocation3 + $0x9]] }
 0x1ec   : > { %v532_v60 = vrot.slane %v527_v55, 6  ;;  %v624_v55 = vsel %vm2967_vm4, 1, %v2564_v52  ;;  %vm4697_vm9 = vcmp.lt.s32.totalorder %v2882_v47, 48  ;;  %vm824_vm4 = vcmp.lt.s32.totalorder %v2882_v47, 34 }
 0x1ed   : > { %v558_v8 = vsel %vm4698_vm2, %v553_v3, %v557_v25 }
 0x1ee   : > { %v533_v16 = vsel %vm4698_vm2, %v528_v13, %v532_v60  ;;  %v560_v25 = vsel %vm546_vm11, %v558_v8, 0.0 }
 0x1ef   : > { %973 = vrot.lane.b32.xlu1 %v2766_v27, %s2560_s9  ;;  %958 = vrot.lane.b32.xlu2 %v2764_v26, %s2560_s9  ;;  %v535_v53 = vsel %vm493_vm5, %v533_v16, 0.0  ;;  %vm703_vm5 = vcmp.ge.s32.totalorder %v2875_v46, 4294967294 }
 0x1f0   : > { %956 = vrot.lane.b32.xlu0 %v2762_v19, %s2560_s9  ;;  %v537_v33 = vmul.f32 %v536_v2, %v535_v53  ;;  %v4726_v53 = vmov 0 }
 0x1f1   : > { %v2839_v5 = vpop.permute.xlu1 %588  ;;  %v2841_v37 = vpop.permute.xlu2 %670 }
 0x1f2   : > { %v2843_v38 = vpop.permute.xlu0 %564 }
 0x1f3   : > { %v568_v14 = vsel %vm551_vm14, %v2843_v38, %v2816_v29  ;;  %v569_v11 = vsel %vm551_vm14, %v2816_v29, %v2843_v38  ;;  %vm663_vm14 = vcmp.lt.s32.totalorder %v2875_v46, 15  ;;  %v561_v29 = vstv %s2947_s20  ;;  %s2570_s20 = smov 3  }
 0x1f4   : > { %v573_v7 = vrot.slane %v568_v14, 6  ;;  %v2325_v38 = vrot.slane %v624_v55, 9  ;;  %vm3061_vm0 = vmand %vm662_vm10, %vm663_vm14  ;;  %v538_v55 = vadd.f32 %v537_v33, %v517_v15  ;;  %vm704_vm10 = vcmp.lt.s32.totalorder %v2875_v46, 14 }
 0x1f5   : > { %v4727_v53 = vsel %vm3061_vm0, 4294967295, %v4726_v53  ;;  %v562_v3 = vmul.f32 %v561_v29, %v560_v25  ;;  %v665_v8 = vsel %vm3061_vm0, 1, %v2564_v52  ;;  %v618_v15 = vstv %s3026_s25  ;;  %s2571_s25 = smov 2  }
 0x1f6   : > { %v574_v14 = vsel %vm4698_vm2, %v569_v11, %v573_v7  ;;  %v577_v7 = vstv %s2976_s21  ;;  %vm674_vm14 = vcmp.lt.s32.totalorder %v2882_v47, 47  ;;  %s3424_s21 = sld [smem:[#allocation3 + $0xa]] }
 0x1f7   : > { %992 = vrot.lane.b32.xlu1 %v2764_v26, %s2561_s10  ;;  %990 = vrot.lane.b32.xlu2 %v2762_v19, %s2561_s10 }
 0x1f8   : > { %975 = vrot.lane.b32.xlu0 %v2771_v28, %s2560_s9  ;;  %s3251_s9 = sld [smem:[#allocation3 + $0x6]] }
 0x1f9   : > { %v2848_v39 = vpop.permute.xlu1 %607  ;;  %v2850_v40 = vpop.permute.xlu2 %689 }
 0x1fa   : > { %v2852_v9 = vpop.permute.xlu0 %590  ;;  %v609_v16 = vsel %vm592_vm3, %v2823_v31, %v2848_v39 }
 0x1fb   : > { %v593_v30 = vsel %vm592_vm3, %v2839_v5, %v2852_v9  ;;  %v594_v17 = vsel %vm592_vm3, %v2852_v9, %v2839_v5  ;;  %v602_v5 = vstv %s2978_s22  ;;  %v614_v9 = vrot.slane %v609_v16, 6  ;;  %s3443_s22 = sld [smem:[#allocation3 + $0x3b]] }
 0x1fc   : > { %v598_v12 = vrot.slane %v593_v30, 6  ;;  %v576_v30 = vsel %vm546_vm11, %v574_v14, 0.0  ;;  %vm3093_vm11 = vcmp.ne.s32.totalorder %v2325_v38, 0  ;;  %v4730_v38 = vmov 0 }
 0x1fd   : > { %v578_v11 = vmul.f32 %v577_v7, %v576_v30 }
 0x1fe   : > { %v599_v2 = vsel %vm4698_vm2, %v594_v17, %v598_v12  ;;  %v563_v17 = vadd.f32 %v562_v3, %v538_v55 }
 0x1ff   : > { %1024 = vrot.lane.b32.xlu1 %v2762_v19, %s2562_s11  ;;  %1009 = vrot.lane.b32.xlu2 %v2771_v28, %s2561_s10  ;;  %v601_v12 = vsel %vm4696_vm15, %v599_v2, 0.0  ;;  %vm3112_vm15 = vmand %vm703_vm5, %vm704_vm10  ;;  %vm745_vm5 = vcmp.lt.s32.totalorder %v2875_v46, 13  ;;  %vm4732_vm10 = vcmp.lt.s32.totalorder %v2882_v47, 48 }
 0x200   : > { %1007 = vrot.lane.b32.xlu0 %v2766_v27, %s2561_s10  ;;  %v4731_v38 = vsel %vm3112_vm15, 4294967295, %v4730_v38  ;;  %v603_v2 = vmul.f32 %v602_v5, %v601_v12  ;;  %v4738_v12 = vmov 0  ;;  %s3271_s10 = sld [smem:[#allocation3 + $0x37]] }
 0x201   : > { %v2857_v41 = vpop.permute.xlu1 %646  ;;  %v2859_v10 = vpop.permute.xlu2 %728 }
 0x202   : > { %v2861_v42 = vpop.permute.xlu0 %629 }
 0x203   : > { %v634_v24 = vsel %vm4697_vm9, %v2861_v42, %v2832_v34  ;;  %v635_v25 = vsel %vm4697_vm9, %v2832_v34, %v2861_v42  ;;  %v2328_v34 = vrot.slane %v665_v8, 9  ;;  %v643_v42 = vstv %s3051_s26  ;;  %s3473_s26 = sld [smem:[#allocation3 + $0x3c]] }
 0x204   : > { %v639_v56 = vrot.slane %v634_v24, 6  ;;  %v610_v24 = vsel %vm592_vm3, %v2848_v39, %v2823_v31  ;;  %vm4699_vm3 = vmand %vm2885_vm6, %vm3093_vm11  ;;  %v579_v39 = vadd.f32 %v578_v11, %v563_v17  ;;  %v659_v17 = vstv %s3086_s27  ;;  %s3497_s27 = sld [smem:[#allocation3 + $0xc]] }
 0x205   : > { %v615_v30 = vsel %vm4698_vm2, %v610_v24, %v614_v9  ;;  %v706_v9 = vsel %vm3112_vm15, 1, %v2564_v52 }
 0x206   : > { %v640_v31 = vsel %vm4698_vm2, %v635_v25, %v639_v56  ;;  %vm4700_vm2 = vcmp.lt.s32.totalorder %v2882_v47, 46  ;;  %v604_v3 = vadd.f32 %v603_v2, %v579_v39  ;;  %v2331_v24 = vrot.slane %v706_v9, 9 }
 0x207   : > { %1043 = vrot.lane.b32.xlu1 %v2771_v28, %s2562_s11  ;;  %1041 = vrot.lane.b32.xlu2 %v2766_v27, %s2562_s11 }
 0x208   : > { %1026 = vrot.lane.b32.xlu0 %v2764_v26, %s2562_s11  ;;  %s2569_s11 = smov 13  }
 0x209   : > { %v2866_v43 = vpop.permute.xlu1 %672  ;;  %v2868_v44 = vpop.permute.xlu2 %754 }
 0x20a   : > { %v2870_v45 = vpop.permute.xlu0 %648  ;;  %v675_v55 = vsel %vm674_vm14, %v2841_v37, %v2866_v43 }
 0x20b   : > { %v650_v57 = vsel %vm4697_vm9, %v2857_v41, %v2870_v45  ;;  %v651_v5 = vsel %vm4732_vm10, %v2870_v45, %v2857_v41  ;;  %vm4733_vm9 = vmand %vm2885_vm6, %vm3009_vm8  ;;  %vm4734_vm10 = vcmask 1041408   ;;  %v680_v8 = vrot.slane %v675_v55, 6 }
 0x20c   : > { %v655_v7 = vrot.slane %v650_v57, 6  ;;  %v617_v56 = vsel %vm4733_vm9, %v615_v30, 0.0  ;;  %v642_v57 = vsel %vm4699_vm3, %v640_v31, 0.0  ;;  %vm3156_vm9 = vcmp.ne.s32.totalorder %v2328_v34, 0 }
 0x20d   : > { %v619_v30 = vmul.f32 %v618_v15, %v617_v56  ;;  %v644_v2 = vmul.f32 %v643_v42, %v642_v57  ;;  %v676_v15 = vsel %vm674_vm14, %v2866_v43, %v2841_v37 }
 0x20e   : > { %v656_v41 = vsel %vm4734_vm10, %v651_v5, %v655_v7  ;;  %vm4737_vm10 = vcmp.ge.s32.totalorder %v2875_v46, 4294967293 }
 0x20f   : > { %1075 = vrot.lane.b32.xlu1 %v2766_v27, %s2563_s14  ;;  %1060 = vrot.lane.b32.xlu2 %v2764_v26, %s2563_s14  ;;  %vm3166_vm3 = vmand %vm4737_vm10, %vm745_vm5  ;;  %v620_v5 = vadd.f32 %v619_v30, %v604_v3  ;;  %vm756_vm10 = vcmp.lt.s32.totalorder %v2882_v47, 45 }
 0x210   : > { %1058 = vrot.lane.b32.xlu0 %v2762_v19, %s2563_s14  ;;  %v4739_v12 = vsel %vm3166_vm3, 4294967295, %v4738_v12  ;;  %vm4740_vm5 = vmand %vm2885_vm6, %vm3093_vm11  ;;  %v747_v55 = vsel %vm3166_vm3, 1, %v2564_v52  ;;  %vm3209_vm3 = vcmp.ne.s32.totalorder %v2331_v24, 0 }
 0x211   : > { %v2889_v49 = vpop.permute.xlu1 %711  ;;  %v2891_v50 = vpop.permute.xlu2 %786  ;;  %v658_v31 = vsel %vm4740_vm5, %v656_v41, 0.0  ;;  %v645_v37 = vadd.f32 %v644_v2, %v620_v5  ;;  %vm4745_vm5 = vcmp.lt.s32.totalorder %v2882_v47, 46  ;;  %v2334_v3 = vrot.slane %v747_v55, 9 }
 0x212   : > { %v2895_v51 = vpop.permute.xlu0 %687  ;;  %v660_v56 = vmul.f32 %v659_v17, %v658_v31  ;;  %v700_v17 = vstv %s3173_s30  ;;  %s2349_s30 = sld [smem:[#allocation3 + $0xd]] }
 0x213   : > { %v691_v45 = vsel %vm674_vm14, %v2895_v51, %v2850_v40  ;;  %v692_v52 = vsel %vm674_vm14, %v2850_v40, %v2895_v51  ;;  %v684_v51 = vstv %s3160_s29  ;;  %vm4705_vm14 = vmand %vm2885_vm6, %vm3209_vm3  ;;  %s3520_s29 = sld [smem:[#allocation3 + $0x3d]] }
 0x214   : > { %v696_v34 = vrot.slane %v691_v45, 6 }
 0x217   : > { %1094 = vrot.lane.b32.xlu1 %v2764_v26, %s2565_s15  ;;  %1092 = vrot.lane.b32.xlu2 %v2762_v19, %s2565_s15 }
 0x218   : > { %1077 = vrot.lane.b32.xlu0 %v2771_v28, %s2563_s14  ;;  %s3335_s14 = sld [smem:[#allocation3 + $0x8]] }
 0x219   : > { %v2932_v61 = vpop.permute.xlu1 %730  ;;  %v2934_v62 = vpop.permute.xlu2 %805 }
 0x21a   : > { %v2941_v4 = vpop.permute.xlu0 %713  ;;  %v732_v41 = vsel %vm4745_vm5, %v2859_v10, %v2932_v61 }
 0x21b   : > { %v716_v25 = vsel %vm4700_vm2, %v2889_v49, %v2941_v4  ;;  %vm4741_vm2 = vcmask 1041408   ;;  %v737_v31 = vrot.slane %v732_v41, 6 }
 0x21c   : > { %v721_v42 = vrot.slane %v716_v25, 6  ;;  %v681_v9 = vsel %vm4741_vm2, %v676_v15, %v680_v8  ;;  %vm4744_vm15 = vmmov %vm4741_vm2  ;;  %v661_v8 = vadd.f32 %v660_v56, %v645_v37  ;;  %v725_v15 = vstv %s3190_s6  ;;  %s2350_s6 = sld [smem:[#allocation3 + $0x3e]] }
 0x21d   : > { %v697_v43 = vsel %vm4744_vm15, %v692_v52, %v696_v34  ;;  %vm4746_vm2 = vmmov %vm4745_vm5  ;;  %vm4748_vm5 = vcmask 1041408  }
 0x21e   : > { %v717_v45 = vsel %vm4746_vm2, %v2941_v4, %v2889_v49  ;;  %vm4747_vm15 = vmand %vm2885_vm6, %vm3156_vm9 }
 0x21f   : > { %1126 = vrot.lane.b32.xlu1 %v2762_v19, %s2566_s23  ;;  %1111 = vrot.lane.b32.xlu2 %v2771_v28, %s2565_s15  ;;  %v683_v49 = vsel %vm4747_vm15, %v681_v9, 0.0  ;;  %v722_v4 = vsel %vm4748_vm5, %v717_v45, %v721_v42  ;;  %vm4749_vm2 = vmmov %vm4747_vm15  ;;  %vm3267_vm15 = vcmp.ne.s32.totalorder %v2334_v3, 0 }
 0x220   : > { %1109 = vrot.lane.b32.xlu0 %v2766_v27, %s2565_s15  ;;  %v699_v24 = vsel %vm4749_vm2, %v697_v43, 0.0  ;;  %v685_v5 = vmul.f32 %v684_v51, %v683_v49  ;;  %v724_v42 = vsel %vm4705_vm14, %v722_v4, 0.0  ;;  %vm4752_vm2 = vcmp.lt.s32.totalorder %v2882_v47, 46  ;;  %vm4753_vm14 = vmmov %vm4748_vm5  ;;  %s3370_s15 = sld [smem:[#allocation3 + $0x39]] }
 0x221   : > { %v3014_v60 = vpop.permute.xlu1 %769  ;;  %v3016_v63 = vpop.permute.xlu2 %837  ;;  %v701_v56 = vmul.f32 %v700_v17, %v699_v24  ;;  %v733_v43 = vsel %vm4752_vm2, %v2932_v61, %v2859_v10  ;;  %v726_v3 = vmul.f32 %v725_v15, %v724_v42  ;;  %vm751_vm5 = vmand %vm2885_vm6, %vm3267_vm15  ;;  %vm4755_vm2 = vcmp.lt.s32.totalorder %v2882_v47, 35 }
 0x222   : > { %v3029_v13 = vpop.permute.xlu0 %752  ;;  %v686_v37 = vadd.f32 %v685_v5, %v661_v8  ;;  %v738_v45 = vsel %vm4753_vm14, %v733_v43, %v737_v31  ;;  %vm4754_vm0 = vmmov %vm4753_vm14  ;;  %v741_v51 = vstv %s3240_s8  ;;  %v782_v15 = vstv %s3271_s10  ;;  %s3572_s8 = sld [smem:[#allocation3 + $0xe]] }
 0x223   : > { %v757_v40 = vsel %vm756_vm10, %v3029_v13, %v2868_v44  ;;  %v758_v41 = vsel %vm756_vm10, %v2868_v44, %v3029_v13  ;;  %vm4756_vm14 = vmmov %vm4755_vm2  ;;  %s2352_s10 = sld [smem:[#allocation3 + $0x3f]] }
 0x224   : > { %v762_v34 = vrot.slane %v757_v40, 6  ;;  %v702_v13 = vadd.f32 %v701_v56, %v686_v37 }
 0x226   : > { %v763_v40 = vsel %vm4754_vm0, %v758_v41, %v762_v34 }
 0x227   : > { %1145 = vrot.lane.b32.xlu1 %v2771_v28, %s2566_s23  ;;  %1143 = vrot.lane.b32.xlu2 %v2766_v27, %s2566_s23  ;;  %v765_v4 = vsel %vm751_vm5, %v763_v40, 0.0 }
 0x228   : > { %1128 = vrot.lane.b32.xlu0 %v2764_v26, %s2566_s23  ;;  %s3460_s23 = sld [smem:[#allocation3 + $0xb]] }
 0x229   : > { %v3088_v33 = vpop.permute.xlu1 %788  ;;  %v3090_v14 = vpop.permute.xlu2 %856 }
 0x22a   : > { %v3098_v16 = vpop.permute.xlu0 %771  ;;  %v791_v10 = vsel %vm4755_vm2, %v2891_v50, %v3088_v33  ;;  %vm858_vm2 = vcmp.lt.s32.totalorder %v2882_v47, 33  ;;  %v792_v43 = vsel %vm4756_vm14, %v3088_v33, %v2891_v50 }
 0x22b   : > { %v773_v25 = vsel %vm756_vm10, %v3014_v60, %v3098_v16  ;;  %v774_v44 = vsel %vm756_vm10, %v3098_v16, %v3014_v60  ;;  %vm4757_vm10 = vmand %vm2885_vm6, %vm3209_vm3  ;;  %v766_v16 = vstv %s3251_s9  ;;  %v796_v31 = vrot.slane %v791_v10, 6  ;;  %s2574_s9 = smov 126  }
 0x22c   : > { %v778_v52 = vrot.slane %v773_v25, 6  ;;  %v740_v60 = vsel %vm4757_vm10, %v738_v45, 0.0  ;;  %v727_v25 = vadd.f32 %v726_v3, %v702_v13  ;;  %vm785_vm6 = vmand %vm2903_vm12, %vm2943_vm1 }
 0x22d   : > { %v742_v56 = vmul.f32 %v741_v51, %v740_v60 }
 0x22e   : > { %v779_v49 = vsel %vm4754_vm0, %v774_v44, %v778_v52  ;;  %v767_v52 = vmul.f32 %v766_v16, %v765_v4  ;;  %vm4758_vm0 = vmmov %vm4756_vm14  ;;  %v816_v44 = vstv %s3322_s13  ;;  %s3611_s13 = sld [smem:[#allocation3 + $0x40]] }
 0x22f   : > { %1177 = vrot.lane.b32.xlu1 %v2766_v27, %s2567_s28  ;;  %1162 = vrot.lane.b32.xlu2 %v2764_v26, %s2567_s28  ;;  %v781_v42 = vsel %vm751_vm5, %v779_v49, 0.0  ;;  %v743_v41 = vadd.f32 %v742_v56, %v727_v25  ;;  %vm4759_vm5 = vcmask 1041408  }
 0x230   : > { %1160 = vrot.lane.b32.xlu0 %v2762_v19, %s2567_s28  ;;  %v797_v45 = vsel %vm4759_vm5, %v792_v43, %v796_v31  ;;  %v783_v3 = vmul.f32 %v782_v15, %v781_v42  ;;  %vm4760_vm10 = vmmov %vm4759_vm5 }
 0x231   : > { %v3179_v7 = vpop.permute.xlu1 %820  ;;  %v3181_v46 = vpop.permute.xlu2 %888  ;;  %v799_v10 = vsel %vm785_vm6, %v797_v45, 0.0  ;;  %v850_v45 = vstv %s3370_s15  ;;  %s2356_s15 = sld [smem:[#allocation3 + $0x41]] }
 0x232   : > { %v3188_v39 = vpop.permute.xlu0 %803 }
 0x233   : > { %v807_v61 = vsel %vm4756_vm14, %v3188_v39, %v2934_v62  ;;  %v808_v48 = vsel %vm4758_vm0, %v2934_v62, %v3188_v39  ;;  %v768_v39 = vadd.f32 %v767_v52, %v743_v41  ;;  %vm819_vm14 = vmand %vm2903_vm12, %vm2988_vm7 }
 0x234   : > { %v812_v34 = vrot.slane %v807_v61, 6  ;;  %vm4761_vm0 = vmmov %vm4759_vm5 }
 0x235   : > { %v784_v49 = vadd.f32 %v783_v3, %v768_v39  ;;  %vm4762_vm5 = vmmov %vm4761_vm0  ;;  %v868_v3 = vstv %s3387_s16  ;;  %s2576_s16 = smov 115  }
 0x236   : > { %v813_v40 = vsel %vm4760_vm10, %v808_v48, %v812_v34  ;;  %vm853_vm10 = vmand %vm2903_vm12, %vm3009_vm8 }
 0x237   : > { %1196 = vrot.lane.b32.xlu1 %v2764_v26, %s2568_s7  ;;  %1194 = vrot.lane.b32.xlu2 %v2762_v19, %s2568_s7  ;;  %v815_v61 = vsel %vm785_vm6, %v813_v40, 0.0  ;;  %vm892_vm6 = vcmp.lt.s32.totalorder %v2882_v47, 32 }
 0x238   : > { %1179 = vrot.lane.b32.xlu0 %v2771_v28, %s2567_s28  ;;  %v817_v15 = vmul.f32 %v816_v44, %v815_v61  ;;  %s2572_s28 = smov 1  }
 0x239   : > { %v3257_v30 = vpop.permute.xlu1 %839  ;;  %v3259_v2 = vpop.permute.xlu2 %907 }
 0x23a   : > { %v823_v55 = vpop.permute.xlu0 %822  ;;  %v841_v50 = vsel %vm824_vm4, %v3016_v63, %v3257_v30  ;;  %v842_v56 = vsel %vm824_vm4, %v3257_v30, %v3016_v63 }
 0x23b   : > { %v825_v8 = vsel %vm824_vm4, %v3179_v7, %v823_v55  ;;  %v826_v62 = vsel %vm824_vm4, %v823_v55, %v3179_v7  ;;  %v800_v55 = vstv %s3306_s12  ;;  %v846_v60 = vrot.slane %v841_v50, 6  ;;  %vm4763_vm4 = vmmov %vm4761_vm0  ;;  %s2575_s12 = smov 125  }
 0x23c   : > { %v830_v37 = vrot.slane %v825_v8, 6  ;;  %v834_v8 = vstv %s3335_s14  ;;  %v801_v34 = vmul.f32 %v800_v55, %v799_v10  ;;  %v884_v55 = vstv %s3397_s17  ;;  %s2355_s14 = sld [smem:[#allocation3 + $0x10]] }
 0x23d   : > { %v847_v43 = vsel %vm4762_vm5, %v842_v56, %v846_v60  ;;  %vm4765_vm5 = vmmov %vm4761_vm0  ;;  %s3663_s17 = sld [smem:[#allocation3 + $0x11]] }
 0x23e   : > { %v831_v7 = vsel %vm4761_vm0, %v826_v62, %v830_v37  ;;  %v802_v37 = vadd.f32 %v801_v34, %v784_v49 }
 0x23f   : > { %1228 = vrot.lane.b32.xlu1 %v2762_v19, %s2569_s11  ;;  %1213 = vrot.lane.b32.xlu2 %v2771_v28, %s2568_s7  ;;  %v833_v25 = vsel %vm819_vm14, %v831_v7, 0.0 }
 0x240   : > { %1211 = vrot.lane.b32.xlu0 %v2766_v27, %s2568_s7  ;;  %v835_v48 = vmul.f32 %v834_v8, %v833_v25  ;;  %s2573_s7 = smov 127  }
 0x241   : > { %v872_v17 = vpop.permute.xlu1 %871  ;;  %v3327_v24 = vpop.permute.xlu2 %939 }
 0x242   : > { %v855_v5 = vpop.permute.xlu0 %854 }
 0x243   : > { %v859_v33 = vsel %vm858_vm2, %v855_v5, %v3090_v14  ;;  %v860_v52 = vsel %vm858_vm2, %v3090_v14, %v855_v5  ;;  %v818_v14 = vadd.f32 %v817_v15, %v802_v37  ;;  %v918_v15 = vstv %s3443_s22  ;;  %s2359_s22 = sld [smem:[#allocation3 + $0x12]] }
 0x244   : > { %v864_v16 = vrot.slane %v859_v33, 6 }
 0x245   : > { %v836_v33 = vadd.f32 %v835_v48, %v818_v14 }
 0x246   : > { %v865_v41 = vsel %vm4761_vm0, %v860_v52, %v864_v16 }
 0x247   : > { %1247 = vrot.lane.b32.xlu1 %v2771_v28, %s2569_s11  ;;  %1245 = vrot.lane.b32.xlu2 %v2766_v27, %s2569_s11  ;;  %v867_v40 = vsel %vm853_vm10, %v865_v41, 0.0 }
 0x248   : > { %1230 = vrot.lane.b32.xlu0 %v2764_v26, %s2569_s11  ;;  %v869_v49 = vmul.f32 %v868_v3, %v867_v40  ;;  %v936_v3 = vstv %s3460_s23  ;;  %s2353_s11 = sld [smem:[#allocation3 + $0xf]]  ;;  %s2578_s23 = smov 113  }
 0x249   : > { %v891_v13 = vpop.permute.xlu1 %890  ;;  %v3389_v51 = vpop.permute.xlu2 %958 }
 0x24a   : > { %v874_v4 = vpop.permute.xlu0 %873  ;;  %v893_v63 = vsel %vm892_vm6, %v3181_v46, %v891_v13  ;;  %v894_v16 = vsel %vm892_vm6, %v891_v13, %v3181_v46 }
 0x24b   : > { %v875_v31 = vsel %vm858_vm2, %v872_v17, %v874_v4  ;;  %v876_v30 = vsel %vm858_vm2, %v874_v4, %v872_v17  ;;  %v849_v17 = vsel %vm819_vm14, %v847_v43, 0.0  ;;  %v898_v39 = vrot.slane %v893_v63, 6  ;;  %vm887_vm2 = vmand %vm2903_vm12, %vm3093_vm11 }
 0x24c   : > { %v880_v42 = vrot.slane %v875_v31, 6  ;;  %v851_v61 = vmul.f32 %v850_v45, %v849_v17  ;;  %vm4764_vm14 = vmmov %vm4761_vm0 }
 0x24d   : > { %v899_v25 = vsel %vm4764_vm14, %v894_v16, %v898_v39  ;;  %v952_v39 = vstv %s3473_s26  ;;  %vm955_vm14 = vmand %vm2903_vm12, %vm3209_vm3  ;;  %s2361_s26 = sld [smem:[#allocation3 + $0x13]] }
 0x24e   : > { %v881_v5 = vsel %vm4763_vm4, %v876_v30, %v880_v42  ;;  %v852_v8 = vadd.f32 %v851_v61, %v836_v33  ;;  %v901_v13 = vsel %vm887_vm2, %v899_v25, 0.0  ;;  %vm4766_vm4 = vmmov %vm4761_vm0 }
 0x24f   : > { %1279 = vrot.lane.b32.xlu1 %v2766_v27, %s2570_s20  ;;  %1264 = vrot.lane.b32.xlu2 %v2764_v26, %s2570_s20  ;;  %v883_v10 = vsel %vm853_vm10, %v881_v5, 0.0  ;;  %vm921_vm10 = vmand %vm2903_vm12, %vm3156_vm9 }
 0x250   : > { %1262 = vrot.lane.b32.xlu0 %v2762_v19, %s2570_s20  ;;  %v885_v31 = vmul.f32 %v884_v55, %v883_v10  ;;  %v870_v46 = vadd.f32 %v869_v49, %v852_v8 }
 0x251   : > { %v923_v50 = vpop.permute.xlu1 %922  ;;  %v3441_v62 = vpop.permute.xlu2 %990 }
 0x252   : > { %v906_v7 = vpop.permute.xlu0 %905  ;;  %v886_v37 = vadd.f32 %v885_v31, %v870_v46 }
 0x253   : > { %v909_v44 = vsel %vm892_vm6, %v906_v7, %v3259_v2  ;;  %v910_v4 = vsel %vm892_vm6, %v3259_v2, %v906_v7  ;;  %vm926_vm6 = vcmp.lt.s32.totalorder %v2882_v47, 31  ;;  %v902_v2 = vstv %s3424_s21  ;;  %s2358_s21 = sld [smem:[#allocation3 + $0x42]] }
 0x254   : > { %v914_v60 = vrot.slane %v909_v44, 6  ;;  %v903_v14 = vmul.f32 %v902_v2, %v901_v13 }
 0x256   : > { %v915_v34 = vsel %vm4765_vm5, %v910_v4, %v914_v60  ;;  %vm4767_vm5 = vmmov %vm4761_vm0 }
 0x257   : > { %1298 = vrot.lane.b32.xlu1 %v2764_v26, %s2571_s25  ;;  %1296 = vrot.lane.b32.xlu2 %v2762_v19, %s2571_s25  ;;  %v917_v42 = vsel %vm887_vm2, %v915_v34, 0.0  ;;  %vm960_vm2 = vcmp.lt.s32.totalorder %v2882_v47, 30  ;;  %v970_v34 = vstv %s3497_s27  ;;  %s2362_s27 = sld [smem:[#allocation3 + $0x44]] }
 0x258   : > { %1281 = vrot.lane.b32.xlu0 %v2771_v28, %s2570_s20  ;;  %v919_v5 = vmul.f32 %v918_v15, %v917_v42  ;;  %s2577_s20 = smov 114  }
 0x259   : > { %v942_v56 = vpop.permute.xlu1 %941  ;;  %v3479_v52 = vpop.permute.xlu2 %1009 }
 0x25a   : > { %v943_v43 = vsel %vm926_vm6, %v3327_v24, %v942_v56  ;;  %v944_v48 = vsel %vm926_vm6, %v942_v56, %v3327_v24  ;;  %v925_v41 = vpop.permute.xlu0 %924  ;;  %v904_v24 = vadd.f32 %v903_v14, %v886_v37 }
 0x25b   : > { %v948_v63 = vrot.slane %v943_v43, 6  ;;  %v927_v30 = vsel %vm926_vm6, %v923_v50, %v925_v41  ;;  %v928_v40 = vsel %vm926_vm6, %v925_v41, %v923_v50  ;;  %vm994_vm6 = vcmp.lt.s32.totalorder %v2882_v47, 29 }
 0x25c   : > { %v932_v45 = vrot.slane %v927_v30, 6  ;;  %v920_v10 = vadd.f32 %v919_v5, %v904_v24  ;;  %v986_v5 = vstv %s3520_s29  ;;  %s3754_s29 = sld [smem:[#allocation3 + $0x14]] }
 0x25d   : > { %v949_v17 = vsel %vm4761_vm0, %v944_v48, %v948_v63 }
 0x25e   : > { %v933_v33 = vsel %vm4766_vm4, %v928_v40, %v932_v45  ;;  %v951_v7 = vsel %vm921_vm10, %v949_v17, 0.0  ;;  %vm4768_vm4 = vmmov %vm4761_vm0  ;;  %v1004_v45 = vstv %s2349_s30  ;;  %s2580_s30 = smov 111  }
 0x25f   : > { %v935_v55 = vsel %vm921_vm10, %v933_v33, 0.0  ;;  %1330 = vrot.lane.b32.xlu1 %v2762_v19, %s2572_s28  ;;  %1315 = vrot.lane.b32.xlu2 %v2771_v28, %s2571_s25  ;;  %v953_v49 = vmul.f32 %v952_v39, %v951_v7  ;;  %vm989_vm10 = vmand %vm2903_vm12, %vm3267_vm15 }
 0x260   : > { %v937_v44 = vmul.f32 %v936_v3, %v935_v55  ;;  %1313 = vrot.lane.b32.xlu0 %v2766_v27, %s2571_s25  ;;  %vm1023_vm12 = vmand %vm2915_vm13, %vm2943_vm1  ;;  %s3702_s25 = sld [smem:[#allocation3 + $0x43]] }
 0x261   : > { %v974_v50 = vpop.permute.xlu1 %973  ;;  %v3507_v61 = vpop.permute.xlu2 %1041 }
 0x262   : > { %v938_v60 = vadd.f32 %v937_v44, %v920_v10  ;;  %v957_v16 = vpop.permute.xlu0 %956 }
 0x263   : > { %v961_v4 = vsel %vm960_vm2, %v957_v16, %v3389_v51  ;;  %v962_v8 = vsel %vm960_vm2, %v3389_v51, %v957_v16 }
 0x264   : > { %v954_v25 = vadd.f32 %v953_v49, %v938_v60  ;;  %v966_v31 = vrot.slane %v961_v4, 6  ;;  %v1020_v60 = vstv %s2350_s6  ;;  %s2364_s6 = sld [smem:[#allocation3 + $0x45]] }
 0x266   : > { %v967_v46 = vsel %vm4767_vm5, %v962_v8, %v966_v31  ;;  %vm4770_vm5 = vmmov %vm4761_vm0 }
 0x267   : > { %v969_v2 = vsel %vm955_vm14, %v967_v46, 0.0  ;;  %1349 = vrot.lane.b32.xlu1 %v2771_v28, %s2572_s28  ;;  %1347 = vrot.lane.b32.xlu2 %v2766_v27, %s2572_s28 }
 0x268   : > { %v971_v51 = vmul.f32 %v970_v34, %v969_v2  ;;  %1332 = vrot.lane.b32.xlu0 %v2764_v26, %s2572_s28  ;;  %s2579_s28 = smov 112  }
 0x269   : > { %v993_v13 = vpop.permute.xlu1 %992  ;;  %v3532_v15 = vpop.permute.xlu2 %1060 }
 0x26a   : > { %v972_v42 = vadd.f32 %v971_v51, %v954_v25  ;;  %v995_v56 = vsel %vm994_vm6, %v3441_v62, %v993_v13  ;;  %v996_v37 = vsel %vm994_vm6, %v993_v13, %v3441_v62  ;;  %v976_v43 = vpop.permute.xlu0 %975 }
 0x26b   : > { %v1000_v48 = vrot.slane %v995_v56, 6  ;;  %v977_v41 = vsel %vm960_vm2, %v974_v50, %v976_v43  ;;  %v978_v63 = vsel %vm960_vm2, %v976_v43, %v974_v50  ;;  %vm4769_vm2 = vmmov %vm4761_vm0 }
 0x26c   : > { %v982_v30 = vrot.slane %v977_v41, 6 }
 0x26d   : > { %v1001_v14 = vsel %vm4761_vm0, %v996_v37, %v1000_v48  ;;  %v1038_v37 = vstv %s3572_s8  ;;  %v1054_v48 = vstv %s2352_s10  ;;  %s2581_s8 = smov 110   ;;  %s2367_s10 = sld [smem:[#allocation3 + $0x16]] }
 0x26e   : > { %v983_v62 = vsel %vm4768_vm4, %v978_v63, %v982_v30  ;;  %v1003_v17 = vsel %vm989_vm10, %v1001_v14, 0.0  ;;  %vm4772_vm4 = vmmov %vm4769_vm2 }
 0x26f   : > { %v985_v3 = vsel %vm955_vm14, %v983_v62, 0.0  ;;  %1395 = vrot.lane.b32.xlu1 %v2766_v27, %s2573_s7  ;;  %1380 = vrot.lane.b32.xlu2 %v2764_v26, %s2573_s7  ;;  %v1005_v39 = vmul.f32 %v1004_v45, %v1003_v17  ;;  %vm1028_vm14 = vcmp.lt.s32.totalorder %v2882_v47, 19 }
 0x270   : > { %v987_v40 = vmul.f32 %v986_v5, %v985_v3  ;;  %1378 = vrot.lane.b32.xlu0 %v2762_v19, %s2573_s7 }
 0x271   : > { %v1025_v24 = vpop.permute.xlu1 %1024  ;;  %v3564_v33 = vpop.permute.xlu2 %1092 }
 0x272   : > { %v988_v7 = vadd.f32 %v987_v40, %v972_v42  ;;  %v1008_v55 = vpop.permute.xlu0 %1007 }
 0x273   : > { %v1011_v10 = vsel %vm994_vm6, %v1008_v55, %v3479_v52  ;;  %v1012_v44 = vsel %vm994_vm6, %v3479_v52, %v1008_v55  ;;  %vm4771_vm6 = vmmov %vm4761_vm0 }
 0x274   : > { %v1006_v50 = vadd.f32 %v1005_v39, %v988_v7  ;;  %v1016_v49 = vrot.slane %v1011_v10, 6  ;;  %vm1057_vm0 = vmand %vm2915_vm13, %vm2988_vm7  ;;  %v1072_v39 = vstv %s2353_s11  ;;  %s2368_s11 = sld [smem:[#allocation3 + $0x47]] }
 0x276   : > { %v1017_v16 = vsel %vm4769_vm2, %v1012_v44, %v1016_v49  ;;  %vm1096_vm2 = vcmp.lt.s32.totalorder %v2882_v47, 17 }
 0x277   : > { %v1019_v4 = vsel %vm989_vm10, %v1017_v16, 0.0  ;;  %1414 = vrot.lane.b32.xlu1 %v2764_v26, %s2574_s9  ;;  %1412 = vrot.lane.b32.xlu2 %v2762_v19, %s2574_s9  ;;  %vm1062_vm10 = vcmp.lt.s32.totalorder %v2882_v47, 18 }
 0x278   : > { %v1021_v52 = vmul.f32 %v1020_v60, %v1019_v4  ;;  %1397 = vrot.lane.b32.xlu0 %v2771_v28, %s2573_s7  ;;  %s2365_s7 = sld [smem:[#allocation3 + $0x15]] }
 0x279   : > { %v1044_v8 = vpop.permute.xlu1 %1043  ;;  %v3584_v25 = vpop.permute.xlu2 %1111 }
 0x27a   : > { %v1022_v54 = vadd.f32 %v1021_v52, %v1006_v50  ;;  %v1045_v31 = vsel %vm1028_vm14, %v3507_v61, %v1044_v8  ;;  %v1046_v34 = vsel %vm1028_vm14, %v1044_v8, %v3507_v61  ;;  %v1027_v46 = vpop.permute.xlu0 %1026 }
 0x27b   : > { %v1050_v2 = vrot.slane %v1045_v31, 6  ;;  %v1029_v51 = vsel %vm1028_vm14, %v1025_v24, %v1027_v46  ;;  %v1030_v13 = vsel %vm1028_vm14, %v1027_v46, %v1025_v24  ;;  %vm1091_vm14 = vmand %vm2915_vm13, %vm3009_vm8  ;;  %v1106_v46 = vstv %s2355_s14  ;;  %s2583_s14 = smov 99  }
 0x27c   : > { %v1034_v42 = vrot.slane %v1029_v51, 6 }
 0x27d   : > { %v1051_v56 = vsel %vm4770_vm5, %v1046_v34, %v1050_v2  ;;  %v1088_v34 = vstv %s3611_s13  ;;  %vm4774_vm5 = vmmov %vm4772_vm4  ;;  %s3845_s13 = sld [smem:[#allocation3 + $0x17]] }
 0x27e   : > { %v1035_v43 = vsel %vm4771_vm6, %v1030_v13, %v1034_v42  ;;  %v1053_v41 = vsel %vm1023_vm12, %v1051_v56, 0.0  ;;  %vm4775_vm6 = vmmov %vm4772_vm4 }
 0x27f   : > { %v1037_v63 = vsel %vm1023_vm12, %v1035_v43, 0.0  ;;  %1446 = vrot.lane.b32.xlu1 %v2762_v19, %s2575_s12  ;;  %1431 = vrot.lane.b32.xlu2 %v2771_v28, %s2574_s9  ;;  %v1055_v5 = vmul.f32 %v1054_v48, %v1053_v41  ;;  %vm4773_vm12 = vmmov %vm4772_vm4 }
 0x280   : > { %v1039_v61 = vmul.f32 %v1038_v37, %v1037_v63  ;;  %1429 = vrot.lane.b32.xlu0 %v2766_v27, %s2574_s9  ;;  %s3793_s9 = sld [smem:[#allocation3 + $0x46]] }
 0x281   : > { %v1076_v30 = vpop.permute.xlu1 %1075  ;;  %v3599_v14 = vpop.permute.xlu2 %1143 }
 0x282   : > { %v1040_v62 = vadd.f32 %v1039_v61, %v1022_v54  ;;  %v1059_v45 = vpop.permute.xlu0 %1058 }
 0x283   : > { %v1063_v17 = vsel %vm1062_vm10, %v1059_v45, %v3532_v15  ;;  %v1064_v3 = vsel %vm1062_vm10, %v3532_v15, %v1059_v45 }
 0x284   : > { %v1056_v40 = vadd.f32 %v1055_v5, %v1040_v62  ;;  %v1068_v24 = vrot.slane %v1063_v17, 6  ;;  %v1122_v5 = vstv %s2356_s15  ;;  %s3858_s15 = sld [smem:[#allocation3 + $0x48]] }
 0x286   : > { %v1069_v7 = vsel %vm4772_vm4, %v1064_v3, %v1068_v24 }
 0x287   : > { %v1071_v55 = vsel %vm1057_vm0, %v1069_v7, 0.0  ;;  %1465 = vrot.lane.b32.xlu1 %v2771_v28, %s2575_s12  ;;  %1463 = vrot.lane.b32.xlu2 %v2766_v27, %s2575_s12 }
 0x288   : > { %v1073_v15 = vmul.f32 %v1072_v39, %v1071_v55  ;;  %1448 = vrot.lane.b32.xlu0 %v2764_v26, %s2575_s12  ;;  %s2582_s12 = smov 109  }
 0x289   : > { %v1095_v10 = vpop.permute.xlu1 %1094  ;;  %v3623_v44 = vpop.permute.xlu2 %1162 }
 0x28a   : > { %v1074_v50 = vadd.f32 %v1073_v15, %v1056_v40  ;;  %v1097_v49 = vsel %vm1096_vm2, %v3564_v33, %v1095_v10  ;;  %v1098_v60 = vsel %vm1096_vm2, %v1095_v10, %v3564_v33  ;;  %v1078_v16 = vpop.permute.xlu0 %1077 }
 0x28b   : > { %v1102_v4 = vrot.slane %v1097_v49, 6  ;;  %v1079_v52 = vsel %vm1062_vm10, %v1076_v30, %v1078_v16  ;;  %v1080_v8 = vsel %vm1062_vm10, %v1078_v16, %v1076_v30  ;;  %vm1130_vm10 = vcmp.lt.s32.totalorder %v2882_v47, 16 }
 0x28c   : > { %v1084_v54 = vrot.slane %v1079_v52, 6 }
 0x28d   : > { %v1103_v31 = vsel %vm4773_vm12, %v1098_v60, %v1102_v4  ;;  %v1140_v60 = vstv %s3663_s17  ;;  %v1156_v4 = vstv %s2358_s21  ;;  %vm1159_vm12 = vmand %vm2915_vm13, %vm3156_vm9  ;;  %s3867_s17 = sld [smem:[#allocation3 + $0x49]]  ;;  %s2584_s21 = smov 98  }
 0x28e   : > { %v1085_v33 = vsel %vm4774_vm5, %v1080_v8, %v1084_v54  ;;  %v1105_v2 = vsel %vm1091_vm14, %v1103_v31, 0.0 }
 0x28f   : > { %v1087_v51 = vsel %vm1057_vm0, %v1085_v33, 0.0  ;;  %1497 = vrot.lane.b32.xlu1 %v2766_v27, %s2576_s16  ;;  %1482 = vrot.lane.b32.xlu2 %v2764_v26, %s2576_s16  ;;  %v1107_v37 = vmul.f32 %v1106_v46, %v1105_v2  ;;  %vm1125_vm0 = vmand %vm2915_vm13, %vm3093_vm11 }
 0x290   : > { %v1089_v13 = vmul.f32 %v1088_v34, %v1087_v51  ;;  %1480 = vrot.lane.b32.xlu0 %v2762_v19, %s2576_s16 }
 0x291   : > { %v1127_v42 = vpop.permute.xlu1 %1126  ;;  %v3655_v56 = vpop.permute.xlu2 %1194 }
 0x292   : > { %v1090_v43 = vadd.f32 %v1089_v13, %v1074_v50  ;;  %v1110_v48 = vpop.permute.xlu0 %1109 }
 0x293   : > { %v1113_v41 = vsel %vm1096_vm2, %v1110_v48, %v3584_v25  ;;  %v1114_v63 = vsel %vm1096_vm2, %v3584_v25, %v1110_v48  ;;  %vm4776_vm2 = vmmov %vm4772_vm4 }
 0x294   : > { %v1108_v61 = vadd.f32 %v1107_v37, %v1090_v43  ;;  %v1118_v30 = vrot.slane %v1113_v41, 6  ;;  %v1174_v37 = vstv %s2359_s22  ;;  %vm4777_vm5 = vmmov %vm4776_vm2  ;;  %s3915_s22 = sld [smem:[#allocation3 + $0x4a]] }
 0x296   : > { %v1119_v62 = vsel %vm4775_vm6, %v1114_v63, %v1118_v30  ;;  %vm1198_vm6 = vcmp.lt.s32.totalorder %v2882_v47, 14 }
 0x297   : > { %v1121_v45 = vsel %vm1091_vm14, %v1119_v62, 0.0  ;;  %1516 = vrot.lane.b32.xlu1 %v2764_v26, %s2577_s20  ;;  %1514 = vrot.lane.b32.xlu2 %v2762_v19, %s2577_s20  ;;  %vm1164_vm14 = vcmp.lt.s32.totalorder %v2882_v47, 15 }
 0x298   : > { %v1123_v25 = vmul.f32 %v1122_v5, %v1121_v45  ;;  %1499 = vrot.lane.b32.xlu0 %v2771_v28, %s2576_s16  ;;  %s3863_s16 = sld [smem:[#allocation3 + $0x18]] }
 0x299   : > { %v1146_v17 = vpop.permute.xlu1 %1145  ;;  %v3675_v3 = vpop.permute.xlu2 %1213 }
 0x29a   : > { %v1124_v40 = vadd.f32 %v1123_v25, %v1108_v61  ;;  %v1147_v24 = vsel %vm1130_vm10, %v3599_v14, %v1146_v17  ;;  %v1148_v39 = vsel %vm1130_vm10, %v1146_v17, %v3599_v14  ;;  %v1129_v7 = vpop.permute.xlu0 %1128 }
 0x29b   : > { %v1152_v55 = vrot.slane %v1147_v24, 6  ;;  %v1131_v15 = vsel %vm1130_vm10, %v1127_v42, %v1129_v7  ;;  %v1132_v10 = vsel %vm1130_vm10, %v1129_v7, %v1127_v42  ;;  %vm1193_vm10 = vmand %vm2915_vm13, %vm3209_vm3  ;;  %v1208_v7 = vstv %s2361_s26  ;;  %s2585_s26 = smov 97  }
 0x29c   : > { %v1136_v50 = vrot.slane %v1131_v15, 6 }
 0x29d   : > { %v1153_v49 = vsel %vm4772_vm4, %v1148_v39, %v1152_v55  ;;  %v1190_v39 = vstv %s3702_s25  ;;  %s2377_s25 = sld [smem:[#allocation3 + $0x4b]] }
 0x29e   : > { %v1137_v16 = vsel %vm4776_vm2, %v1132_v10, %v1136_v50  ;;  %v1155_v52 = vsel %vm1125_vm0, %v1153_v49, 0.0 }
 0x29f   : > { %v1139_v8 = vsel %vm1125_vm0, %v1137_v16, 0.0  ;;  %1548 = vrot.lane.b32.xlu1 %v2762_v19, %s2578_s23  ;;  %1533 = vrot.lane.b32.xlu2 %v2771_v28, %s2577_s20  ;;  %v1157_v34 = vmul.f32 %v1156_v4, %v1155_v52  ;;  %vm4778_vm0 = vmmov %vm4776_vm2 }
 0x2a0   : > { %v1141_v14 = vmul.f32 %v1140_v60, %v1139_v8  ;;  %1531 = vrot.lane.b32.xlu0 %v2766_v27, %s2577_s20  ;;  %vm4779_vm4 = vmmov %vm4778_vm0  ;;  %s3875_s20 = sld [smem:[#allocation3 + $0x19]] }
 0x2a1   : > { %v1178_v54 = vpop.permute.xlu1 %1177  ;;  %v3690_v31 = vpop.permute.xlu2 %1245  ;;  %vm4780_vm2 = vmmov %vm4778_vm0 }
 0x2a2   : > { %v1142_v33 = vadd.f32 %v1141_v14, %v1124_v40  ;;  %v1161_v46 = vpop.permute.xlu0 %1160 }
 0x2a3   : > { %v1165_v2 = vsel %vm1164_vm14, %v1161_v46, %v3623_v44  ;;  %v1166_v51 = vsel %vm1164_vm14, %v3623_v44, %v1161_v46 }
 0x2a4   : > { %v1158_v13 = vadd.f32 %v1157_v34, %v1142_v33  ;;  %v1170_v42 = vrot.slane %v1165_v2, 6  ;;  %v1224_v34 = vstv %s2362_s27  ;;  %s3970_s27 = sld [smem:[#allocation3 + $0x1b]] }
 0x2a6   : > { %v1171_v43 = vsel %vm4777_vm5, %v1166_v51, %v1170_v42  ;;  %vm4781_vm5 = vmmov %vm4778_vm0 }
 0x2a7   : > { %v1173_v48 = vsel %vm1159_vm12, %v1171_v43, 0.0  ;;  %1567 = vrot.lane.b32.xlu1 %v2771_v28, %s2578_s23  ;;  %1565 = vrot.lane.b32.xlu2 %v2766_v27, %s2578_s23 }
 0x2a8   : > { %v1175_v44 = vmul.f32 %v1174_v37, %v1173_v48  ;;  %1550 = vrot.lane.b32.xlu0 %v2764_v26, %s2578_s23  ;;  %s2376_s23 = sld [smem:[#allocation3 + $0x1a]] }
 0x2a9   : > { %v1197_v41 = vpop.permute.xlu1 %1196  ;;  %v3714_v63 = vpop.permute.xlu2 %1264 }
 0x2aa   : > { %v1176_v61 = vadd.f32 %v1175_v44, %v1158_v13  ;;  %v1199_v30 = vsel %vm1198_vm6, %v3655_v56, %v1197_v41  ;;  %v1200_v5 = vsel %vm1198_vm6, %v1197_v41, %v3655_v56  ;;  %v1180_v62 = vpop.permute.xlu0 %1179 }
 0x2ab   : > { %v1204_v45 = vrot.slane %v1199_v30, 6  ;;  %v1181_v25 = vsel %vm1164_vm14, %v1178_v54, %v1180_v62  ;;  %v1182_v17 = vsel %vm1164_vm14, %v1180_v62, %v1178_v54  ;;  %vm1232_vm14 = vcmp.lt.s32.totalorder %v2882_v47, 13 }
 0x2ac   : > { %v1186_v40 = vrot.slane %v1181_v25, 6 }
 0x2ad   : > { %v1205_v24 = vsel %vm4778_vm0, %v1200_v5, %v1204_v45  ;;  %v1242_v5 = vstv %s3754_s29  ;;  %v1258_v45 = vstv %s2364_s6  ;;  %s2379_s29 = sld [smem:[#allocation3 + $0x4c]]  ;;  %s2587_s6 = smov 95  }
 0x2ae   : > { %v1187_v56 = vsel %vm4779_vm4, %v1182_v17, %v1186_v40  ;;  %v1207_v55 = vsel %vm1193_vm10, %v1205_v24, 0.0  ;;  %vm4784_vm4 = vmmov %vm4780_vm2 }
 0x2af   : > { %v1189_v15 = vsel %vm1159_vm12, %v1187_v56, 0.0  ;;  %1599 = vrot.lane.b32.xlu1 %v2766_v27, %s2579_s28  ;;  %1584 = vrot.lane.b32.xlu2 %v2764_v26, %s2579_s28  ;;  %v1209_v60 = vmul.f32 %v1208_v7, %v1207_v55  ;;  %vm1227_vm12 = vmand %vm2915_vm13, %vm3267_vm15  ;;  %vm1266_vm13 = vcmp.lt.s32.totalorder %v2882_v47, 3 }
 0x2b0   : > { %v1191_v10 = vmul.f32 %v1190_v39, %v1189_v15  ;;  %1582 = vrot.lane.b32.xlu0 %v2762_v19, %s2579_s28 }
 0x2b1   : > { %v1229_v50 = vpop.permute.xlu1 %1228  ;;  %v3746_v49 = vpop.permute.xlu2 %1296 }
 0x2b2   : > { %v1192_v16 = vadd.f32 %v1191_v10, %v1176_v61  ;;  %v1212_v4 = vpop.permute.xlu0 %1211 }
 0x2b3   : > { %v1215_v52 = vsel %vm1198_vm6, %v1212_v4, %v3675_v3  ;;  %v1216_v8 = vsel %vm1198_vm6, %v3675_v3, %v1212_v4  ;;  %vm4782_vm6 = vmmov %vm4778_vm0 }
 0x2b4   : > { %v1210_v14 = vadd.f32 %v1209_v60, %v1192_v16  ;;  %v1220_v54 = vrot.slane %v1215_v52, 6 }
 0x2b6   : > { %v1221_v33 = vsel %vm4780_vm2, %v1216_v8, %v1220_v54  ;;  %vm1300_vm2 = vcmp.lt.s32.totalorder %v2882_v47, 2 }
 0x2b7   : > { %v1223_v46 = vsel %vm1193_vm10, %v1221_v33, 0.0  ;;  %1618 = vrot.lane.b32.xlu1 %v2764_v26, %s2580_s30  ;;  %1616 = vrot.lane.b32.xlu2 %v2762_v19, %s2580_s30  ;;  %vm4783_vm10 = vnez %v4721_v18 }
 0x2b8   : > { %v1225_v3 = vmul.f32 %v1224_v34, %v1223_v46  ;;  %1601 = vrot.lane.b32.xlu0 %v2771_v28, %s2579_s28  ;;  %vm1261_vm0 = vmand %vm4783_vm10, %vm2943_vm1  ;;  %s2586_s28 = smov 96  }
 0x2b9   : > { %v1248_v2 = vpop.permute.xlu1 %1247  ;;  %v3766_v51 = vpop.permute.xlu2 %1315 }
 0x2ba   : > { %v1226_v13 = vadd.f32 %v1225_v3, %v1210_v14  ;;  %v1249_v42 = vsel %vm1232_vm14, %v3690_v31, %v1248_v2  ;;  %v1250_v37 = vsel %vm1232_vm14, %v1248_v2, %v3690_v31  ;;  %v1231_v43 = vpop.permute.xlu0 %1230 }
 0x2bb   : > { %v1254_v48 = vrot.slane %v1249_v42, 6  ;;  %v1233_v44 = vsel %vm1232_vm14, %v1229_v50, %v1231_v43  ;;  %v1234_v41 = vsel %vm1232_vm14, %v1231_v43, %v1229_v50  ;;  %v1276_v50 = vstv %s2365_s7  ;;  %vm1295_vm14 = vmand %vm4783_vm10, %vm2988_vm7  ;;  %s4009_s7 = sld [smem:[#allocation3 + $0x4d]] }
 0x2bc   : > { %v1238_v61 = vrot.slane %v1233_v44, 6  ;;  %v1292_v42 = vstv %s3793_s9  ;;  %s2383_s9 = sld [smem:[#allocation3 + $0x4e]] }
 0x2bd   : > { %v1255_v30 = vsel %vm4781_vm5, %v1250_v37, %v1254_v48  ;;  %vm4786_vm5 = vmmov %vm4784_vm4  ;;  %v1310_v37 = vstv %s2367_s10  ;;  %s2588_s10 = smov 94  }
 0x2be   : > { %v1239_v62 = vsel %vm4782_vm6, %v1234_v41, %v1238_v61  ;;  %v1257_v25 = vsel %vm1227_vm12, %v1255_v30, 0.0  ;;  %vm4787_vm6 = vmmov %vm4784_vm4 }
 0x2bf   : > { %v1241_v17 = vsel %vm1227_vm12, %v1239_v62, 0.0  ;;  %1650 = vrot.lane.b32.xlu1 %v2762_v19, %s2581_s8  ;;  %1635 = vrot.lane.b32.xlu2 %v2771_v28, %s2580_s30  ;;  %v1259_v24 = vmul.f32 %v1258_v45, %v1257_v25  ;;  %vm4785_vm12 = vmmov %vm4784_vm4 }
 0x2c0   : > { %v1243_v31 = vmul.f32 %v1242_v5, %v1241_v17  ;;  %1633 = vrot.lane.b32.xlu0 %v2766_v27, %s2580_s30  ;;  %s2380_s30 = sld [smem:[#allocation3 + $0x1c]] }
 0x2c1   : > { %v1280_v58 = vpop.permute.xlu1 %1279  ;;  %v3781_v40 = vpop.permute.xlu2 %1347 }
 0x2c2   : > { %v1244_v39 = vadd.f32 %v1243_v31, %v1226_v13  ;;  %v1263_v56 = vpop.permute.xlu0 %1262 }
 0x2c3   : > { %v1267_v7 = vsel %vm1266_vm13, %v1263_v56, %v3714_v63  ;;  %v1268_v55 = vsel %vm1266_vm13, %v3714_v63, %v1263_v56 }
 0x2c4   : > { %v1260_v15 = vadd.f32 %v1259_v24, %v1244_v39  ;;  %v1272_v10 = vrot.slane %v1267_v7, 6 }
 0x2c6   : > { %v1273_v60 = vsel %vm4784_vm4, %v1268_v55, %v1272_v10 }
 0x2c7   : > { %v1275_v16 = vsel %vm1261_vm0, %v1273_v60, 0.0  ;;  %1669 = vrot.lane.b32.xlu1 %v2771_v28, %s2581_s8  ;;  %1667 = vrot.lane.b32.xlu2 %v2766_v27, %s2581_s8 }
 0x2c8   : > { %v1277_v63 = vmul.f32 %v1276_v50, %v1275_v16  ;;  %1652 = vrot.lane.b32.xlu0 %v2764_v26, %s2581_s8  ;;  %s2382_s8 = sld [smem:[#allocation3 + $0x1d]] }
 0x2c9   : > { %v1299_v4 = vpop.permute.xlu1 %1298  ;;  %v3805_v52 = vpop.permute.xlu2 %1380 }
 0x2ca   : > { %v1278_v8 = vadd.f32 %v1277_v63, %v1260_v15  ;;  %v1301_v14 = vsel %vm1300_vm2, %v3746_v49, %v1299_v4  ;;  %v1302_v54 = vsel %vm1300_vm2, %v1299_v4, %v3746_v49  ;;  %v1282_v34 = vpop.permute.xlu0 %1281 }
 0x2cb   : > { %v1306_v33 = vrot.slane %v1301_v14, 6  ;;  %v1283_v46 = vsel %vm1266_vm13, %v1280_v58, %v1282_v34  ;;  %v1284_v3 = vsel %vm1266_vm13, %v1282_v34, %v1280_v58  ;;  %v1326_v58 = vstv %s2368_s11  ;;  %s4061_s11 = sld [smem:[#allocation3 + $0x1e]] }
 0x2cc   : > { %v1288_v2 = vrot.slane %v1283_v46, 6  ;;  %vm1334_vm13 = vcmp.lt.s32.totalorder %v2882_v47, 1  ;;  %v1344_v14 = vstv %s3845_s13  ;;  %s2385_s13 = sld [smem:[#allocation3 + $0x4f]] }
 0x2cd   : > { %v1307_v13 = vsel %vm4785_vm12, %v1302_v54, %v1306_v33  ;;  %v1360_v54 = vstv %s3858_s15  ;;  %v2518_v33 = vld [vmem:[#allocation2] sm:$0xf]  ;;  %vm1382_vm12 = vcmp.lt.s32.totalorder %v2882_v47, 127  ;;  %s2590_s15 = smov 83  }
 0x2ce   : > { %v1289_v49 = vsel %vm4786_vm5, %v1284_v3, %v1288_v2  ;;  %v1309_v43 = vsel %vm1295_vm14, %v1307_v13, 0.0  ;;  %v2373_v46 = vrot.slane %v2518_v33, 9  ;;  %vm1377_vm5 = vmand %vm4783_vm10, %vm3156_vm9 }
 0x2cf   : > { %v1291_v48 = vsel %vm1261_vm0, %v1289_v49, 0.0  ;;  %1701 = vrot.lane.b32.xlu1 %v2766_v27, %s2582_s12  ;;  %1686 = vrot.lane.b32.xlu2 %v2764_v26, %s2582_s12  ;;  %v1311_v30 = vmul.f32 %v1310_v37, %v1309_v43  ;;  %vm1329_vm0 = vmand %vm4783_vm10, %vm3009_vm8 }
 0x2d0   : > { %v1293_v44 = vmul.f32 %v1292_v42, %v1291_v48  ;;  %1684 = vrot.lane.b32.xlu0 %v2762_v19, %s2582_s12  ;;  %v1366_v42 = vstv %s3863_s16  ;;  %s4100_s16 = sld [smem:[#allocation3 + $0x50]] }
 0x2d1   : > { %v1331_v41 = vpop.permute.xlu1 %1330  ;;  %v3837_v61 = vpop.permute.xlu2 %1412 }
 0x2d2   : > { %v1294_v5 = vadd.f32 %v1293_v44, %v1278_v8  ;;  %v1314_v62 = vpop.permute.xlu0 %1313 }
 0x2d3   : > { %v1317_v45 = vsel %vm1300_vm2, %v1314_v62, %v3766_v51  ;;  %v1318_v25 = vsel %vm1300_vm2, %v3766_v51, %v1314_v62  ;;  %vm1363_vm2 = vmand %vm4783_vm10, %vm3093_vm11 }
 0x2d4   : > { %v1312_v17 = vadd.f32 %v1311_v30, %v1294_v5  ;;  %v1322_v31 = vrot.slane %v1317_v45, 6  ;;  %v1365_v13 = vsel %vm1363_vm2, %v2518_v33, 0.0  ;;  %v1374_v30 = vstv %s3867_s17  ;;  %s2388_s17 = sld [smem:[#allocation3 + $0x20]] }
 0x2d5   : > { %v1367_v45 = vmul.f32 %v1366_v42, %v1365_v13 }
 0x2d6   : > { %v1323_v24 = vsel %vm4787_vm6, %v1318_v25, %v1322_v31  ;;  %v1392_v31 = vstv %s3875_s20  ;;  %vm4789_vm6 = vmmov %vm4784_vm4  ;;  %s2389_s20 = sld [smem:[#allocation3 + $0x51]] }
 0x2d7   : > { %v1325_v39 = vsel %vm1295_vm14, %v1323_v24, 0.0  ;;  %1720 = vrot.lane.b32.xlu1 %v2764_v26, %s2583_s14  ;;  %1718 = vrot.lane.b32.xlu2 %v2762_v19, %s2583_s14  ;;  %vm4788_vm14 = vmmov %vm4784_vm4 }
 0x2d8   : > { %v1327_v51 = vmul.f32 %v1326_v58, %v1325_v39  ;;  %1703 = vrot.lane.b32.xlu0 %v2771_v28, %s2582_s12  ;;  %s2589_s12 = smov 93  }
 0x2d9   : > { %v1350_v56 = vpop.permute.xlu1 %1349  ;;  %v3861_v7 = vpop.permute.xlu2 %1431 }
 0x2da   : > { %v1328_v55 = vadd.f32 %v1327_v51, %v1312_v17  ;;  %v1351_v15 = vsel %vm1334_vm13, %v3781_v40, %v1350_v56  ;;  %v1352_v10 = vsel %vm1334_vm13, %v1350_v56, %v3781_v40  ;;  %v1333_v50 = vpop.permute.xlu0 %1332 }
 0x2db   : > { %v1356_v60 = vrot.slane %v1351_v15, 6  ;;  %v1335_v16 = vsel %vm1334_vm13, %v1331_v41, %v1333_v50  ;;  %v1336_v63 = vsel %vm1334_vm13, %v1333_v50, %v1331_v41  ;;  %v1373_v41 = vsel %vm1363_vm2, %v2373_v46, 0.0  ;;  %vm4790_vm2 = vmmov %vm4784_vm4 }
 0x2dc   : > { %v1340_v4 = vrot.slane %v1335_v16, 6  ;;  %v1375_v58 = vmul.f32 %v1374_v30, %v1373_v41  ;;  %vm1416_vm13 = vcmp.lt.s32.totalorder %v2882_v47, 126 }
 0x2dd   : > { %v1357_v8 = vsel %vm4784_vm4, %v1352_v10, %v1356_v60 }
 0x2de   : > { %v1341_v40 = vsel %vm4788_vm14, %v1336_v63, %v1340_v4  ;;  %v1359_v34 = vsel %vm1329_vm0, %v1357_v8, 0.0  ;;  %vm4791_vm14 = vmmov %vm4790_vm2 }
 0x2df   : > { %v1343_v3 = vsel %vm1329_vm0, %v1341_v40, 0.0  ;;  %1752 = vrot.lane.b32.xlu1 %v2762_v19, %s2584_s21  ;;  %1737 = vrot.lane.b32.xlu2 %v2771_v28, %s2583_s14  ;;  %v1361_v43 = vmul.f32 %v1360_v54, %v1359_v34  ;;  %vm1411_vm0 = vmand %vm4783_vm10, %vm3209_vm3  ;;  %v1408_v54 = vstv %s3915_s22  ;;  %v1426_v34 = vstv %s2376_s23  ;;  %s4152_s22 = sld [smem:[#allocation3 + $0x21]]  ;;  %s2592_s23 = smov 81  }
 0x2e0   : > { %v1345_v2 = vmul.f32 %v1344_v14, %v1343_v3  ;;  %1735 = vrot.lane.b32.xlu0 %v2766_v27, %s2583_s14  ;;  %s2386_s14 = sld [smem:[#allocation3 + $0x1f]] }
 0x2e1   : > { %v1396_v49 = vpop.permute.xlu1 %1395  ;;  %v3896_v37 = vpop.permute.xlu2 %1463 }
 0x2e2   : > { %v1346_v48 = vadd.f32 %v1345_v2, %v1328_v55  ;;  %v1379_v44 = vpop.permute.xlu0 %1378 }
 0x2e3   : > { %v1383_v5 = vsel %vm1382_vm12, %v1379_v44, %v3805_v52  ;;  %v1384_v62 = vsel %vm1382_vm12, %v3805_v52, %v1379_v44 }
 0x2e4   : > { %v1362_v25 = vadd.f32 %v1361_v43, %v1346_v48  ;;  %v1388_v17 = vrot.slane %v1384_v62, 6 }
 0x2e6   : > { %v1368_v24 = vadd.f32 %v1367_v45, %v1362_v25  ;;  %v1389_v39 = vsel %vm4789_vm6, %v1383_v5, %v1388_v17  ;;  %v1442_v5 = vstv %s2377_s25  ;;  %vm4792_vm6 = vmmov %vm4790_vm2  ;;  %s2391_s25 = sld [smem:[#allocation3 + $0x52]] }
 0x2e7   : > { %v1391_v52 = vsel %vm1377_vm5, %v1389_v39, 0.0  ;;  %1771 = vrot.lane.b32.xlu1 %v2771_v28, %s2584_s21  ;;  %1769 = vrot.lane.b32.xlu2 %v2766_v27, %s2584_s21 }
 0x2e8   : > { %v1376_v51 = vadd.f32 %v1375_v58, %v1368_v24  ;;  %v1393_v56 = vmul.f32 %v1392_v31, %v1391_v52  ;;  %1754 = vrot.lane.b32.xlu0 %v2764_v26, %s2584_s21  ;;  %s2591_s21 = smov 82  }
 0x2e9   : > { %v1415_v55 = vpop.permute.xlu1 %1414  ;;  %v3930_v15 = vpop.permute.xlu2 %1482 }
 0x2ea   : > { %v1394_v10 = vadd.f32 %v1393_v56, %v1376_v51  ;;  %v1417_v50 = vsel %vm1416_vm13, %v3837_v61, %v1415_v55  ;;  %v1418_v60 = vsel %vm1416_vm13, %v1415_v55, %v3837_v61  ;;  %v1398_v16 = vpop.permute.xlu0 %1397 }
 0x2eb   : > { %v1422_v63 = vrot.slane %v1418_v60, 6  ;;  %v1399_v4 = vsel %vm1382_vm12, %v1396_v49, %v1398_v16  ;;  %v1400_v8 = vsel %vm1382_vm12, %v1398_v16, %v1396_v49  ;;  %vm1450_vm12 = vcmp.lt.s32.totalorder %v2882_v47, 125 }
 0x2ec   : > { %v1404_v14 = vrot.slane %v1400_v8, 6  ;;  %v1476_v16 = vstv %s2379_s29  ;;  %s2394_s29 = sld [smem:[#allocation3 + $0x23]] }
 0x2ed   : > { %v1423_v40 = vsel %vm4784_vm4, %v1417_v50, %v1422_v63  ;;  %v1460_v50 = vstv %s3970_s27  ;;  %s2593_s27 = smov 80  }
 0x2ee   : > { %v1405_v61 = vsel %vm4790_vm2, %v1399_v4, %v1404_v14  ;;  %v1425_v33 = vsel %vm1411_vm0, %v1423_v40, 0.0 }
 0x2ef   : > { %v1407_v46 = vsel %vm1377_vm5, %v1405_v61, 0.0  ;;  %1803 = vrot.lane.b32.xlu1 %v2766_v27, %s2585_s26  ;;  %1788 = vrot.lane.b32.xlu2 %v2764_v26, %s2585_s26  ;;  %v1427_v42 = vmul.f32 %v1426_v34, %v1425_v33  ;;  %vm1445_vm5 = vmand %vm4783_vm10, %vm3267_vm15  ;;  %vm1484_vm10 = vcmp.lt.s32.totalorder %v2882_v47, 115 }
 0x2f0   : > { %v1409_v3 = vmul.f32 %v1408_v54, %v1407_v46  ;;  %1786 = vrot.lane.b32.xlu0 %v2762_v19, %s2585_s26 }
 0x2f1   : > { %v1447_v2 = vpop.permute.xlu1 %1446  ;;  %v3962_v13 = vpop.permute.xlu2 %1514 }
 0x2f2   : > { %v1410_v49 = vadd.f32 %v1409_v3, %v1394_v10  ;;  %v1430_v43 = vpop.permute.xlu0 %1429  ;;  %v1494_v3 = vstv %s2380_s30  ;;  %s2395_s30 = sld [smem:[#allocation3 + $0x54]] }
 0x2f3   : > { %v1433_v48 = vsel %vm1416_vm13, %v1430_v43, %v3861_v7  ;;  %v1434_v44 = vsel %vm1416_vm13, %v3861_v7, %v1430_v43  ;;  %vm4793_vm13 = vmmov %vm4790_vm2 }
 0x2f4   : > { %v1428_v41 = vadd.f32 %v1427_v42, %v1410_v49  ;;  %v1438_v30 = vrot.slane %v1434_v44, 6 }
 0x2f6   : > { %v1439_v62 = vsel %vm4791_vm14, %v1433_v48, %v1438_v30  ;;  %vm1518_vm14 = vcmp.lt.s32.totalorder %v2882_v47, 114 }
 0x2f7   : > { %v1441_v45 = vsel %vm1411_vm0, %v1439_v62, 0.0  ;;  %1822 = vrot.lane.b32.xlu1 %v2764_v26, %s2586_s28  ;;  %1820 = vrot.lane.b32.xlu2 %v2762_v19, %s2586_s28  ;;  %vm4794_vm0 = vnez %v4727_v53 }
 0x2f8   : > { %v1443_v7 = vmul.f32 %v1442_v5, %v1441_v45  ;;  %1805 = vrot.lane.b32.xlu0 %v2771_v28, %s2585_s26  ;;  %vm1479_vm4 = vmand %vm4794_vm0, %vm2943_vm1  ;;  %s2392_s26 = sld [smem:[#allocation3 + $0x22]] }
 0x2f9   : > { %v1466_v25 = vpop.permute.xlu1 %1465  ;;  %v3982_v17 = vpop.permute.xlu2 %1533 }
 0x2fa   : > { %v1444_v31 = vadd.f32 %v1443_v7, %v1428_v41  ;;  %v1467_v58 = vsel %vm1450_vm12, %v3896_v37, %v1466_v25  ;;  %v1468_v24 = vsel %vm1450_vm12, %v1466_v25, %v3896_v37  ;;  %v1449_v39 = vpop.permute.xlu0 %1448 }
 0x2fb   : > { %v1472_v52 = vrot.slane %v1468_v24, 6  ;;  %v1451_v51 = vsel %vm1450_vm12, %v1447_v2, %v1449_v39  ;;  %v1452_v56 = vsel %vm1450_vm12, %v1449_v39, %v1447_v2  ;;  %vm1513_vm12 = vmand %vm4794_vm0, %vm2988_vm7 }
 0x2fc   : > { %v1456_v55 = vrot.slane %v1452_v56, 6 }
 0x2fd   : > { %v1473_v10 = vsel %vm4792_vm6, %v1467_v58, %v1472_v52  ;;  %vm4796_vm6 = vmmov %vm4790_vm2  ;;  %v1528_v58 = vstv %s2382_s8  ;;  %s2595_s8 = smov 78  }
 0x2fe   : > { %v1457_v60 = vsel %vm4793_vm13, %v1451_v51, %v1456_v55  ;;  %v1475_v63 = vsel %vm1445_vm5, %v1473_v10, 0.0  ;;  %vm4797_vm13 = vmmov %vm4790_vm2 }
 0x2ff   : > { %v1459_v4 = vsel %vm1445_vm5, %v1457_v60, 0.0  ;;  %1854 = vrot.lane.b32.xlu1 %v2762_v19, %s2587_s6  ;;  %1839 = vrot.lane.b32.xlu2 %v2771_v28, %s2586_s28  ;;  %v1477_v14 = vmul.f32 %v1476_v16, %v1475_v63  ;;  %vm4795_vm5 = vmmov %vm4790_vm2 }
 0x300   : > { %v1461_v37 = vmul.f32 %v1460_v50, %v1459_v4  ;;  %1837 = vrot.lane.b32.xlu0 %v2766_v27, %s2586_s28  ;;  %s4191_s28 = sld [smem:[#allocation3 + $0x53]] }
 0x301   : > { %v1498_v18 = vpop.permute.xlu1 %1497  ;;  %v3997_v8 = vpop.permute.xlu2 %1565 }
 0x302   : > { %v1462_v40 = vadd.f32 %v1461_v37, %v1444_v31  ;;  %v1481_v54 = vpop.permute.xlu0 %1480  ;;  %v1510_v31 = vstv %s4009_s7  ;;  %v1544_v37 = vstv %s2383_s9  ;;  %s4243_s7 = sld [smem:[#allocation3 + $0x24]] }
 0x303   : > { %v1485_v61 = vsel %vm1484_vm10, %v1481_v54, %v3930_v15  ;;  %v1486_v34 = vsel %vm1484_vm10, %v3930_v15, %v1481_v54  ;;  %s2397_s9 = sld [smem:[#allocation3 + $0x55]] }
 0x304   : > { %v1478_v33 = vadd.f32 %v1477_v14, %v1462_v40  ;;  %v1490_v46 = vrot.slane %v1486_v34, 6 }
 0x306   : > { %v1491_v2 = vsel %vm4790_vm2, %v1485_v61, %v1490_v46 }
 0x307   : > { %v1493_v42 = vsel %vm1479_vm4, %v1491_v2, 0.0  ;;  %1873 = vrot.lane.b32.xlu1 %v2771_v28, %s2587_s6  ;;  %1871 = vrot.lane.b32.xlu2 %v2766_v27, %s2587_s6 }
 0x308   : > { %v1495_v15 = vmul.f32 %v1494_v3, %v1493_v42  ;;  %1856 = vrot.lane.b32.xlu0 %v2764_v26, %s2587_s6  ;;  %s2594_s6 = smov 79  }
 0x309   : > { %v1517_v49 = vpop.permute.xlu1 %1516  ;;  %v4021_v43 = vpop.permute.xlu2 %1584 }
 0x30a   : > { %v1496_v48 = vadd.f32 %v1495_v15, %v1478_v33  ;;  %v1519_v44 = vsel %vm1518_vm14, %v3962_v13, %v1517_v49  ;;  %v1520_v41 = vsel %vm1518_vm14, %v1517_v49, %v3962_v13  ;;  %v1500_v30 = vpop.permute.xlu0 %1499 }
 0x30b   : > { %v1524_v5 = vrot.slane %v1520_v41, 6  ;;  %v1501_v62 = vsel %vm1484_vm10, %v1498_v18, %v1500_v30  ;;  %v1502_v45 = vsel %vm1484_vm10, %v1500_v30, %v1498_v18  ;;  %vm1552_vm10 = vcmp.lt.s32.totalorder %v2882_v47, 113 }
 0x30c   : > { %v1506_v7 = vrot.slane %v1502_v45, 6  ;;  %v1578_v41 = vstv %s2385_s13  ;;  %s2400_s13 = sld [smem:[#allocation3 + $0x26]] }
 0x30d   : > { %v1525_v25 = vsel %vm4795_vm5, %v1519_v44, %v1524_v5  ;;  %vm1581_vm5 = vmand %vm4794_vm0, %vm3093_vm11 }
 0x30e   : > { %v1507_v13 = vsel %vm4796_vm6, %v1501_v62, %v1506_v7  ;;  %v1527_v24 = vsel %vm1513_vm12, %v1525_v25, 0.0  ;;  %vm4799_vm6 = vmmov %vm4790_vm2 }
 0x30f   : > { %v1509_v39 = vsel %vm1479_vm4, %v1507_v13, 0.0  ;;  %1905 = vrot.lane.b32.xlu1 %v2766_v27, %s2588_s10  ;;  %1890 = vrot.lane.b32.xlu2 %v2764_v26, %s2588_s10  ;;  %v1529_v55 = vmul.f32 %v1528_v58, %v1527_v24  ;;  %vm1547_vm4 = vmand %vm4794_vm0, %vm3009_vm8 }
 0x310   : > { %v1511_v52 = vmul.f32 %v1510_v31, %v1509_v39  ;;  %1888 = vrot.lane.b32.xlu0 %v2762_v19, %s2588_s10 }
 0x311   : > { %v1549_v51 = vpop.permute.xlu1 %1548  ;;  %v4053_v56 = vpop.permute.xlu2 %1616 }
 0x312   : > { %v1512_v10 = vadd.f32 %v1511_v52, %v1496_v48  ;;  %v1532_v50 = vpop.permute.xlu0 %1531  ;;  %v1562_v48 = vstv %s4061_s11  ;;  %v1596_v52 = vstv %s2386_s14  ;;  %s2596_s11 = smov 77   ;;  %s2401_s14 = sld [smem:[#allocation3 + $0x57]] }
 0x313   : > { %v1535_v60 = vsel %vm1518_vm14, %v1532_v50, %v3982_v17  ;;  %v1536_v16 = vsel %vm1518_vm14, %v3982_v17, %v1532_v50  ;;  %vm4798_vm14 = vmmov %vm4790_vm2 }
 0x314   : > { %v1530_v63 = vadd.f32 %v1529_v55, %v1512_v10  ;;  %v1540_v4 = vrot.slane %v1536_v16, 6 }
 0x316   : > { %v1541_v18 = vsel %vm4797_vm13, %v1535_v60, %v1540_v4  ;;  %vm1620_vm13 = vcmp.lt.s32.totalorder %v2882_v47, 111 }
 0x317   : > { %v1543_v14 = vsel %vm1513_vm12, %v1541_v18, 0.0  ;;  %1924 = vrot.lane.b32.xlu1 %v2764_v26, %s2589_s12  ;;  %1922 = vrot.lane.b32.xlu2 %v2762_v19, %s2589_s12  ;;  %vm1586_vm12 = vcmp.lt.s32.totalorder %v2882_v47, 112 }
 0x318   : > { %v1545_v17 = vmul.f32 %v1544_v37, %v1543_v14  ;;  %1907 = vrot.lane.b32.xlu0 %v2771_v28, %s2588_s10  ;;  %s2398_s10 = sld [smem:[#allocation3 + $0x25]] }
 0x319   : > { %v1568_v40 = vpop.permute.xlu1 %1567  ;;  %v4073_v54 = vpop.permute.xlu2 %1635 }
 0x31a   : > { %v1546_v61 = vadd.f32 %v1545_v17, %v1530_v63  ;;  %v1569_v34 = vsel %vm1552_vm10, %v3997_v8, %v1568_v40  ;;  %v1570_v33 = vsel %vm1552_vm10, %v1568_v40, %v3997_v8  ;;  %v1551_v46 = vpop.permute.xlu0 %1550 }
 0x31b   : > { %v1574_v3 = vrot.slane %v1570_v33, 6  ;;  %v1553_v2 = vsel %vm1552_vm10, %v1549_v51, %v1551_v46  ;;  %v1554_v42 = vsel %vm1552_vm10, %v1551_v46, %v1549_v51  ;;  %vm1615_vm10 = vmand %vm4794_vm0, %vm3156_vm9 }
 0x31c   : > { %v1558_v15 = vrot.slane %v1554_v42, 6 }
 0x31d   : > { %v1575_v49 = vsel %vm4790_vm2, %v1569_v34, %v1574_v3  ;;  %v1630_v34 = vstv %s2388_s17  ;;  %s4374_s17 = sld [smem:[#allocation3 + $0x28]] }
 0x31e   : > { %v1559_v44 = vsel %vm4798_vm14, %v1553_v2, %v1558_v15  ;;  %v1577_v30 = vsel %vm1547_vm4, %v1575_v49, 0.0  ;;  %vm4801_vm14 = vmmov %vm4790_vm2 }
 0x31f   : > { %v1561_v5 = vsel %vm1547_vm4, %v1559_v44, 0.0  ;;  %1956 = vrot.lane.b32.xlu1 %v2762_v19, %s2590_s15  ;;  %1941 = vrot.lane.b32.xlu2 %v2771_v28, %s2589_s12  ;;  %v1579_v7 = vmul.f32 %v1578_v41, %v1577_v30  ;;  %vm4800_vm4 = vmmov %vm4790_vm2 }
 0x320   : > { %v1563_v8 = vmul.f32 %v1562_v48, %v1561_v5  ;;  %1939 = vrot.lane.b32.xlu0 %v2766_v27, %s2589_s12  ;;  %s2399_s12 = sld [smem:[#allocation3 + $0x56]] }
 0x321   : > { %v1600_v62 = vpop.permute.xlu1 %1599  ;;  %v4088_v45 = vpop.permute.xlu2 %1667 }
 0x322   : > { %v1564_v25 = vadd.f32 %v1563_v8, %v1546_v61  ;;  %v1583_v31 = vpop.permute.xlu0 %1582  ;;  %v1612_v61 = vstv %s4100_s16  ;;  %v1646_v8 = vstv %s2389_s20  ;;  %s4370_s16 = sld [smem:[#allocation3 + $0x58]] }
 0x323   : > { %v1587_v13 = vsel %vm1586_vm12, %v1583_v31, %v4021_v43  ;;  %v1588_v58 = vsel %vm1586_vm12, %v4021_v43, %v1583_v31  ;;  %s4380_s20 = sld [smem:[#allocation3 + $0x59]] }
 0x324   : > { %v1580_v24 = vadd.f32 %v1579_v7, %v1564_v25  ;;  %v1592_v39 = vrot.slane %v1588_v58, 6 }
 0x326   : > { %v1593_v51 = vsel %vm4799_vm6, %v1587_v13, %v1592_v39  ;;  %vm4802_vm6 = vmmov %vm4790_vm2 }
 0x327   : > { %v1595_v55 = vsel %vm1581_vm5, %v1593_v51, 0.0  ;;  %1975 = vrot.lane.b32.xlu1 %v2771_v28, %s2590_s15  ;;  %1973 = vrot.lane.b32.xlu2 %v2766_v27, %s2590_s15 }
 0x328   : > { %v1597_v43 = vmul.f32 %v1596_v52, %v1595_v55  ;;  %1958 = vrot.lane.b32.xlu0 %v2764_v26, %s2590_s15  ;;  %s2402_s15 = sld [smem:[#allocation3 + $0x27]] }
 0x329   : > { %v1619_v10 = vpop.permute.xlu1 %1618  ;;  %v4112_v50 = vpop.permute.xlu2 %1686 }
 0x32a   : > { %v1598_v60 = vadd.f32 %v1597_v43, %v1580_v24  ;;  %v1621_v16 = vsel %vm1620_vm13, %v4053_v56, %v1619_v10  ;;  %v1622_v63 = vsel %vm1620_vm13, %v1619_v10, %v4053_v56  ;;  %v1602_v4 = vpop.permute.xlu0 %1601 }
 0x32b   : > { %v1626_v37 = vrot.slane %v1622_v63, 6  ;;  %v1603_v18 = vsel %vm1586_vm12, %v1600_v62, %v1602_v4  ;;  %v1604_v14 = vsel %vm1586_vm12, %v1602_v4, %v1600_v62  ;;  %vm1654_vm12 = vcmp.lt.s32.totalorder %v2882_v47, 110 }
 0x32c   : > { %v1608_v17 = vrot.slane %v1604_v14, 6  ;;  %v1680_v63 = vstv %s2391_s25  ;;  %s4472_s25 = sld [smem:[#allocation3 + $0x5b]] }
 0x32d   : > { %v1627_v40 = vsel %vm4800_vm4, %v1621_v16, %v1626_v37  ;;  %vm1683_vm4 = vmand %vm4794_vm0, %vm3267_vm15 }
 0x32e   : > { %v1609_v56 = vsel %vm4790_vm2, %v1603_v18, %v1608_v17  ;;  %v1629_v33 = vsel %vm1615_vm10, %v1627_v40, 0.0 }
 0x32f   : > { %v1611_v46 = vsel %vm1581_vm5, %v1609_v56, 0.0  ;;  %2007 = vrot.lane.b32.xlu1 %v2766_v27, %s2591_s21  ;;  %1992 = vrot.lane.b32.xlu2 %v2764_v26, %s2591_s21  ;;  %v1631_v15 = vmul.f32 %v1630_v34, %v1629_v33  ;;  %vm1649_vm5 = vmand %vm4794_vm0, %vm3209_vm3 }
 0x330   : > { %v1613_v3 = vmul.f32 %v1612_v61, %v1611_v46  ;;  %1990 = vrot.lane.b32.xlu0 %v2762_v19, %s2591_s21  ;;  %vm4807_vm0 = vmmov %vm4790_vm2 }
 0x331   : > { %v1651_v2 = vpop.permute.xlu1 %1650  ;;  %v4144_v42 = vpop.permute.xlu2 %1718 }
 0x332   : > { %v1614_v49 = vadd.f32 %v1613_v3, %v1598_v60  ;;  %v1634_v48 = vpop.permute.xlu0 %1633  ;;  %v1664_v60 = vstv %s4152_s22  ;;  %v1698_v3 = vstv %s2392_s26  ;;  %s4421_s22 = sld [smem:[#allocation3 + $0x5a]] }
 0x333   : > { %v1637_v44 = vsel %vm1620_vm13, %v1634_v48, %v4073_v54  ;;  %v1638_v41 = vsel %vm1620_vm13, %v4073_v54, %v1634_v48  ;;  %vm4803_vm13 = vmmov %vm4790_vm2  ;;  %s4481_s26 = sld [smem:[#allocation3 + $0x2b]] }
 0x334   : > { %v1632_v30 = vadd.f32 %v1631_v15, %v1614_v49  ;;  %v1642_v5 = vrot.slane %v1638_v41, 6 }
 0x336   : > { %v1643_v62 = vsel %vm4801_vm14, %v1637_v44, %v1642_v5  ;;  %vm1722_vm14 = vcmp.lt.s32.totalorder %v2882_v47, 99 }
 0x337   : > { %v1645_v7 = vsel %vm1615_vm10, %v1643_v62, 0.0  ;;  %2026 = vrot.lane.b32.xlu1 %v2764_v26, %s2592_s23  ;;  %2024 = vrot.lane.b32.xlu2 %v2762_v19, %s2592_s23  ;;  %vm1688_vm10 = vcmp.lt.s32.totalorder %v2882_v47, 109 }
 0x338   : > { %v1647_v54 = vmul.f32 %v1646_v8, %v1645_v7  ;;  %2009 = vrot.lane.b32.xlu0 %v2771_v28, %s2591_s21  ;;  %s4419_s21 = sld [smem:[#allocation3 + $0x29]] }
 0x339   : > { %v1670_v25 = vpop.permute.xlu1 %1669  ;;  %v4164_v31 = vpop.permute.xlu2 %1737 }
 0x33a   : > { %v1648_v13 = vadd.f32 %v1647_v54, %v1632_v30  ;;  %v1671_v58 = vsel %vm1654_vm12, %v4088_v45, %v1670_v25  ;;  %v1672_v24 = vsel %vm1654_vm12, %v1670_v25, %v4088_v45  ;;  %v1653_v39 = vpop.permute.xlu0 %1652 }
 0x33b   : > { %v1676_v52 = vrot.slane %v1672_v24, 6  ;;  %v1655_v51 = vsel %vm1654_vm12, %v1651_v2, %v1653_v39  ;;  %v1656_v55 = vsel %vm1654_vm12, %v1653_v39, %v1651_v2  ;;  %vm4804_vm12 = vnez %v4731_v38 }
 0x33c   : > { %v1660_v43 = vrot.slane %v1656_v55, 6 }
 0x33d   : > { %v1677_v10 = vsel %vm4802_vm6, %v1671_v58, %v1676_v52  ;;  %vm4805_vm6 = vmmov %vm4790_vm2  ;;  %v1732_v58 = vstv %s2394_s29  ;;  %s4542_s29 = sld [smem:[#allocation3 + $0x5d]] }
 0x33e   : > { %v1661_v16 = vsel %vm4803_vm13, %v1655_v51, %v1660_v43  ;;  %v1679_v4 = vsel %vm1649_vm5, %v1677_v10, 0.0  ;;  %vm4806_vm13 = vmmov %vm4790_vm2 }
 0x33f   : > { %v1663_v37 = vsel %vm1649_vm5, %v1661_v16, 0.0  ;;  %2058 = vrot.lane.b32.xlu1 %v2762_v19, %s2593_s27  ;;  %2043 = vrot.lane.b32.xlu2 %v2771_v28, %s2592_s23  ;;  %v1681_v17 = vmul.f32 %v1680_v63, %v1679_v4  ;;  %vm1717_vm5 = vmand %vm4804_vm12, %vm2943_vm1 }
 0x340   : > { %v1665_v45 = vmul.f32 %v1664_v60, %v1663_v37  ;;  %2041 = vrot.lane.b32.xlu0 %v2766_v27, %s2592_s23  ;;  %v1748_v37 = vstv %s2395_s30  ;;  %s4437_s23 = sld [smem:[#allocation3 + $0x2a]] }
 0x341   : > { %v1702_v18 = vpop.permute.xlu1 %1701  ;;  %v4179_v14 = vpop.permute.xlu2 %1769  ;;  %s4553_s30 = sld [smem:[#allocation3 + $0x2d]] }
 0x342   : > { %v1666_v40 = vadd.f32 %v1665_v45, %v1648_v13  ;;  %v1685_v61 = vpop.permute.xlu0 %1684  ;;  %v1714_v13 = vstv %s4191_s28  ;;  %s4528_s28 = sld [smem:[#allocation3 + $0x2c]] }
 0x343   : > { %v1689_v56 = vsel %vm1688_vm10, %v1685_v61, %v4112_v50  ;;  %v1690_v34 = vsel %vm1688_vm10, %v4112_v50, %v1685_v61 }
 0x344   : > { %v1682_v33 = vadd.f32 %v1681_v17, %v1666_v40  ;;  %v1694_v46 = vrot.slane %v1690_v34, 6 }
 0x346   : > { %v1695_v2 = vsel %vm4790_vm2, %v1689_v56, %v1694_v46  ;;  %vm4808_vm2 = vmmov %vm4807_vm0 }
 0x347   : > { %v1697_v15 = vsel %vm1683_vm4, %v1695_v2, 0.0  ;;  %2077 = vrot.lane.b32.xlu1 %v2771_v28, %s2593_s27  ;;  %2075 = vrot.lane.b32.xlu2 %v2766_v27, %s2593_s27 }
 0x348   : > { %v1699_v50 = vmul.f32 %v1698_v3, %v1697_v15  ;;  %2060 = vrot.lane.b32.xlu0 %v2764_v26, %s2593_s27  ;;  %s4497_s27 = sld [smem:[#allocation3 + $0x5c]] }
 0x349   : > { %v1721_v49 = vpop.permute.xlu1 %1720  ;;  %v4203_v48 = vpop.permute.xlu2 %1788 }
 0x34a   : > { %v1700_v44 = vadd.f32 %v1699_v50, %v1682_v33  ;;  %v1723_v41 = vsel %vm1722_vm14, %v4144_v42, %v1721_v49  ;;  %v1724_v30 = vsel %vm1722_vm14, %v1721_v49, %v4144_v42  ;;  %v1704_v5 = vpop.permute.xlu0 %1703  ;;  %v1766_v49 = vstv %s4243_s7  ;;  %s4589_s7 = sld [smem:[#allocation3 + $0x2e]] }
 0x34b   : > { %v1728_v8 = vrot.slane %v1724_v30, 6  ;;  %v1705_v62 = vsel %vm1688_vm10, %v1702_v18, %v1704_v5  ;;  %v1706_v7 = vsel %vm1688_vm10, %v1704_v5, %v1702_v18  ;;  %vm1756_vm10 = vcmp.lt.s32.totalorder %v2882_v47, 98 }
 0x34c   : > { %v1710_v54 = vrot.slane %v1706_v7, 6 }
 0x34d   : > { %v1729_v25 = vsel %vm4805_vm6, %v1723_v41, %v1728_v8  ;;  %v1782_v41 = vstv %s2397_s9  ;;  %vm1785_vm6 = vmand %vm4804_vm12, %vm3009_vm8  ;;  %s4619_s9 = sld [smem:[#allocation3 + $0x2f]] }
 0x34e   : > { %v1711_v42 = vsel %vm4806_vm13, %v1705_v62, %v1710_v54  ;;  %v1731_v24 = vsel %vm1717_vm5, %v1729_v25, 0.0  ;;  %vm4810_vm13 = vmmov %vm4807_vm0 }
 0x34f   : > { %v1713_v39 = vsel %vm1683_vm4, %v1711_v42, 0.0  ;;  %2109 = vrot.lane.b32.xlu1 %v2766_v27, %s2594_s6  ;;  %2094 = vrot.lane.b32.xlu2 %v2764_v26, %s2594_s6  ;;  %v1733_v43 = vmul.f32 %v1732_v58, %v1731_v24  ;;  %vm1751_vm4 = vmand %vm4804_vm12, %vm2988_vm7  ;;  %v1800_v24 = vstv %s2398_s10  ;;  %s4634_s10 = sld [smem:[#allocation3 + $0x60]] }
 0x350   : > { %v1715_v52 = vmul.f32 %v1714_v13, %v1713_v39  ;;  %2092 = vrot.lane.b32.xlu0 %v2762_v19, %s2594_s6 }
 0x351   : > { %v1753_v51 = vpop.permute.xlu1 %1752  ;;  %v4235_v55 = vpop.permute.xlu2 %1820 }
 0x352   : > { %v1716_v10 = vadd.f32 %v1715_v52, %v1700_v44  ;;  %v1736_v60 = vpop.permute.xlu0 %1735 }
 0x353   : > { %v1739_v53 = vsel %vm1722_vm14, %v1736_v60, %v4164_v31  ;;  %v1740_v16 = vsel %vm1722_vm14, %v4164_v31, %v1736_v60  ;;  %vm4809_vm14 = vmmov %vm4807_vm0 }
 0x354   : > { %v1734_v63 = vadd.f32 %v1733_v43, %v1716_v10  ;;  %v1744_v4 = vrot.slane %v1740_v16, 6 }
 0x356   : > { %v1745_v45 = vsel %vm4807_vm0, %v1739_v53, %v1744_v4  ;;  %vm1824_vm0 = vcmp.lt.s32.totalorder %v2882_v47, 96 }
 0x357   : > { %v1747_v18 = vsel %vm1717_vm5, %v1745_v45, 0.0  ;;  %2128 = vrot.lane.b32.xlu1 %v2764_v26, %s2595_s8  ;;  %2126 = vrot.lane.b32.xlu2 %v2762_v19, %s2595_s8  ;;  %vm1790_vm5 = vcmp.lt.s32.totalorder %v2882_v47, 97  ;;  %v1834_v45 = vstv %s2400_s13 }
 0x358   : > { %v1749_v31 = vmul.f32 %v1748_v37, %v1747_v18  ;;  %2111 = vrot.lane.b32.xlu0 %v2771_v28, %s2594_s6  ;;  %v1816_v37 = vstv %s2399_s12  ;;  %s4584_s6 = sld [smem:[#allocation3 + $0x5e]] }
 0x359   : > { %v1772_v17 = vpop.permute.xlu1 %1771  ;;  %v4255_v40 = vpop.permute.xlu2 %1839  ;;  %s2421_s12 = sld [smem:[#allocation3 + $0x61]] }
 0x35a   : > { %v1750_v61 = vadd.f32 %v1749_v31, %v1734_v63  ;;  %v1773_v56 = vsel %vm1756_vm10, %v4179_v14, %v1772_v17  ;;  %v1774_v34 = vsel %vm1756_vm10, %v1772_v17, %v4179_v14  ;;  %v1755_v33 = vpop.permute.xlu0 %1754 }
 0x35b   : > { %v1778_v46 = vrot.slane %v1774_v34, 6  ;;  %v1757_v3 = vsel %vm1756_vm10, %v1753_v51, %v1755_v33  ;;  %v1758_v2 = vsel %vm1756_vm10, %v1755_v33, %v1753_v51  ;;  %vm1819_vm10 = vmand %vm4804_vm12, %vm3093_vm11 }
 0x35c   : > { %v1762_v15 = vrot.slane %v1758_v2, 6 }
 0x35d   : > { %v1779_v50 = vsel %vm4808_vm2, %v1773_v56, %v1778_v46 }
 0x35e   : > { %v1763_v44 = vsel %vm4809_vm14, %v1757_v3, %v1762_v15  ;;  %v1781_v30 = vsel %vm1751_vm4, %v1779_v50, 0.0  ;;  %vm4812_vm14 = vmmov %vm4808_vm2 }
 0x35f   : > { %v1765_v5 = vsel %vm1751_vm4, %v1763_v44, 0.0  ;;  %2160 = vrot.lane.b32.xlu1 %v2762_v19, %s2596_s11  ;;  %2145 = vrot.lane.b32.xlu2 %v2771_v28, %s2595_s8  ;;  %v1783_v7 = vmul.f32 %v1782_v41, %v1781_v30  ;;  %vm4811_vm4 = vmmov %vm4808_vm2 }
 0x360   : > { %v1767_v14 = vmul.f32 %v1766_v49, %v1765_v5  ;;  %2143 = vrot.lane.b32.xlu0 %v2766_v27, %s2595_s8  ;;  %v1850_v49 = vstv %s2401_s14  ;;  %s4597_s8 = sld [smem:[#allocation3 + $0x5f]] }
 0x361   : > { %v1804_v8 = vpop.permute.xlu1 %1803  ;;  %v4270_v62 = vpop.permute.xlu2 %1871 }
 0x362   : > { %v1768_v54 = vadd.f32 %v1767_v14, %v1750_v61  ;;  %v1787_v25 = vpop.permute.xlu0 %1786 }
 0x363   : > { %v1791_v13 = vsel %vm1790_vm5, %v1787_v25, %v4203_v48  ;;  %v1792_v19 = vsel %vm1790_vm5, %v4203_v48, %v1787_v25 }
 0x364   : > { %v1784_v42 = vadd.f32 %v1783_v7, %v1768_v54  ;;  %v1796_v58 = vrot.slane %v1792_v19, 6  ;;  %v1868_v54 = vstv %s2402_s15  ;;  %s238_s15 = scalar_lea.vmem %s4695_s5, %s2425_s24 }
 0x366   : > { %v1797_v39 = vsel %vm4810_vm13, %v1791_v13, %v1796_v58  ;;  %vm4813_vm13 = vmmov %vm4808_vm2 }
 0x367   : > { %v1799_v52 = vsel %vm1785_vm6, %v1797_v39, 0.0  ;;  %2179 = vrot.lane.b32.xlu1 %v2771_v28, %s2596_s11  ;;  %2177 = vrot.lane.b32.xlu2 %v2766_v27, %s2596_s11 }
 0x368   : > { %v1801_v48 = vmul.f32 %v1800_v24, %v1799_v52  ;;  %2162 = vrot.lane.b32.xlu0 %v2764_v26, %s2596_s11  ;;  %s4648_s11 = sld [smem:[#allocation3 + $0x30]] }
 0x369   : > { %v1823_v51 = vpop.permute.xlu1 %1822  ;;  %v4298_v16 = vpop.permute.xlu2 %1890 }
 0x36a   : > { %v1802_v43 = vadd.f32 %v1801_v48, %v1784_v42  ;;  %v1825_v10 = vsel %vm1824_vm0, %v4235_v55, %v1823_v51  ;;  %v1826_v60 = vsel %vm1824_vm0, %v1823_v51, %v4235_v55  ;;  %v1806_v53 = vpop.permute.xlu0 %1805 }
 0x36b   : > { %v1830_v28 = vrot.slane %v1826_v60, 6  ;;  %v1807_v27 = vsel %vm1790_vm5, %v1804_v8, %v1806_v53  ;;  %v1808_v26 = vsel %vm1790_vm5, %v1806_v53, %v1804_v8  ;;  %vm1858_vm5 = vcmp.lt.s32.totalorder %v2882_v47, 95 }
 0x36c   : > { %v1812_v63 = vrot.slane %v1808_v26, 6 }
 0x36d   : > { %v1831_v4 = vsel %vm4811_vm4, %v1825_v10, %v1830_v28  ;;  %vm4814_vm4 = vmmov %vm4808_vm2 }
 0x36e   : > { %v1813_v55 = vsel %vm4808_vm2, %v1807_v27, %v1812_v63  ;;  %v1833_v18 = vsel %vm1819_vm10, %v1831_v4, 0.0  ;;  %vm1887_vm2 = vmand %vm4804_vm12, %vm3209_vm3 }
 0x36f   : > { %v1815_v31 = vsel %vm1785_vm6, %v1813_v55, 0.0  ;;  %v1835_v56 = vmul.f32 %v1834_v45, %v1833_v18  ;;  %vm1853_vm6 = vmand %vm4804_vm12, %vm3156_vm9 }
 0x370   : > { %v1817_v17 = vmul.f32 %v1816_v37, %v1815_v31 }
 0x371   : > { %v1855_v61 = vpop.permute.xlu1 %1854  ;;  %v4326_v50 = vpop.permute.xlu2 %1922 }
 0x372   : > { %v1818_v34 = vadd.f32 %v1817_v17, %v1802_v43  ;;  %v1838_v33 = vpop.permute.xlu0 %1837 }
 0x373   : > { %v1841_v46 = vsel %vm1824_vm0, %v1838_v33, %v4255_v40  ;;  %v1842_v3 = vsel %vm1824_vm0, %v4255_v40, %v1838_v33  ;;  %vm1892_vm0 = vcmp.lt.s32.totalorder %v2882_v47, 94 }
 0x374   : > { %v1836_v2 = vadd.f32 %v1835_v56, %v1818_v34  ;;  %v1846_v15 = vrot.slane %v1842_v3, 6 }
 0x376   : > { %v1847_v44 = vsel %vm4812_vm14, %v1841_v46, %v1846_v15  ;;  %vm4815_vm14 = vmmov %vm4814_vm4 }
 0x377   : > { %v1849_v41 = vsel %vm1819_vm10, %v1847_v44, 0.0  ;;  %vm1926_vm10 = vcmp.lt.s32.totalorder %v2882_v47, 93  ;;  %v1884_v44 = vstv %s4370_s16 }
 0x378   : > { %v1851_v30 = vmul.f32 %v1850_v49, %v1849_v41 }
 0x379   : > { %v1874_v5 = vpop.permute.xlu1 %1873  ;;  %v4344_v19 = vpop.permute.xlu2 %1941 }
 0x37a   : > { %v1852_v14 = vadd.f32 %v1851_v30, %v1836_v2  ;;  %v1857_v40 = vpop.permute.xlu0 %1856  ;;  %v1876_v37 = vsel %vm1858_vm5, %v1874_v5, %v4270_v62  ;;  %v1875_v33 = vsel %vm1858_vm5, %v4270_v62, %v1874_v5  ;;  %v1902_v30 = vstv %s4374_s17 }
 0x37b   : > { %v1860_v8 = vsel %vm1858_vm5, %v1857_v40, %v1855_v61  ;;  %v1859_v25 = vsel %vm1858_vm5, %v1855_v61, %v1857_v40  ;;  %v1880_v31 = vrot.slane %v1876_v37, 6  ;;  %vm1960_vm5 = vcmp.lt.s32.totalorder %v2882_v47, 83 }
 0x37c   : > { %v1864_v7 = vrot.slane %v1860_v8, 6 }
 0x37d   : > { %v1881_v3 = vsel %vm4814_vm4, %v1875_v33, %v1880_v31  ;;  %v1936_v33 = vstv %s4419_s21 }
 0x37e   : > { %v1865_v13 = vsel %vm4813_vm13, %v1859_v25, %v1864_v7  ;;  %vm4816_vm13 = vmmov %vm4814_vm4  ;;  %v1883_v41 = vsel %vm1853_vm6, %v1881_v3, 0.0 }
 0x37f   : > { %v1867_v42 = vsel %vm1853_vm6, %v1865_v13, 0.0  ;;  %vm1994_vm6 = vcmp.lt.s32.totalorder %v2882_v47, 82 }
 0x380   : > { %v1869_v58 = vmul.f32 %v1868_v54, %v1867_v42  ;;  %v1918_v54 = vstv %s4380_s20 }
 0x381   : > { %v1906_v24 = vpop.permute.xlu1 %1905  ;;  %v4351_v48 = vpop.permute.xlu2 %1973 }
 0x382   : > { %v1870_v39 = vadd.f32 %v1869_v58, %v1852_v14  ;;  %v1889_v52 = vpop.permute.xlu0 %1888  ;;  %v1885_v58 = vmul.f32 %v1884_v44, %v1883_v41  ;;  %v1970_v44 = vstv %s4437_s23 }
 0x383   : > { %v1894_v55 = vsel %vm1892_vm0, %v4298_v16, %v1889_v52  ;;  %v1893_v46 = vsel %vm1892_vm0, %v1889_v52, %v4298_v16 }
 0x384   : > { %v1898_v17 = vrot.slane %v1894_v55, 6  ;;  %v1886_v37 = vadd.f32 %v1885_v58, %v1870_v39 }
 0x386   : > { %v1899_v2 = vsel %vm4815_vm14, %v1893_v46, %v1898_v17 }
 0x387   : > { %v1901_v5 = vsel %vm1887_vm2, %v1899_v2, 0.0 }
 0x389   : > { %v1925_v51 = vpop.permute.xlu1 %1924  ;;  %v4353_v53 = vpop.permute.xlu2 %1992 }
 0x38a   : > { %v1908_v43 = vpop.permute.xlu0 %1907  ;;  %v1928_v15 = vsel %vm1926_vm10, %v1925_v51, %v4326_v50  ;;  %v1927_v52 = vsel %vm1926_vm10, %v4326_v50, %v1925_v51 }
 0x38b   : > { %v1910_v18 = vsel %vm1892_vm0, %v1908_v43, %v1906_v24  ;;  %v1909_v62 = vsel %vm1892_vm0, %v1906_v24, %v1908_v43  ;;  %v1932_v14 = vrot.slane %v1928_v15, 6  ;;  %v1903_v24 = vmul.f32 %v1902_v30, %v1901_v5  ;;  %vm1921_vm0 = vmand %vm4804_vm12, %vm3267_vm15 }
 0x38c   : > { %v1914_v34 = vrot.slane %v1910_v18, 6  ;;  %vm2028_vm12 = vcmp.lt.s32.totalorder %v2882_v47, 81 }
 0x38d   : > { %v1933_v55 = vsel %vm4814_vm4, %v1927_v52, %v1932_v14  ;;  %v1904_v50 = vadd.f32 %v1903_v24, %v1886_v37  ;;  %v1986_v24 = vstv %s4472_s25  ;;  %v2004_v37 = vstv %s4481_s26 }
 0x38e   : > { %v1915_v16 = vsel %vm4816_vm13, %v1909_v62, %v1914_v34 }
 0x38f   : > { %v1917_v25 = vsel %vm1887_vm2, %v1915_v16, 0.0  ;;  %vm4817_vm2 = vmmov %vm4814_vm4 }
 0x390   : > { %v1919_v18 = vmul.f32 %v1918_v54, %v1917_v25  ;;  %vm4819_vm13 = vmmov %vm4817_vm2 }
 0x391   : > { %v1957_v10 = vpop.permute.xlu1 %1956  ;;  %v4357_v26 = vpop.permute.xlu2 %2024 }
 0x392   : > { %v1940_v60 = vpop.permute.xlu0 %1939 }
 0x393   : > { %v1944_v49 = vsel %vm1926_vm10, %v4344_v19, %v1940_v60  ;;  %v1943_v31 = vsel %vm1926_vm10, %v1940_v60, %v4344_v19  ;;  %v1935_v19 = vsel %vm1921_vm0, %v1933_v55, 0.0  ;;  %vm4818_vm10 = vnez %v4739_v12 }
 0x394   : > { %v1948_v13 = vrot.slane %v1944_v49, 6  ;;  %vm1955_vm14 = vmand %vm4818_vm10, %vm2943_vm1  ;;  %v1920_v60 = vadd.f32 %v1919_v18, %v1904_v50  ;;  %v1937_v49 = vmul.f32 %v1936_v33, %v1935_v19  ;;  %v2020_v50 = vstv %s4497_s27 }
 0x395   : > { %vm1989_vm4 = vmand %vm4818_vm10, %vm2988_vm7  ;;  %vm2096_vm1 = vcmp.lt.s32.totalorder %v2882_v47, 79 }
 0x396   : > { %v1949_v17 = vsel %vm4817_vm2, %v1943_v31, %v1948_v13  ;;  %v1938_v14 = vadd.f32 %v1937_v49, %v1920_v60  ;;  %vm2023_vm7 = vmand %vm4818_vm10, %vm3009_vm8  ;;  %v2054_v49 = vstv %s4542_s29 }
 0x397   : > { %v1951_v46 = vsel %vm1921_vm0, %v1949_v17, 0.0  ;;  %vm4820_vm0 = vmmov %vm4817_vm2 }
 0x398   : > { %vm4821_vm2 = vmmov %vm4820_vm0 }
 0x399   : > { %v4355_v28 = vpop.permute.xlu1 %1975  ;;  %v4372_v45 = vpop.permute.xlu2 %2043  ;;  %vm2057_vm8 = vmand %vm4818_vm10, %vm3093_vm11 }
 0x39a   : > { %v1959_v27 = vpop.permute.xlu0 %1958  ;;  %v1978_v39 = vsel %vm1960_vm5, %v4355_v28, %v4351_v48  ;;  %vm2125_vm11 = vmand %vm4818_vm10, %vm3209_vm3 }
 0x39b   : > { %v1962_v40 = vsel %vm1960_vm5, %v1959_v27, %v1957_v10  ;;  %v1961_v51 = vsel %vm1960_vm5, %v1957_v10, %v1959_v27  ;;  %v1952_v27 = vstv %s4421_s22  ;;  %v1982_v15 = vrot.slane %v1978_v39, 6  ;;  %vm2159_vm3 = vmand %vm4818_vm10, %vm3267_vm15 }
 0x39c   : > { %v1966_v43 = vrot.slane %v1962_v40, 6  ;;  %v1953_v30 = vmul.f32 %v1952_v27, %v1951_v46  ;;  %v1977_v40 = vsel %vm1960_vm5, %v4351_v48, %v4355_v28  ;;  %vm4822_vm5 = vmmov %vm4820_vm0 }
 0x39d   : > { %v1983_v25 = vsel %vm4820_vm0, %v1977_v40, %v1982_v15  ;;  %v2038_v15 = vstv %s4528_s28 }
 0x39e   : > { %v1967_v10 = vsel %vm4819_vm13, %v1961_v51, %v1966_v43  ;;  %vm2062_vm13 = vcmp.lt.s32.totalorder %v2882_v47, 80  ;;  %v1985_v43 = vsel %vm1955_vm14, %v1983_v25, 0.0 }
 0x39f   : > { %v1969_v38 = vsel %vm1955_vm14, %v1967_v10, 0.0  ;;  %v1987_v51 = vmul.f32 %v1986_v24, %v1985_v43  ;;  %vm4824_vm14 = vmmov %vm4820_vm0 }
 0x3a0   : > { %v1971_v13 = vmul.f32 %v1970_v44, %v1969_v38 }
 0x3a1   : > { %v4359_v63 = vpop.permute.xlu1 %2007  ;;  %v4425_v8 = vpop.permute.xlu2 %2075 }
 0x3a2   : > { %v4361_v4 = vpop.permute.xlu0 %1990 }
 0x3a3   : > { %v1996_v34 = vsel %vm1994_vm6, %v4353_v53, %v4361_v4  ;;  %v1995_v54 = vsel %vm1994_vm6, %v4361_v4, %v4353_v53  ;;  %v1954_v4 = vadd.f32 %v1953_v30, %v1938_v14  ;;  %v2072_v14 = vstv %s4553_s30 }
 0x3a4   : > { %v2000_v62 = vrot.slane %v1996_v34, 6 }
 0x3a5   : > { %v1972_v18 = vadd.f32 %v1971_v13, %v1954_v4 }
 0x3a6   : > { %v2001_v58 = vsel %vm4821_vm2, %v1995_v54, %v2000_v62 }
 0x3a7   : > { %v1988_v60 = vadd.f32 %v1987_v51, %v1972_v18  ;;  %v2106_v18 = vstv %s4589_s7 }
 0x3a9   : > { %v4378_v61 = vpop.permute.xlu1 %2026  ;;  %v4495_v41 = vpop.permute.xlu2 %2094 }
 0x3aa   : > { %v4382_v56 = vpop.permute.xlu0 %2009  ;;  %v2030_v48 = vsel %vm2028_vm12, %v4378_v61, %v4357_v26  ;;  %v2029_v19 = vsel %vm2028_vm12, %v4357_v26, %v4378_v61 }
 0x3ab   : > { %v2012_v3 = vsel %vm1994_vm6, %v4382_v56, %v4359_v63  ;;  %v2011_v53 = vsel %vm1994_vm6, %v4359_v63, %v4382_v56  ;;  %v2003_v63 = vsel %vm1989_vm4, %v2001_v58, 0.0  ;;  %v2034_v31 = vrot.slane %v2030_v48, 6  ;;  %vm4823_vm6 = vmmov %vm4820_vm0 }
 0x3ac   : > { %v2016_v5 = vrot.slane %v2012_v3, 6  ;;  %v2005_v34 = vmul.f32 %v2004_v37, %v2003_v63  ;;  %v2088_v63 = vstv %s4584_s6 }
 0x3ad   : > { %v2035_v27 = vsel %vm4823_vm6, %v2029_v19, %v2034_v31 }
 0x3ae   : > { %v2017_v52 = vsel %vm4822_vm5, %v2011_v53, %v2016_v5  ;;  %v2006_v61 = vadd.f32 %v2005_v34, %v1988_v60  ;;  %v2037_v62 = vsel %vm2023_vm7, %v2035_v27, 0.0 }
 0x3af   : > { %v2019_v39 = vsel %vm1989_vm4, %v2017_v52, 0.0  ;;  %v2039_v25 = vmul.f32 %v2038_v15, %v2037_v62  ;;  %vm4826_vm4 = vmmov %vm4821_vm2 }
 0x3b0   : > { %v2021_v46 = vmul.f32 %v2020_v50, %v2019_v39  ;;  %vm2091_vm2 = vmand %vm4818_vm10, %vm3156_vm9  ;;  %v2122_v39 = vstv %s4597_s8 }
 0x3b1   : > { %v4427_v7 = vpop.permute.xlu1 %2058  ;;  %v2127_v10 = vpop.permute.xlu2 %2126  ;;  %vm4827_vm5 = vmmov %vm4826_vm4 }
 0x3b2   : > { %v4435_v42 = vpop.permute.xlu0 %2041  ;;  %vm4829_vm9 = vmmov %vm4826_vm4 }
 0x3b3   : > { %v2046_v28 = vsel %vm2028_vm12, %v4372_v45, %v4435_v42  ;;  %v2045_v32 = vsel %vm2028_vm12, %v4435_v42, %v4372_v45  ;;  %vm4825_vm12 = vmmov %vm4820_vm0  ;;  %vm2130_vm0 = vcmp.lt.s32.totalorder %v2882_v47, 78 }
 0x3b4   : > { %v2050_v17 = vrot.slane %v2046_v28, 6 }
 0x3b6   : > { %v2051_v3 = vsel %vm4824_vm14, %v2045_v32, %v2050_v17 }
 0x3b7   : > { %v2053_v44 = vsel %vm2023_vm7, %v2051_v3, 0.0  ;;  %vm2164_vm7 = vcmp.lt.s32.totalorder %v2882_v47, 77 }
 0x3b8   : > { %v2055_v13 = vmul.f32 %v2054_v49, %v2053_v44 }
 0x3b9   : > { %v4487_v2 = vpop.permute.xlu1 %2077  ;;  %v2146_v43 = vpop.permute.xlu2 %2145 }
 0x3ba   : > { %v2061_v16 = vpop.permute.xlu0 %2060  ;;  %v2080_v26 = vsel %vm2062_vm13, %v4487_v2, %v4425_v8  ;;  %v2079_v48 = vsel %vm2062_vm13, %v4425_v8, %v4487_v2 }
 0x3bb   : > { %v2064_v56 = vsel %vm2062_vm13, %v2061_v16, %v4427_v7  ;;  %v2063_v45 = vsel %vm2062_vm13, %v4427_v7, %v2061_v16  ;;  %v2022_v16 = vadd.f32 %v2021_v46, %v2006_v61  ;;  %v2084_v38 = vrot.slane %v2080_v26, 6  ;;  %vm4828_vm13 = vmmov %vm4826_vm4 }
 0x3bc   : > { %v2068_v33 = vrot.slane %v2064_v56, 6  ;;  %v2156_v61 = vstv %s4634_s10 }
 0x3bd   : > { %v2040_v28 = vadd.f32 %v2039_v25, %v2022_v16  ;;  %v2085_v4 = vsel %vm4826_vm4, %v2079_v48, %v2084_v38 }
 0x3be   : > { %v2069_v42 = vsel %vm4825_vm12, %v2063_v45, %v2068_v33  ;;  %v2087_v56 = vsel %vm2057_vm8, %v2085_v4, 0.0  ;;  %v2140_v45 = vstv %s4619_s9 }
 0x3bf   : > { %v2071_v40 = vsel %vm2057_vm8, %v2069_v42, 0.0  ;;  %v2089_v34 = vmul.f32 %v2088_v63, %v2087_v56 }
 0x3c0   : > { %v2073_v24 = vmul.f32 %v2072_v14, %v2071_v40  ;;  %v2174_v40 = vstv %s4648_s11 }
 0x3c1   : > { %v2110_v55 = vpop.permute.xlu1 %2109  ;;  %v2178_v26 = vpop.permute.xlu2 %2177 }
 0x3c2   : > { %v2093_v6 = vpop.permute.xlu0 %2092 }
 0x3c3   : > { %v2098_v59 = vsel %vm2096_vm1, %v4495_v41, %v2093_v6  ;;  %v2097_v53 = vsel %vm2096_vm1, %v2093_v6, %v4495_v41  ;;  %v2056_v41 = vadd.f32 %v2055_v13, %v2040_v28 }
 0x3c4   : > { %v2102_v30 = vrot.slane %v2098_v59, 6 }
 0x3c5   : > { %v2074_v17 = vadd.f32 %v2073_v24, %v2056_v41 }
 0x3c6   : > { %v2103_v52 = vsel %vm4827_vm5, %v2097_v53, %v2102_v30 }
 0x3c7   : > { %v2105_v31 = vsel %vm2091_vm2, %v2103_v52, 0.0  ;;  %v2090_v27 = vadd.f32 %v2089_v34, %v2074_v17 }
 0x3c8   : > { %v2107_v33 = vmul.f32 %v2106_v18, %v2105_v31 }
 0x3c9   : > { %v2129_v7 = vpop.permute.xlu1 %2128 }
 0x3ca   : > { %v2112_v5 = vpop.permute.xlu0 %2111  ;;  %v2132_v8 = vsel %vm2130_vm0, %v2129_v7, %v2127_v10  ;;  %v2131_v32 = vsel %vm2130_vm0, %v2127_v10, %v2129_v7  ;;  %v2108_v10 = vadd.f32 %v2107_v33, %v2090_v27 }
 0x3cb   : > { %v2114_v54 = vsel %vm2096_vm1, %v2112_v5, %v2110_v55  ;;  %v2113_v2 = vsel %vm2096_vm1, %v2110_v55, %v2112_v5  ;;  %v2136_v6 = vrot.slane %v2132_v8, 6  ;;  %vm4830_vm1 = vmmov %vm4826_vm4 }
 0x3cc   : > { %v2118_v58 = vrot.slane %v2114_v54, 6  ;;  %vm4831_vm6 = vmmov %vm4830_vm1 }
 0x3cd   : > { %v2137_v11 = vsel %vm4829_vm9, %v2131_v32, %v2136_v6  ;;  %vm4832_vm14 = vmmov %vm4830_vm1 }
 0x3ce   : > { %v2119_v37 = vsel %vm4828_vm13, %v2113_v2, %v2118_v58  ;;  %v2139_v59 = vsel %vm2125_vm11, %v2137_v11, 0.0  ;;  %v2190_v58 = vstv %s2421_s12 }
 0x3cf   : > { %v2121_v29 = vsel %vm2091_vm2, %v2119_v37, 0.0  ;;  %v2141_v16 = vmul.f32 %v2140_v45, %v2139_v59 }
 0x3d0   : > { %v2123_v46 = vmul.f32 %v2122_v39, %v2121_v29 }
 0x3d1   : > { %v2161_v55 = vpop.permute.xlu1 %2160 }
 0x3d2   : > { %v2144_v50 = vpop.permute.xlu0 %2143  ;;  %v2124_v57 = vadd.f32 %v2123_v46, %v2108_v10 }
 0x3d3   : > { %v2148_v51 = vsel %vm2130_vm0, %v2146_v43, %v2144_v50  ;;  %v2147_v60 = vsel %vm2130_vm0, %v2144_v50, %v2146_v43 }
 0x3d4   : > { %v2152_v19 = vrot.slane %v2148_v51, 6  ;;  %v2142_v25 = vadd.f32 %v2141_v16, %v2124_v57 }
 0x3d6   : > { %v2153_v3 = vsel %vm4830_vm1, %v2147_v60, %v2152_v19 }
 0x3d7   : > { %v2155_v42 = vsel %vm2125_vm11, %v2153_v3, 0.0 }
 0x3d8   : > { %v2157_v38 = vmul.f32 %v2156_v61, %v2155_v42 }
 0x3d9   : > { %v2180_v15 = vpop.permute.xlu1 %2179 }
 0x3da   : > { %v2182_v62 = vsel %vm2164_vm7, %v2180_v15, %v2178_v26  ;;  %v2163_v49 = vpop.permute.xlu0 %2162  ;;  %v2181_v30 = vsel %vm2164_vm7, %v2178_v26, %v2180_v15  ;;  %v2158_v9 = vadd.f32 %v2157_v38, %v2142_v25 }
 0x3db   : > { %v2186_v44 = vrot.slane %v2182_v62, 6  ;;  %v2166_v7 = vsel %vm2164_vm7, %v2163_v49, %v2161_v55  ;;  %v2165_v54 = vsel %vm2164_vm7, %v2161_v55, %v2163_v49 }
 0x3dc   : > { %v2170_v5 = vrot.slane %v2166_v7, 6 }
 0x3dd   : > { %v2187_v14 = vsel %vm4831_vm6, %v2181_v30, %v2186_v44 }
 0x3de   : > { %v2171_v13 = vsel %vm4832_vm14, %v2165_v54, %v2170_v5  ;;  %v2189_v48 = vsel %vm2159_vm3, %v2187_v14, 0.0 }
 0x3df   : > { %v2173_v53 = vsel %vm2159_vm3, %v2171_v13, 0.0  ;;  %v2191_v12 = vmul.f32 %v2190_v58, %v2189_v48 }
 0x3e0   : > { %v2175_v28 = vmul.f32 %v2174_v40, %v2173_v53 }
 0x3e2   : > { %v2176_v4 = vadd.f32 %v2175_v28, %v2158_v9 }
 0x3e4   : > { %v2192_v24 = vadd.f32 %v2191_v12, %v2176_v4 }
 0x3e6   : > { %v2422_v52 = vmul.f32 -1.442695, %v2192_v24 }
 0x3e8   : > { %2514 = vpow2.f32 %v2422_v52 }
 0x3ee   : > { %v2515_v43 = vpop.eup %2514 }
 0x3ef   : > { %v2196_v8 = vadd.f32 1.0, %v2515_v43 }
 0x3f1   : > { %2516 = vrcp.f32 %v2196_v8  ;;  %v2208_v37 = vand.u32 2147483648, %v2196_v8  ;;  %v2206_v56 = vand.u32 2147483647, %v2196_v8  ;;  %vm2202_vm10 = vweird.f32 %v2196_v8 }
 0x3f3   : > { %v2209_v31 = vor.u32 1.1754944e-38, %v2208_v37  ;;  %vm2207_vm12 = vcmp.eq.f32.partialorder %v2206_v56, 8.507059e+37 }
 0x3f7   : > { %v2517_v2 = vpop.eup %2516 }
 0x3f8   : > { %v2198_v41 = vmul.f32 %v2517_v2, %v2196_v8  ;;  %vm2203_vm15 = vweird.f32 %v2517_v2 }
 0x3f9   : > { %vm2204_vm8 = vmor %vm2202_vm10, %vm2203_vm15 }
 0x3fa   : > { %v2199_v47 = vsub.f32 1.0, %v2198_v41 }
 0x3fc   : > { %v2200_v63 = vmul.f32 %v2517_v2, %v2199_v47 }
 0x3fe   : > { %v2201_v18 = vadd.f32 %v2517_v2, %v2200_v63 }
 0x400   : > { %v2205_v55 = vsel %vm2204_vm8, %v2517_v2, %v2201_v18 }
 0x401   : > { %v2210_v17 = vsel %vm2207_vm12, %v2209_v31, %v2205_v55 }
 0x402   : > { %v2213_v6 = vperm.slane %v2210_v17, 0  ;;  %v2214_v50 = vperm.slane %v2210_v17, 2 }
 0x404   : > { %v2217_v39 = vperm.slane %v2213_v6, 0  ;;  %v2218_v29 = vperm.slane %v2214_v50, 0 }
 0x406   : > { %v2219_v51 = vmul.f32 %v2217_v39, %v2728_v22  ;;  %v2220_v34 = vmul.f32 %v2218_v29, %v2731_v23  ;;  %v2221_v33 = vmul.f32 %v2217_v39, %v2722_v20  ;;  %v2222_v19 = vmul.f32 %v2218_v29, %v2725_v21 }
 0x407   : > { %v2223_v32 = vmul.f32 %v2217_v39, %v2738_v0  ;;  %v2224_v60 = vmul.f32 %v2218_v29, %v2741_v1  ;;  %v2225_v27 = vmul.f32 %v2217_v39, %v2746_v35  ;;  %v2226_v11 = vmul.f32 %v2218_v29, %v2749_v36 }
 0x408   : > { %2227 = vst [vmem:[%s238_s15] sm:$0xff] %v2219_v51 }
 0x409   : > { %2228 = vst [vmem:[%s238_s15 + $0x8] sm:$0xff] %v2220_v34 }
 0x40a   : > { %2229 = vst [vmem:[%s238_s15 + $0x10] sm:$0xff] %v2221_v33 }
 0x40b   : > { %2230 = vst [vmem:[%s238_s15 + $0x18] sm:$0xff] %v2222_v19 }
 0x40c   : > { %2231 = vst [vmem:[%s238_s15 + $0x20] sm:$0xff] %v2223_v32 }
 0x40d   : > { %2232 = vst [vmem:[%s238_s15 + $0x28] sm:$0xff] %v2224_v60 }
 0x40e   : > { %2233 = vst [vmem:[%s238_s15 + $0x30] sm:$0xff] %v2225_v27 }
 0x40f   : > { %2234 = vst [vmem:[%s238_s15 + $0x38] sm:$0xff] %v2226_v11 }
 0x410 PF: > { %s16_s18 = sadd.s32 1, %s2544_s18  }
 0x411   : > { %p13_p7 = scmp.ge.s32.totalorder %s16_s18, 4  }
 0x413   :  { %15 = sbr.rel (!%p13_p7) target bundleno = 1 (0x1), region = 76 }
 0x418   :  { %2256 = vsyncpa [#allocation4], 1 }
 0x419   :  { %2258 = vsyncpa [#allocation4 + $0x1], 1 }

</bundles_post_ra>
